<compile_context>
chip_gen: v5e
topology: v5e:2x2
jax: 0.10.0
libtpu: 0.0.40
codegen_flags: <defaults>
</compile_context>

<pallas_src>
import jax
import jax.numpy as jnp
from jax.experimental import pallas as pl
from jax.experimental.pallas import tpu as pltpu

NEG_SLOPE = 0.01   # nn.LeakyReLU default
BN_EPS = 1e-5      # nn.BatchNorm1d default
LANE = 128         # TPU lane width; all channel dims zero-padded to this

# Fixed internal lengths (Upsample(256) normalizes the sequence length):
L_UP = 256                      # after nn.Upsample(256)
L_C1 = (L_UP - 3) // 2 + 1      # 127, after Conv1d(k=3, s=2)
L_P1 = L_C1 // 3                # 42,  after MaxPool1d(3)
L_C2 = (L_P1 - 3) // 2 + 1      # 20,  after Conv1d(k=3, s=2)
L_P2 = L_C2 // 2                # 10,  after MaxPool1d(2)


def _rup(n, m=LANE):
    return ((n + m - 1) // m) * m


def _leaky(x):
    return jnp.where(x > 0, x, NEG_SLOPE * x)


def _runs(indices):
    """Group a non-decreasing index list into (src, dst_start, length) runs."""
    out, start = [], 0
    for i in range(1, len(indices) + 1):
        if i == len(indices) or indices[i] != indices[start]:
            out.append((int(indices[start]), start, i - start))
            start = i
    return out


# ----------------------------------------------------------------------------
# Fused forward pass
# ----------------------------------------------------------------------------
def cnn_forward(params, x_ncl, *, block_b=8):
    """x_ncl: (B, num_channels, L) — PyTorch Conv1d layout. Returns (B, num_classes)."""
    B, c_in, L = x_ncl.shape
    num_classes = params["fc3_w"].shape[1]
    assert num_classes <= LANE, "output packing assumes num_classes <= 128"
    cin_p = _rup(c_in)
    f32, bf16 = jnp.float32, jnp.bfloat16

    # --- static geometry of the first block (only part that depends on L) ---
    L0 = L + 1                      # Conv1d(k=2, padding=1) output length
    P0 = L0 // 2                    # MaxPool1d(2) output length
    assert P0 >= 1, "input too short"
    # nearest Upsample(256): dst i -> src (i*P0)//256.  Split outputs into
    # even/odd streams (de-interleave at write) so conv_1's stride-2 tap reads
    # become contiguous sublane slices.
    runs_even = _runs([((2 * j) * P0) // L_UP for j in range(L_UP // 2)])
    runs_odd = _runs([((2 * j + 1) * P0) // L_UP for j in range(L_UP // 2)])
    # TODO(synk): for very long inputs (P0 >= 256) the runs degenerate to 256
    # single-row writes; an SMEM index table + per-row copy would scale better.

    # --- batch blocking: whole batch in one step if small, else blocks of 8 ---
    bblk = B if B <= block_b else block_b
    assert bblk == B or bblk % 8 == 0
    n_steps = -(-B // bblk)
    b_pad = n_steps * bblk

    # --- operand packing (tiny plain-JAX preprocessing, once per call) ---
    x = jnp.transpose(x_ncl, (0, 2, 1)).astype(f32)                    # (B, L, Cin)
    x = jnp.pad(x, ((0, b_pad - B), (1, 1), (0, cin_p - c_in)))        # (b_pad, L+2, cin_p)

    def conv_taps(w, cin_pad):                                         # torch (Cout, Cin, K)
        t = jnp.transpose(w, (2, 1, 0)).astype(f32)                    # (K, Cin, Cout)
        t = jnp.pad(t, ((0, 0), (0, cin_pad - t.shape[1]), (0, LANE - t.shape[2])))
        return t.astype(bf16)

    w0 = conv_taps(params["conv0_w"], cin_p)                           # (2, cin_p, 128) bf16
    w1 = conv_taps(params["conv1_w"], LANE)                            # (3, 128, 128) bf16
    w2 = conv_taps(params["conv2_w"], LANE)                            # (3, 128, 128) bf16

    # fc1: fold torch's C-major Flatten into a per-position weight stack
    f1 = params["fc1_w"].astype(f32).reshape(32, L_P2, 80)             # [c, l, o]
    f1 = jnp.transpose(f1, (1, 0, 2))                                  # [l, c, o]
    f1 = jnp.pad(f1, ((0, 0), (0, LANE - 32), (0, LANE - 80))).astype(bf16)
    f2 = jnp.pad(params["fc2_w"].astype(f32),
                 ((0, LANE - 80), (0, LANE - 32))).astype(bf16)
    f3 = jnp.pad(params["fc3_w"].astype(f32),
                 ((0, LANE - 32), (0, LANE - num_classes))).astype(bf16)

    def bn_fold(gamma, beta, mean, var):
        s = gamma / jnp.sqrt(var + BN_EPS)
        return s, beta - mean * s

    def pad_vec(v, fill=0.0):
        return jnp.pad(v.astype(f32), (0, LANE - v.shape[0]), constant_values=fill)

    sc0, sh0 = bn_fold(*params["bn0"])
    sc1, sh1 = bn_fold(*params["bn1"])
    sc2, sh2 = bn_fold(*params["bn2"])
    # Packed per-channel vectors (12, 128).  Biases / BN shifts in padded lanes
    # MUST be 0 so padded lanes stay exactly 0 downstream.
    vecs = jnp.stack([
        pad_vec(params["conv0_b"]), pad_vec(sc0), pad_vec(sh0),
        pad_vec(params["conv1_b"]), pad_vec(sc1, 1.0), pad_vec(sh1),
        pad_vec(params["conv2_b"]), pad_vec(sc2, 1.0), pad_vec(sh2),
        pad_vec(params["fc1_b"]), pad_vec(params["fc2_b"]), pad_vec(params["fc3_b"]),
    ])                                                                  # (12, 128)

    # --- the fused kernel: bblk samples per grid step ---
    def kernel(x_ref, w0_ref, w1_ref, w2_ref, f1_ref, f2_ref, f3_ref, vec_ref,
               o_ref, a0, up, a1, p1, a2, x3):
        def mm(a, w):   # bf16 x bf16 MXU matmul, f32 accumulation
            return jnp.dot(a.astype(jnp.bfloat16), w,
                           preferred_element_type=jnp.float32)

        b0, s0, t0 = vec_ref[0:1, :], vec_ref[1:2, :], vec_ref[2:3, :]
        b1, s1, t1 = vec_ref[3:4, :], vec_ref[4:5, :], vec_ref[5:6, :]
        b2, s2, t2 = vec_ref[6:7, :], vec_ref[7:8, :], vec_ref[8:9, :]
        fb1, fb2, fb3 = vec_ref[9:10, :], vec_ref[10:11, :], vec_ref[11:12, :]

        # ---- conv stages: per-sample loop (scratch reused across samples) ----
        for b in range(bblk):
            # upsample block: Conv1d(cin,128,k=2,pad=1) ; LeakyReLU∘MaxPool(2) ; BN
            a0[...] = mm(x_ref[b, 0:L0, :], w0_ref[0])
            a0[...] += mm(x_ref[b, 1:L0 + 1, :], w0_ref[1])
            pool0 = _leaky(jnp.maximum(a0[pl.ds(0, P0, stride=2), :],
                                       a0[pl.ds(1, P0, stride=2), :]) + b0)
            pool0 = pool0 * s0 + t0                                     # (P0, 128)
            # Upsample(256, nearest) -> even/odd streams (broadcast writes)
            for src, dst, ln in runs_even:
                up[0, dst:dst + ln, :] = jnp.broadcast_to(pool0[src:src + 1, :], (ln, LANE))
            for src, dst, ln in runs_odd:
                up[1, dst:dst + ln, :] = jnp.broadcast_to(pool0[src:src + 1, :], (ln, LANE))

            # conv_1: Conv1d(128,64,k=3,s=2) — contiguous tap reads from the
            # de-interleaved buffer, accumulated tap-by-tap into scratch.
            a1[...] = mm(up[0, 0:L_C1, :], w1_ref[0])
            a1[...] += mm(up[1, 0:L_C1, :], w1_ref[1])
            a1[...] += mm(up[0, 1:L_C1 + 1, :], w1_ref[2])
            # LeakyReLU∘MaxPool(3) (folded) ; Dropout(eval) ; BN
            m1 = jnp.maximum(jnp.maximum(a1[pl.ds(0, L_P1, stride=3), :],
                                         a1[pl.ds(1, L_P1, stride=3), :]),
                             a1[pl.ds(2, L_P1, stride=3), :])
            p1[...] = _leaky(m1 + b1) * s1 + t1                         # (42, 128)

            # conv_2: Conv1d(64,32,k=3,s=2)
            a2[...] = mm(p1[pl.ds(0, L_C2, stride=2), :], w2_ref[0])
            a2[...] += mm(p1[pl.ds(1, L_C2, stride=2), :], w2_ref[1])
            a2[...] += mm(p1[pl.ds(2, L_C2, stride=2), :], w2_ref[2])
            # LeakyReLU∘MaxPool(2) ; Dropout(eval) ; BN
            m2 = jnp.maximum(a2[pl.ds(0, L_P2, stride=2), :],
                             a2[pl.ds(1, L_P2, stride=2), :])
            x3[b] = _leaky(m2 + b2) * s2 + t2                           # (10, 128)

        # ---- fc stages: batched over the sample block (real M on the MXU) ----
        x3v = x3[...]                                                   # (bblk, 10, 128)
        acc = mm(x3v[:, 0, :], f1_ref[0])
        for l in range(1, L_P2):
            acc = acc + mm(x3v[:, l, :], f1_ref[l])
        y = _leaky(acc + fb1)                                           # lanes >= 80 stay 0
        y = _leaky(mm(y, f2_ref[...]) + fb2)                            # lanes >= 32 stay 0
        y = _leaky(mm(y, f3_ref[...]) + fb3)                            # lanes >= classes stay 0
        o_ref[...] = y                                                  # (bblk, 128) f32

    def rep_spec(shape):
        return pl.BlockSpec(shape, lambda g, _n=len(shape): (0,) * _n)

    out = pl.pallas_call(
        kernel,
        out_shape=jax.ShapeDtypeStruct((b_pad, LANE), f32),
        grid=(n_steps,),
        in_specs=[
            pl.BlockSpec((bblk, L + 2, cin_p), lambda g: (g, 0, 0)),    # x (per block)
            rep_spec((2, cin_p, LANE)),                                 # conv0 taps
            rep_spec((3, LANE, LANE)),                                  # conv1 taps
            rep_spec((3, LANE, LANE)),                                  # conv2 taps
            rep_spec((L_P2, LANE, LANE)),                               # fc1 (per-position)
            rep_spec((LANE, LANE)),                                     # fc2
            rep_spec((LANE, LANE)),                                     # fc3
            rep_spec((12, LANE)),                                       # biases + BN scale/shift
        ],
        out_specs=pl.BlockSpec((bblk, LANE), lambda g: (g, 0)),
        scratch_shapes=[
            pltpu.VMEM((L0, LANE), f32),             # conv0 raw output
            pltpu.VMEM((2, L_UP // 2, LANE), f32),   # upsampled, even/odd streams
            pltpu.VMEM((L_C1, LANE), f32),           # conv1 raw output
            pltpu.VMEM((L_P1, LANE), f32),           # pool1 + bn1 (conv2 input)
            pltpu.VMEM((L_C2, LANE), f32),           # conv2 raw output
            pltpu.VMEM((bblk, L_P2, LANE), f32),     # pooled/bn2 features (fc input)
        ],
        compiler_params=pltpu.CompilerParams(dimension_semantics=("parallel",)),
    )(x, w0, w1, w2, f1, f2, f3, vecs)
    return out[:B, :num_classes]


# ----------------------------------------------------------------------------
# Pure-JAX reference (same eval-mode semantics) for self-checking
# ----------------------------------------------------------------------------
def _reference_forward(params, x_ncl):
    def leaky(x):
        return jnp.where(x > 0, x, NEG_SLOPE * x)

    def conv1d(x, w, b, stride=1, padding=0):            # x: (B,L,C), w torch (Cout,Cin,K)
        Bb, _, _ = x.shape
        Cout, Cin, K = w.shape
        if padding:
            x = jnp.pad(x, ((0, 0), (padding, padding), (0, 0)))
        Lout = (x.shape[1] - K) // stride + 1
        idx = jnp.arange(Lout)[:, None] * stride + jnp.arange(K)[None, :]
        xc = x[:, idx, :].reshape(Bb, Lout, K * Cin)
        wm = jnp.transpose(w, (2, 1, 0)).reshape(K * Cin, Cout)
        return xc @ wm + b

    def maxpool(x, k):
        Bb, Ln, C = x.shape
        Lo = Ln // k
        return jnp.max(x[:, :Lo * k, :].reshape(Bb, Lo, k, C), axis=2)

    def bn(x, p):
        g, b, m, v = p
        s = g / jnp.sqrt(v + BN_EPS)
        return x * s + (b - m * s)

    x = jnp.transpose(x_ncl, (0, 2, 1)).astype(jnp.float32)
    x = bn(maxpool(leaky(conv1d(x, params["conv0_w"], params["conv0_b"], 1, 1)), 2), params["bn0"])
    x = x[:, (jnp.arange(L_UP) * x.shape[1]) // L_UP, :]               # Upsample(256, nearest)
    x = bn(maxpool(leaky(conv1d(x, params["conv1_w"], params["conv1_b"], 2, 0)), 3), params["bn1"])
    x = bn(maxpool(leaky(conv1d(x, params["conv2_w"], params["conv2_b"], 2, 0)), 2), params["bn2"])
    x = jnp.transpose(x, (0, 2, 1)).reshape(x.shape[0], -1)            # torch Flatten (C-major)
    x = leaky(x @ params["fc1_w"] + params["fc1_b"])
    x = leaky(x @ params["fc2_w"] + params["fc2_b"])
    return leaky(x @ params["fc3_w"] + params["fc3_b"])


# ----------------------------------------------------------------------------
# Parameters (deterministic synthetic init)
# ----------------------------------------------------------------------------
def init_params(key, num_channels, num_classes):
    ks = jax.random.split(key, 12)

    def w(k, shape, fan_in):
        return (jax.random.normal(k, shape, jnp.float32) / jnp.sqrt(fan_in)).astype(jnp.float32)

    def bn(k, c):
        g = 1.0 + 0.1 * jax.random.normal(k, (c,), jnp.float32)
        b = 0.1 * jax.random.normal(jax.random.fold_in(k, 1), (c,), jnp.float32)
        return g, b, jnp.zeros((c,), jnp.float32), jnp.ones((c,), jnp.float32)

    p = {}
    p["conv0_w"] = w(ks[0], (128, num_channels, 2), num_channels * 2)
    p["conv0_b"] = 0.01 * jax.random.normal(ks[1], (128,), jnp.float32)
    p["bn0"] = bn(ks[2], 128)
    p["conv1_w"] = w(ks[3], (64, 128, 3), 128 * 3)
    p["conv1_b"] = 0.01 * jax.random.normal(ks[4], (64,), jnp.float32)
    p["bn1"] = bn(ks[5], 64)
    p["conv2_w"] = w(ks[6], (32, 64, 3), 64 * 3)
    p["conv2_b"] = 0.01 * jax.random.normal(ks[7], (32,), jnp.float32)
    p["bn2"] = bn(ks[8], 32)
    p["fc1_w"] = w(ks[9], (320, 80), 320)
    p["fc1_b"] = jnp.zeros((80,), jnp.float32)
    p["fc2_w"] = w(ks[10], (80, 32), 80)
    p["fc2_b"] = jnp.zeros((32,), jnp.float32)
    p["fc3_w"] = w(ks[11], (32, num_classes), 32)
    p["fc3_b"] = jnp.zeros((num_classes,), jnp.float32)
    return p


if __name__ == "__main__":
    B, NUM_CHANNELS, L, NUM_CLASSES = 2, 4, 16, 5
    key = jax.random.PRNGKey(0)
    k_params, k_x = jax.random.split(key)
    params = init_params(k_params, NUM_CHANNELS, NUM_CLASSES)
    x = jax.random.normal(k_x, (B, NUM_CHANNELS, L), jnp.float32)      # NCL, like torch

    out = jax.jit(cnn_forward)(params, x)
    out = jax.block_until_ready(out)
    assert out.shape == (B, NUM_CLASSES), out.shape
    assert bool(jnp.all(jnp.isfinite(out)))

    # self-check against the plain-JAX f32 reference (bf16 MXU inputs with f32
    # accumulation -> loose tolerance)
    ref = _reference_forward(params, x)
    assert bool(jnp.allclose(out, ref, rtol=2e-2, atol=2e-2)), (
        float(jnp.max(jnp.abs(out - ref))))

    print("KERNEL_OK")
</pallas_src>

<mosaic_0001>
module attributes {stable_mosaic.version = 11 : i64} {
  func.func @kernel(%arg0: i32, %arg1: memref<2x18x128xf32, #tpu.memory_space<vmem>>, %arg2: memref<2x128x128xbf16, #tpu.memory_space<vmem>>, %arg3: memref<3x128x128xbf16, #tpu.memory_space<vmem>>, %arg4: memref<3x128x128xbf16, #tpu.memory_space<vmem>>, %arg5: memref<10x128x128xbf16, #tpu.memory_space<vmem>>, %arg6: memref<128x128xbf16, #tpu.memory_space<vmem>>, %arg7: memref<128x128xbf16, #tpu.memory_space<vmem>>, %arg8: memref<12x128xf32, #tpu.memory_space<vmem>>, %arg9: memref<2x128xf32, #tpu.memory_space<vmem>>, %arg10: memref<17x128xf32, #tpu.memory_space<vmem>>, %arg11: memref<2x128x128xf32, #tpu.memory_space<vmem>>, %arg12: memref<127x128xf32, #tpu.memory_space<vmem>>, %arg13: memref<42x128xf32, #tpu.memory_space<vmem>>, %arg14: memref<20x128xf32, #tpu.memory_space<vmem>>, %arg15: memref<2x10x128xf32, #tpu.memory_space<vmem>>) attributes {dimension_semantics = [#tpu.dimension_semantics<parallel>], iteration_bounds = array<i64: 1>, scalar_prefetch = 0 : i64, scratch_operands = 6 : i64, tpu.core_type = #tpu.core_type<tc>, window_params = [{transform_indices = @transform_0, window_bounds = array<i64: 2, 18, 128>}, {pipeline_mode = #tpu.pipeline_mode<synchronous>, transform_indices = @transform_1, window_bounds = array<i64: 2, 128, 128>}, {pipeline_mode = #tpu.pipeline_mode<synchronous>, transform_indices = @transform_2, window_bounds = array<i64: 3, 128, 128>}, {pipeline_mode = #tpu.pipeline_mode<synchronous>, transform_indices = @transform_3, window_bounds = array<i64: 3, 128, 128>}, {pipeline_mode = #tpu.pipeline_mode<synchronous>, transform_indices = @transform_4, window_bounds = array<i64: 10, 128, 128>}, {pipeline_mode = #tpu.pipeline_mode<synchronous>, transform_indices = @transform_5, window_bounds = array<i64: 128, 128>}, {pipeline_mode = #tpu.pipeline_mode<synchronous>, transform_indices = @transform_6, window_bounds = array<i64: 128, 128>}, {pipeline_mode = #tpu.pipeline_mode<synchronous>, transform_indices = @transform_7, window_bounds = array<i64: 12, 128>}, {transform_indices = @transform_8, window_bounds = array<i64: 2, 128>}]} {
    %c0 = arith.constant 0 : index
    %c0_0 = arith.constant 0 : index
    %0 = vector.load %arg8[%c0, %c0_0] : memref<12x128xf32, #tpu.memory_space<vmem>>, vector<1x128xf32>
    %c1 = arith.constant 1 : index
    %c0_1 = arith.constant 0 : index
    %1 = vector.load %arg8[%c1, %c0_1] : memref<12x128xf32, #tpu.memory_space<vmem>>, vector<1x128xf32>
    %c2 = arith.constant 2 : index
    %c0_2 = arith.constant 0 : index
    %2 = vector.load %arg8[%c2, %c0_2] : memref<12x128xf32, #tpu.memory_space<vmem>>, vector<1x128xf32>
    %c3 = arith.constant 3 : index
    %c0_3 = arith.constant 0 : index
    %3 = vector.load %arg8[%c3, %c0_3] : memref<12x128xf32, #tpu.memory_space<vmem>>, vector<1x128xf32>
    %c4 = arith.constant 4 : index
    %c0_4 = arith.constant 0 : index
    %4 = vector.load %arg8[%c4, %c0_4] : memref<12x128xf32, #tpu.memory_space<vmem>>, vector<1x128xf32>
    %c5 = arith.constant 5 : index
    %c0_5 = arith.constant 0 : index
    %5 = vector.load %arg8[%c5, %c0_5] : memref<12x128xf32, #tpu.memory_space<vmem>>, vector<1x128xf32>
    %c6 = arith.constant 6 : index
    %c0_6 = arith.constant 0 : index
    %6 = vector.load %arg8[%c6, %c0_6] : memref<12x128xf32, #tpu.memory_space<vmem>>, vector<1x128xf32>
    %c7 = arith.constant 7 : index
    %c0_7 = arith.constant 0 : index
    %7 = vector.load %arg8[%c7, %c0_7] : memref<12x128xf32, #tpu.memory_space<vmem>>, vector<1x128xf32>
    %c8 = arith.constant 8 : index
    %c0_8 = arith.constant 0 : index
    %8 = vector.load %arg8[%c8, %c0_8] : memref<12x128xf32, #tpu.memory_space<vmem>>, vector<1x128xf32>
    %c9 = arith.constant 9 : index
    %c0_9 = arith.constant 0 : index
    %9 = vector.load %arg8[%c9, %c0_9] : memref<12x128xf32, #tpu.memory_space<vmem>>, vector<1x128xf32>
    %c10 = arith.constant 10 : index
    %c0_10 = arith.constant 0 : index
    %10 = vector.load %arg8[%c10, %c0_10] : memref<12x128xf32, #tpu.memory_space<vmem>>, vector<1x128xf32>
    %c11 = arith.constant 11 : index
    %c0_11 = arith.constant 0 : index
    %11 = vector.load %arg8[%c11, %c0_11] : memref<12x128xf32, #tpu.memory_space<vmem>>, vector<1x128xf32>
    %c0_12 = arith.constant 0 : index
    %c0_13 = arith.constant 0 : index
    %c0_14 = arith.constant 0 : index
    %12 = vector.load %arg1[%c0_12, %c0_13, %c0_14] : memref<2x18x128xf32, #tpu.memory_space<vmem>>, vector<1x17x128xf32>
    %13 = vector.shape_cast %12 : vector<1x17x128xf32> to vector<17x128xf32>
    %c0_15 = arith.constant 0 : index
    %c0_16 = arith.constant 0 : index
    %c0_17 = arith.constant 0 : index
    %14 = vector.load %arg2[%c0_15, %c0_16, %c0_17] : memref<2x128x128xbf16, #tpu.memory_space<vmem>>, vector<1x128x128xbf16>
    %15 = vector.shape_cast %14 : vector<1x128x128xbf16> to vector<128x128xbf16>
    %16 = arith.truncf %13 : vector<17x128xf32> to vector<17x128xbf16>
    %cst = arith.constant dense<0.000000e+00> : vector<17x128xf32>
    %17 = tpu.matmul %16, %15, %cst {dimension_numbers = #tpu.dot_dimension_numbers<[1], [0], [0], [1], [0, 0, 1, 1], [], []>} : vector<17x128xbf16>, vector<128x128xbf16>, vector<17x128xf32> -> vector<17x128xf32>
    %c0_18 = arith.constant 0 : index
    %c0_19 = arith.constant 0 : index
    %18 = vector.load %arg10[%c0_18, %c0_19] : memref<17x128xf32, #tpu.memory_space<vmem>>, vector<17x128xf32>
    tpu.vector_store %arg10[%c0_18, %c0_19], %17 {strides = array<i32>} : memref<17x128xf32, #tpu.memory_space<vmem>>, vector<17x128xf32>,
    %c0_20 = arith.constant 0 : index
    %c0_21 = arith.constant 0 : index
    %19 = vector.load %arg10[%c0_20, %c0_21] : memref<17x128xf32, #tpu.memory_space<vmem>>, vector<17x128xf32>
    %c0_22 = arith.constant 0 : index
    %c1_23 = arith.constant 1 : index
    %c0_24 = arith.constant 0 : index
    %20 = vector.load %arg1[%c0_22, %c1_23, %c0_24] : memref<2x18x128xf32, #tpu.memory_space<vmem>>, vector<1x17x128xf32>
    %21 = vector.shape_cast %20 : vector<1x17x128xf32> to vector<17x128xf32>
    %c1_25 = arith.constant 1 : index
    %c0_26 = arith.constant 0 : index
    %c0_27 = arith.constant 0 : index
    %22 = vector.load %arg2[%c1_25, %c0_26, %c0_27] : memref<2x128x128xbf16, #tpu.memory_space<vmem>>, vector<1x128x128xbf16>
    %23 = vector.shape_cast %22 : vector<1x128x128xbf16> to vector<128x128xbf16>
    %24 = arith.truncf %21 : vector<17x128xf32> to vector<17x128xbf16>
    %cst_28 = arith.constant dense<0.000000e+00> : vector<17x128xf32>
    %25 = tpu.matmul %24, %23, %cst_28 {dimension_numbers = #tpu.dot_dimension_numbers<[1], [0], [0], [1], [0, 0, 1, 1], [], []>} : vector<17x128xbf16>, vector<128x128xbf16>, vector<17x128xf32> -> vector<17x128xf32>
    %26 = arith.addf %19, %25 : vector<17x128xf32>
    %c0_29 = arith.constant 0 : index
    %c0_30 = arith.constant 0 : index
    %27 = vector.load %arg10[%c0_29, %c0_30] : memref<17x128xf32, #tpu.memory_space<vmem>>, vector<17x128xf32>
    tpu.vector_store %arg10[%c0_29, %c0_30], %26 {strides = array<i32>} : memref<17x128xf32, #tpu.memory_space<vmem>>, vector<17x128xf32>,
    %c0_31 = arith.constant 0 : index
    %c0_32 = arith.constant 0 : index
    %28 = tpu.strided_load %arg10[%c0_31, %c0_32] {strides = array<i32: 2, 1>} : memref<17x128xf32, #tpu.memory_space<vmem>>, vector<8x128xf32>
    %c1_33 = arith.constant 1 : index
    %c0_34 = arith.constant 0 : index
    %29 = tpu.strided_load %arg10[%c1_33, %c0_34] {strides = array<i32: 2, 1>} : memref<17x128xf32, #tpu.memory_space<vmem>>, vector<8x128xf32>
    %30 = arith.maximumf %28, %29 : vector<8x128xf32>
    %31 = vector.broadcast %0 : vector<1x128xf32> to vector<8x128xf32>
    %32 = arith.addf %30, %31 : vector<8x128xf32>
    %cst_35 = arith.constant 0.000000e+00 : f32
    %33 = vector.broadcast %cst_35 : f32 to vector<8x128xf32>
    %34 = arith.cmpf ogt, %32, %33 : vector<8x128xf32>
    %cst_36 = arith.constant 0.00999999977 : f32
    %35 = vector.broadcast %cst_36 : f32 to vector<8x128xf32>
    %36 = arith.mulf %35, %32 : vector<8x128xf32>
    %37 = arith.select %34, %32, %36 : vector<8x128xi1>, vector<8x128xf32>
    %38 = vector.broadcast %1 : vector<1x128xf32> to vector<8x128xf32>
    %39 = arith.mulf %37, %38 : vector<8x128xf32>
    %40 = vector.broadcast %2 : vector<1x128xf32> to vector<8x128xf32>
    %41 = arith.addf %39, %40 : vector<8x128xf32>
    %42 = vector.extract_strided_slice %41 {offsets = [0, 0], sizes = [1, 128], strides = [1, 1]} : vector<8x128xf32> to vector<1x128xf32>
    %43 = vector.shape_cast %42 : vector<1x128xf32> to vector<1x128xf32>
    %44 = vector.broadcast %43 : vector<1x128xf32> to vector<16x128xf32>
    %c0_37 = arith.constant 0 : index
    %c0_38 = arith.constant 0 : index
    %c0_39 = arith.constant 0 : index
    %45 = vector.load %arg11[%c0_37, %c0_38, %c0_39] : memref<2x128x128xf32, #tpu.memory_space<vmem>>, vector<1x16x128xf32>
    %46 = vector.shape_cast %45 : vector<1x16x128xf32> to vector<16x128xf32>
    %47 = vector.shape_cast %44 : vector<16x128xf32> to vector<1x16x128xf32>
    tpu.vector_store %arg11[%c0_37, %c0_38, %c0_39], %47 {strides = array<i32>} : memref<2x128x128xf32, #tpu.memory_space<vmem>>, vector<1x16x128xf32>,
    %48 = vector.extract_strided_slice %41 {offsets = [1, 0], sizes = [1, 128], strides = [1, 1]} : vector<8x128xf32> to vector<1x128xf32>
    %49 = vector.shape_cast %48 : vector<1x128xf32> to vector<1x128xf32>
    %50 = vector.broadcast %49 : vector<1x128xf32> to vector<16x128xf32>
    %c0_40 = arith.constant 0 : index
    %c16 = arith.constant 16 : index
    %c0_41 = arith.constant 0 : index
    %51 = vector.load %arg11[%c0_40, %c16, %c0_41] : memref<2x128x128xf32, #tpu.memory_space<vmem>>, vector<1x16x128xf32>
    %52 = vector.shape_cast %51 : vector<1x16x128xf32> to vector<16x128xf32>
    %53 = vector.shape_cast %50 : vector<16x128xf32> to vector<1x16x128xf32>
    tpu.vector_store %arg11[%c0_40, %c16, %c0_41], %53 {strides = array<i32>} : memref<2x128x128xf32, #tpu.memory_space<vmem>>, vector<1x16x128xf32>,
    %54 = vector.extract_strided_slice %41 {offsets = [2, 0], sizes = [1, 128], strides = [1, 1]} : vector<8x128xf32> to vector<1x128xf32>
    %55 = vector.shape_cast %54 : vector<1x128xf32> to vector<1x128xf32>
    %56 = vector.broadcast %55 : vector<1x128xf32> to vector<16x128xf32>
    %c0_42 = arith.constant 0 : index
    %c32 = arith.constant 32 : index
    %c0_43 = arith.constant 0 : index
    %57 = vector.load %arg11[%c0_42, %c32, %c0_43] : memref<2x128x128xf32, #tpu.memory_space<vmem>>, vector<1x16x128xf32>
    %58 = vector.shape_cast %57 : vector<1x16x128xf32> to vector<16x128xf32>
    %59 = vector.shape_cast %56 : vector<16x128xf32> to vector<1x16x128xf32>
    tpu.vector_store %arg11[%c0_42, %c32, %c0_43], %59 {strides = array<i32>} : memref<2x128x128xf32, #tpu.memory_space<vmem>>, vector<1x16x128xf32>,
    %60 = vector.extract_strided_slice %41 {offsets = [3, 0], sizes = [1, 128], strides = [1, 1]} : vector<8x128xf32> to vector<1x128xf32>
    %61 = vector.shape_cast %60 : vector<1x128xf32> to vector<1x128xf32>
    %62 = vector.broadcast %61 : vector<1x128xf32> to vector<16x128xf32>
    %c0_44 = arith.constant 0 : index
    %c48 = arith.constant 48 : index
    %c0_45 = arith.constant 0 : index
    %63 = vector.load %arg11[%c0_44, %c48, %c0_45] : memref<2x128x128xf32, #tpu.memory_space<vmem>>, vector<1x16x128xf32>
    %64 = vector.shape_cast %63 : vector<1x16x128xf32> to vector<16x128xf32>
    %65 = vector.shape_cast %62 : vector<16x128xf32> to vector<1x16x128xf32>
    tpu.vector_store %arg11[%c0_44, %c48, %c0_45], %65 {strides = array<i32>} : memref<2x128x128xf32, #tpu.memory_space<vmem>>, vector<1x16x128xf32>,
    %66 = vector.extract_strided_slice %41 {offsets = [4, 0], sizes = [1, 128], strides = [1, 1]} : vector<8x128xf32> to vector<1x128xf32>
    %67 = vector.shape_cast %66 : vector<1x128xf32> to vector<1x128xf32>
    %68 = vector.broadcast %67 : vector<1x128xf32> to vector<16x128xf32>
    %c0_46 = arith.constant 0 : index
    %c64 = arith.constant 64 : index
    %c0_47 = arith.constant 0 : index
    %69 = vector.load %arg11[%c0_46, %c64, %c0_47] : memref<2x128x128xf32, #tpu.memory_space<vmem>>, vector<1x16x128xf32>
    %70 = vector.shape_cast %69 : vector<1x16x128xf32> to vector<16x128xf32>
    %71 = vector.shape_cast %68 : vector<16x128xf32> to vector<1x16x128xf32>
    tpu.vector_store %arg11[%c0_46, %c64, %c0_47], %71 {strides = array<i32>} : memref<2x128x128xf32, #tpu.memory_space<vmem>>, vector<1x16x128xf32>,
    %72 = vector.extract_strided_slice %41 {offsets = [5, 0], sizes = [1, 128], strides = [1, 1]} : vector<8x128xf32> to vector<1x128xf32>
    %73 = vector.shape_cast %72 : vector<1x128xf32> to vector<1x128xf32>
    %74 = vector.broadcast %73 : vector<1x128xf32> to vector<16x128xf32>
    %c0_48 = arith.constant 0 : index
    %c80 = arith.constant 80 : index
    %c0_49 = arith.constant 0 : index
    %75 = vector.load %arg11[%c0_48, %c80, %c0_49] : memref<2x128x128xf32, #tpu.memory_space<vmem>>, vector<1x16x128xf32>
    %76 = vector.shape_cast %75 : vector<1x16x128xf32> to vector<16x128xf32>
    %77 = vector.shape_cast %74 : vector<16x128xf32> to vector<1x16x128xf32>
    tpu.vector_store %arg11[%c0_48, %c80, %c0_49], %77 {strides = array<i32>} : memref<2x128x128xf32, #tpu.memory_space<vmem>>, vector<1x16x128xf32>,
    %78 = vector.extract_strided_slice %41 {offsets = [6, 0], sizes = [1, 128], strides = [1, 1]} : vector<8x128xf32> to vector<1x128xf32>
    %79 = vector.shape_cast %78 : vector<1x128xf32> to vector<1x128xf32>
    %80 = vector.broadcast %79 : vector<1x128xf32> to vector<16x128xf32>
    %c0_50 = arith.constant 0 : index
    %c96 = arith.constant 96 : index
    %c0_51 = arith.constant 0 : index
    %81 = vector.load %arg11[%c0_50, %c96, %c0_51] : memref<2x128x128xf32, #tpu.memory_space<vmem>>, vector<1x16x128xf32>
    %82 = vector.shape_cast %81 : vector<1x16x128xf32> to vector<16x128xf32>
    %83 = vector.shape_cast %80 : vector<16x128xf32> to vector<1x16x128xf32>
    tpu.vector_store %arg11[%c0_50, %c96, %c0_51], %83 {strides = array<i32>} : memref<2x128x128xf32, #tpu.memory_space<vmem>>, vector<1x16x128xf32>,
    %84 = vector.extract_strided_slice %41 {offsets = [7, 0], sizes = [1, 128], strides = [1, 1]} : vector<8x128xf32> to vector<1x128xf32>
    %85 = vector.shape_cast %84 : vector<1x128xf32> to vector<1x128xf32>
    %86 = vector.broadcast %85 : vector<1x128xf32> to vector<16x128xf32>
    %c0_52 = arith.constant 0 : index
    %c112 = arith.constant 112 : index
    %c0_53 = arith.constant 0 : index
    %87 = vector.load %arg11[%c0_52, %c112, %c0_53] : memref<2x128x128xf32, #tpu.memory_space<vmem>>, vector<1x16x128xf32>
    %88 = vector.shape_cast %87 : vector<1x16x128xf32> to vector<16x128xf32>
    %89 = vector.shape_cast %86 : vector<16x128xf32> to vector<1x16x128xf32>
    tpu.vector_store %arg11[%c0_52, %c112, %c0_53], %89 {strides = array<i32>} : memref<2x128x128xf32, #tpu.memory_space<vmem>>, vector<1x16x128xf32>,
    %90 = vector.extract_strided_slice %41 {offsets = [0, 0], sizes = [1, 128], strides = [1, 1]} : vector<8x128xf32> to vector<1x128xf32>
    %91 = vector.shape_cast %90 : vector<1x128xf32> to vector<1x128xf32>
    %92 = vector.broadcast %91 : vector<1x128xf32> to vector<16x128xf32>
    %c1_54 = arith.constant 1 : index
    %c0_55 = arith.constant 0 : index
    %c0_56 = arith.constant 0 : index
    %93 = vector.load %arg11[%c1_54, %c0_55, %c0_56] : memref<2x128x128xf32, #tpu.memory_space<vmem>>, vector<1x16x128xf32>
    %94 = vector.shape_cast %93 : vector<1x16x128xf32> to vector<16x128xf32>
    %95 = vector.shape_cast %92 : vector<16x128xf32> to vector<1x16x128xf32>
    tpu.vector_store %arg11[%c1_54, %c0_55, %c0_56], %95 {strides = array<i32>} : memref<2x128x128xf32, #tpu.memory_space<vmem>>, vector<1x16x128xf32>,
    %96 = vector.extract_strided_slice %41 {offsets = [1, 0], sizes = [1, 128], strides = [1, 1]} : vector<8x128xf32> to vector<1x128xf32>
    %97 = vector.shape_cast %96 : vector<1x128xf32> to vector<1x128xf32>
    %98 = vector.broadcast %97 : vector<1x128xf32> to vector<16x128xf32>
    %c1_57 = arith.constant 1 : index
    %c16_58 = arith.constant 16 : index
    %c0_59 = arith.constant 0 : index
    %99 = vector.load %arg11[%c1_57, %c16_58, %c0_59] : memref<2x128x128xf32, #tpu.memory_space<vmem>>, vector<1x16x128xf32>
    %100 = vector.shape_cast %99 : vector<1x16x128xf32> to vector<16x128xf32>
    %101 = vector.shape_cast %98 : vector<16x128xf32> to vector<1x16x128xf32>
    tpu.vector_store %arg11[%c1_57, %c16_58, %c0_59], %101 {strides = array<i32>} : memref<2x128x128xf32, #tpu.memory_space<vmem>>, vector<1x16x128xf32>,
    %102 = vector.extract_strided_slice %41 {offsets = [2, 0], sizes = [1, 128], strides = [1, 1]} : vector<8x128xf32> to vector<1x128xf32>
    %103 = vector.shape_cast %102 : vector<1x128xf32> to vector<1x128xf32>
    %104 = vector.broadcast %103 : vector<1x128xf32> to vector<16x128xf32>
    %c1_60 = arith.constant 1 : index
    %c32_61 = arith.constant 32 : index
    %c0_62 = arith.constant 0 : index
    %105 = vector.load %arg11[%c1_60, %c32_61, %c0_62] : memref<2x128x128xf32, #tpu.memory_space<vmem>>, vector<1x16x128xf32>
    %106 = vector.shape_cast %105 : vector<1x16x128xf32> to vector<16x128xf32>
    %107 = vector.shape_cast %104 : vector<16x128xf32> to vector<1x16x128xf32>
    tpu.vector_store %arg11[%c1_60, %c32_61, %c0_62], %107 {strides = array<i32>} : memref<2x128x128xf32, #tpu.memory_space<vmem>>, vector<1x16x128xf32>,
    %108 = vector.extract_strided_slice %41 {offsets = [3, 0], sizes = [1, 128], strides = [1, 1]} : vector<8x128xf32> to vector<1x128xf32>
    %109 = vector.shape_cast %108 : vector<1x128xf32> to vector<1x128xf32>
    %110 = vector.broadcast %109 : vector<1x128xf32> to vector<16x128xf32>
    %c1_63 = arith.constant 1 : index
    %c48_64 = arith.constant 48 : index
    %c0_65 = arith.constant 0 : index
    %111 = vector.load %arg11[%c1_63, %c48_64, %c0_65] : memref<2x128x128xf32, #tpu.memory_space<vmem>>, vector<1x16x128xf32>
    %112 = vector.shape_cast %111 : vector<1x16x128xf32> to vector<16x128xf32>
    %113 = vector.shape_cast %110 : vector<16x128xf32> to vector<1x16x128xf32>
    tpu.vector_store %arg11[%c1_63, %c48_64, %c0_65], %113 {strides = array<i32>} : memref<2x128x128xf32, #tpu.memory_space<vmem>>, vector<1x16x128xf32>,
    %114 = vector.extract_strided_slice %41 {offsets = [4, 0], sizes = [1, 128], strides = [1, 1]} : vector<8x128xf32> to vector<1x128xf32>
    %115 = vector.shape_cast %114 : vector<1x128xf32> to vector<1x128xf32>
    %116 = vector.broadcast %115 : vector<1x128xf32> to vector<16x128xf32>
    %c1_66 = arith.constant 1 : index
    %c64_67 = arith.constant 64 : index
    %c0_68 = arith.constant 0 : index
    %117 = vector.load %arg11[%c1_66, %c64_67, %c0_68] : memref<2x128x128xf32, #tpu.memory_space<vmem>>, vector<1x16x128xf32>
    %118 = vector.shape_cast %117 : vector<1x16x128xf32> to vector<16x128xf32>
    %119 = vector.shape_cast %116 : vector<16x128xf32> to vector<1x16x128xf32>
    tpu.vector_store %arg11[%c1_66, %c64_67, %c0_68], %119 {strides = array<i32>} : memref<2x128x128xf32, #tpu.memory_space<vmem>>, vector<1x16x128xf32>,
    %120 = vector.extract_strided_slice %41 {offsets = [5, 0], sizes = [1, 128], strides = [1, 1]} : vector<8x128xf32> to vector<1x128xf32>
    %121 = vector.shape_cast %120 : vector<1x128xf32> to vector<1x128xf32>
    %122 = vector.broadcast %121 : vector<1x128xf32> to vector<16x128xf32>
    %c1_69 = arith.constant 1 : index
    %c80_70 = arith.constant 80 : index
    %c0_71 = arith.constant 0 : index
    %123 = vector.load %arg11[%c1_69, %c80_70, %c0_71] : memref<2x128x128xf32, #tpu.memory_space<vmem>>, vector<1x16x128xf32>
    %124 = vector.shape_cast %123 : vector<1x16x128xf32> to vector<16x128xf32>
    %125 = vector.shape_cast %122 : vector<16x128xf32> to vector<1x16x128xf32>
    tpu.vector_store %arg11[%c1_69, %c80_70, %c0_71], %125 {strides = array<i32>} : memref<2x128x128xf32, #tpu.memory_space<vmem>>, vector<1x16x128xf32>,
    %126 = vector.extract_strided_slice %41 {offsets = [6, 0], sizes = [1, 128], strides = [1, 1]} : vector<8x128xf32> to vector<1x128xf32>
    %127 = vector.shape_cast %126 : vector<1x128xf32> to vector<1x128xf32>
    %128 = vector.broadcast %127 : vector<1x128xf32> to vector<16x128xf32>
    %c1_72 = arith.constant 1 : index
    %c96_73 = arith.constant 96 : index
    %c0_74 = arith.constant 0 : index
    %129 = vector.load %arg11[%c1_72, %c96_73, %c0_74] : memref<2x128x128xf32, #tpu.memory_space<vmem>>, vector<1x16x128xf32>
    %130 = vector.shape_cast %129 : vector<1x16x128xf32> to vector<16x128xf32>
    %131 = vector.shape_cast %128 : vector<16x128xf32> to vector<1x16x128xf32>
    tpu.vector_store %arg11[%c1_72, %c96_73, %c0_74], %131 {strides = array<i32>} : memref<2x128x128xf32, #tpu.memory_space<vmem>>, vector<1x16x128xf32>,
    %132 = vector.extract_strided_slice %41 {offsets = [7, 0], sizes = [1, 128], strides = [1, 1]} : vector<8x128xf32> to vector<1x128xf32>
    %133 = vector.shape_cast %132 : vector<1x128xf32> to vector<1x128xf32>
    %134 = vector.broadcast %133 : vector<1x128xf32> to vector<16x128xf32>
    %c1_75 = arith.constant 1 : index
    %c112_76 = arith.constant 112 : index
    %c0_77 = arith.constant 0 : index
    %135 = vector.load %arg11[%c1_75, %c112_76, %c0_77] : memref<2x128x128xf32, #tpu.memory_space<vmem>>, vector<1x16x128xf32>
    %136 = vector.shape_cast %135 : vector<1x16x128xf32> to vector<16x128xf32>
    %137 = vector.shape_cast %134 : vector<16x128xf32> to vector<1x16x128xf32>
    tpu.vector_store %arg11[%c1_75, %c112_76, %c0_77], %137 {strides = array<i32>} : memref<2x128x128xf32, #tpu.memory_space<vmem>>, vector<1x16x128xf32>,
    %c0_78 = arith.constant 0 : index
    %c0_79 = arith.constant 0 : index
    %c0_80 = arith.constant 0 : index
    %138 = vector.load %arg11[%c0_78, %c0_79, %c0_80] : memref<2x128x128xf32, #tpu.memory_space<vmem>>, vector<1x127x128xf32>
    %139 = vector.shape_cast %138 : vector<1x127x128xf32> to vector<127x128xf32>
    %c0_81 = arith.constant 0 : index
    %c0_82 = arith.constant 0 : index
    %c0_83 = arith.constant 0 : index
    %140 = vector.load %arg3[%c0_81, %c0_82, %c0_83] : memref<3x128x128xbf16, #tpu.memory_space<vmem>>, vector<1x128x128xbf16>
    %141 = vector.shape_cast %140 : vector<1x128x128xbf16> to vector<128x128xbf16>
    %142 = arith.truncf %139 : vector<127x128xf32> to vector<127x128xbf16>
    %cst_84 = arith.constant dense<0.000000e+00> : vector<127x128xf32>
    %143 = tpu.matmul %142, %141, %cst_84 {dimension_numbers = #tpu.dot_dimension_numbers<[1], [0], [0], [1], [0, 0, 1, 1], [], []>} : vector<127x128xbf16>, vector<128x128xbf16>, vector<127x128xf32> -> vector<127x128xf32>
    %c0_85 = arith.constant 0 : index
    %c0_86 = arith.constant 0 : index
    %144 = vector.load %arg12[%c0_85, %c0_86] : memref<127x128xf32, #tpu.memory_space<vmem>>, vector<127x128xf32>
    tpu.vector_store %arg12[%c0_85, %c0_86], %143 {strides = array<i32>} : memref<127x128xf32, #tpu.memory_space<vmem>>, vector<127x128xf32>,
    %c0_87 = arith.constant 0 : index
    %c0_88 = arith.constant 0 : index
    %145 = vector.load %arg12[%c0_87, %c0_88] : memref<127x128xf32, #tpu.memory_space<vmem>>, vector<127x128xf32>
    %c1_89 = arith.constant 1 : index
    %c0_90 = arith.constant 0 : index
    %c0_91 = arith.constant 0 : index
    %146 = vector.load %arg11[%c1_89, %c0_90, %c0_91] : memref<2x128x128xf32, #tpu.memory_space<vmem>>, vector<1x127x128xf32>
    %147 = vector.shape_cast %146 : vector<1x127x128xf32> to vector<127x128xf32>
    %c1_92 = arith.constant 1 : index
    %c0_93 = arith.constant 0 : index
    %c0_94 = arith.constant 0 : index
    %148 = vector.load %arg3[%c1_92, %c0_93, %c0_94] : memref<3x128x128xbf16, #tpu.memory_space<vmem>>, vector<1x128x128xbf16>
    %149 = vector.shape_cast %148 : vector<1x128x128xbf16> to vector<128x128xbf16>
    %150 = arith.truncf %147 : vector<127x128xf32> to vector<127x128xbf16>
    %cst_95 = arith.constant dense<0.000000e+00> : vector<127x128xf32>
    %151 = tpu.matmul %150, %149, %cst_95 {dimension_numbers = #tpu.dot_dimension_numbers<[1], [0], [0], [1], [0, 0, 1, 1], [], []>} : vector<127x128xbf16>, vector<128x128xbf16>, vector<127x128xf32> -> vector<127x128xf32>
    %152 = arith.addf %145, %151 : vector<127x128xf32>
    %c0_96 = arith.constant 0 : index
    %c0_97 = arith.constant 0 : index
    %153 = vector.load %arg12[%c0_96, %c0_97] : memref<127x128xf32, #tpu.memory_space<vmem>>, vector<127x128xf32>
    tpu.vector_store %arg12[%c0_96, %c0_97], %152 {strides = array<i32>} : memref<127x128xf32, #tpu.memory_space<vmem>>, vector<127x128xf32>,
    %c0_98 = arith.constant 0 : index
    %c0_99 = arith.constant 0 : index
    %154 = vector.load %arg12[%c0_98, %c0_99] : memref<127x128xf32, #tpu.memory_space<vmem>>, vector<127x128xf32>
    %c0_100 = arith.constant 0 : index
    %c1_101 = arith.constant 1 : index
    %c0_102 = arith.constant 0 : index
    %155 = vector.load %arg11[%c0_100, %c1_101, %c0_102] : memref<2x128x128xf32, #tpu.memory_space<vmem>>, vector<1x127x128xf32>
    %156 = vector.shape_cast %155 : vector<1x127x128xf32> to vector<127x128xf32>
    %c2_103 = arith.constant 2 : index
    %c0_104 = arith.constant 0 : index
    %c0_105 = arith.constant 0 : index
    %157 = vector.load %arg3[%c2_103, %c0_104, %c0_105] : memref<3x128x128xbf16, #tpu.memory_space<vmem>>, vector<1x128x128xbf16>
    %158 = vector.shape_cast %157 : vector<1x128x128xbf16> to vector<128x128xbf16>
    %159 = arith.truncf %156 : vector<127x128xf32> to vector<127x128xbf16>
    %cst_106 = arith.constant dense<0.000000e+00> : vector<127x128xf32>
    %160 = tpu.matmul %159, %158, %cst_106 {dimension_numbers = #tpu.dot_dimension_numbers<[1], [0], [0], [1], [0, 0, 1, 1], [], []>} : vector<127x128xbf16>, vector<128x128xbf16>, vector<127x128xf32> -> vector<127x128xf32>
    %161 = arith.addf %154, %160 : vector<127x128xf32>
    %c0_107 = arith.constant 0 : index
    %c0_108 = arith.constant 0 : index
    %162 = vector.load %arg12[%c0_107, %c0_108] : memref<127x128xf32, #tpu.memory_space<vmem>>, vector<127x128xf32>
    tpu.vector_store %arg12[%c0_107, %c0_108], %161 {strides = array<i32>} : memref<127x128xf32, #tpu.memory_space<vmem>>, vector<127x128xf32>,
    %c0_109 = arith.constant 0 : index
    %c0_110 = arith.constant 0 : index
    %163 = tpu.strided_load %arg12[%c0_109, %c0_110] {strides = array<i32: 3, 1>} : memref<127x128xf32, #tpu.memory_space<vmem>>, vector<42x128xf32>
    %c1_111 = arith.constant 1 : index
    %c0_112 = arith.constant 0 : index
    %164 = tpu.strided_load %arg12[%c1_111, %c0_112] {strides = array<i32: 3, 1>} : memref<127x128xf32, #tpu.memory_space<vmem>>, vector<42x128xf32>
    %165 = arith.maximumf %163, %164 : vector<42x128xf32>
    %c2_113 = arith.constant 2 : index
    %c0_114 = arith.constant 0 : index
    %166 = tpu.strided_load %arg12[%c2_113, %c0_114] {strides = array<i32: 3, 1>} : memref<127x128xf32, #tpu.memory_space<vmem>>, vector<42x128xf32>
    %167 = arith.maximumf %165, %166 : vector<42x128xf32>
    %168 = vector.broadcast %3 : vector<1x128xf32> to vector<42x128xf32>
    %169 = arith.addf %167, %168 : vector<42x128xf32>
    %cst_115 = arith.constant 0.000000e+00 : f32
    %170 = vector.broadcast %cst_115 : f32 to vector<42x128xf32>
    %171 = arith.cmpf ogt, %169, %170 : vector<42x128xf32>
    %cst_116 = arith.constant 0.00999999977 : f32
    %172 = vector.broadcast %cst_116 : f32 to vector<42x128xf32>
    %173 = arith.mulf %172, %169 : vector<42x128xf32>
    %174 = arith.select %171, %169, %173 : vector<42x128xi1>, vector<42x128xf32>
    %175 = vector.broadcast %4 : vector<1x128xf32> to vector<42x128xf32>
    %176 = arith.mulf %174, %175 : vector<42x128xf32>
    %177 = vector.broadcast %5 : vector<1x128xf32> to vector<42x128xf32>
    %178 = arith.addf %176, %177 : vector<42x128xf32>
    %c0_117 = arith.constant 0 : index
    %c0_118 = arith.constant 0 : index
    %179 = vector.load %arg13[%c0_117, %c0_118] : memref<42x128xf32, #tpu.memory_space<vmem>>, vector<42x128xf32>
    tpu.vector_store %arg13[%c0_117, %c0_118], %178 {strides = array<i32>} : memref<42x128xf32, #tpu.memory_space<vmem>>, vector<42x128xf32>,
    %c0_119 = arith.constant 0 : index
    %c0_120 = arith.constant 0 : index
    %180 = tpu.strided_load %arg13[%c0_119, %c0_120] {strides = array<i32: 2, 1>} : memref<42x128xf32, #tpu.memory_space<vmem>>, vector<20x128xf32>
    %c0_121 = arith.constant 0 : index
    %c0_122 = arith.constant 0 : index
    %c0_123 = arith.constant 0 : index
    %181 = vector.load %arg4[%c0_121, %c0_122, %c0_123] : memref<3x128x128xbf16, #tpu.memory_space<vmem>>, vector<1x128x128xbf16>
    %182 = vector.shape_cast %181 : vector<1x128x128xbf16> to vector<128x128xbf16>
    %183 = arith.truncf %180 : vector<20x128xf32> to vector<20x128xbf16>
    %cst_124 = arith.constant dense<0.000000e+00> : vector<20x128xf32>
    %184 = tpu.matmul %183, %182, %cst_124 {dimension_numbers = #tpu.dot_dimension_numbers<[1], [0], [0], [1], [0, 0, 1, 1], [], []>} : vector<20x128xbf16>, vector<128x128xbf16>, vector<20x128xf32> -> vector<20x128xf32>
    %c0_125 = arith.constant 0 : index
    %c0_126 = arith.constant 0 : index
    %185 = vector.load %arg14[%c0_125, %c0_126] : memref<20x128xf32, #tpu.memory_space<vmem>>, vector<20x128xf32>
    tpu.vector_store %arg14[%c0_125, %c0_126], %184 {strides = array<i32>} : memref<20x128xf32, #tpu.memory_space<vmem>>, vector<20x128xf32>,
    %c0_127 = arith.constant 0 : index
    %c0_128 = arith.constant 0 : index
    %186 = vector.load %arg14[%c0_127, %c0_128] : memref<20x128xf32, #tpu.memory_space<vmem>>, vector<20x128xf32>
    %c1_129 = arith.constant 1 : index
    %c0_130 = arith.constant 0 : index
    %187 = tpu.strided_load %arg13[%c1_129, %c0_130] {strides = array<i32: 2, 1>} : memref<42x128xf32, #tpu.memory_space<vmem>>, vector<20x128xf32>
    %c1_131 = arith.constant 1 : index
    %c0_132 = arith.constant 0 : index
    %c0_133 = arith.constant 0 : index
    %188 = vector.load %arg4[%c1_131, %c0_132, %c0_133] : memref<3x128x128xbf16, #tpu.memory_space<vmem>>, vector<1x128x128xbf16>
    %189 = vector.shape_cast %188 : vector<1x128x128xbf16> to vector<128x128xbf16>
    %190 = arith.truncf %187 : vector<20x128xf32> to vector<20x128xbf16>
    %cst_134 = arith.constant dense<0.000000e+00> : vector<20x128xf32>
    %191 = tpu.matmul %190, %189, %cst_134 {dimension_numbers = #tpu.dot_dimension_numbers<[1], [0], [0], [1], [0, 0, 1, 1], [], []>} : vector<20x128xbf16>, vector<128x128xbf16>, vector<20x128xf32> -> vector<20x128xf32>
    %192 = arith.addf %186, %191 : vector<20x128xf32>
    %c0_135 = arith.constant 0 : index
    %c0_136 = arith.constant 0 : index
    %193 = vector.load %arg14[%c0_135, %c0_136] : memref<20x128xf32, #tpu.memory_space<vmem>>, vector<20x128xf32>
    tpu.vector_store %arg14[%c0_135, %c0_136], %192 {strides = array<i32>} : memref<20x128xf32, #tpu.memory_space<vmem>>, vector<20x128xf32>,
    %c0_137 = arith.constant 0 : index
    %c0_138 = arith.constant 0 : index
    %194 = vector.load %arg14[%c0_137, %c0_138] : memref<20x128xf32, #tpu.memory_space<vmem>>, vector<20x128xf32>
    %c2_139 = arith.constant 2 : index
    %c0_140 = arith.constant 0 : index
    %195 = tpu.strided_load %arg13[%c2_139, %c0_140] {strides = array<i32: 2, 1>} : memref<42x128xf32, #tpu.memory_space<vmem>>, vector<20x128xf32>
    %c2_141 = arith.constant 2 : index
    %c0_142 = arith.constant 0 : index
    %c0_143 = arith.constant 0 : index
    %196 = vector.load %arg4[%c2_141, %c0_142, %c0_143] : memref<3x128x128xbf16, #tpu.memory_space<vmem>>, vector<1x128x128xbf16>
    %197 = vector.shape_cast %196 : vector<1x128x128xbf16> to vector<128x128xbf16>
    %198 = arith.truncf %195 : vector<20x128xf32> to vector<20x128xbf16>
    %cst_144 = arith.constant dense<0.000000e+00> : vector<20x128xf32>
    %199 = tpu.matmul %198, %197, %cst_144 {dimension_numbers = #tpu.dot_dimension_numbers<[1], [0], [0], [1], [0, 0, 1, 1], [], []>} : vector<20x128xbf16>, vector<128x128xbf16>, vector<20x128xf32> -> vector<20x128xf32>
    %200 = arith.addf %194, %199 : vector<20x128xf32>
    %c0_145 = arith.constant 0 : index
    %c0_146 = arith.constant 0 : index
    %201 = vector.load %arg14[%c0_145, %c0_146] : memref<20x128xf32, #tpu.memory_space<vmem>>, vector<20x128xf32>
    tpu.vector_store %arg14[%c0_145, %c0_146], %200 {strides = array<i32>} : memref<20x128xf32, #tpu.memory_space<vmem>>, vector<20x128xf32>,
    %c0_147 = arith.constant 0 : index
    %c0_148 = arith.constant 0 : index
    %202 = tpu.strided_load %arg14[%c0_147, %c0_148] {strides = array<i32: 2, 1>} : memref<20x128xf32, #tpu.memory_space<vmem>>, vector<10x128xf32>
    %c1_149 = arith.constant 1 : index
    %c0_150 = arith.constant 0 : index
    %203 = tpu.strided_load %arg14[%c1_149, %c0_150] {strides = array<i32: 2, 1>} : memref<20x128xf32, #tpu.memory_space<vmem>>, vector<10x128xf32>
    %204 = arith.maximumf %202, %203 : vector<10x128xf32>
    %205 = vector.broadcast %6 : vector<1x128xf32> to vector<10x128xf32>
    %206 = arith.addf %204, %205 : vector<10x128xf32>
    %cst_151 = arith.constant 0.000000e+00 : f32
    %207 = vector.broadcast %cst_151 : f32 to vector<10x128xf32>
    %208 = arith.cmpf ogt, %206, %207 : vector<10x128xf32>
    %cst_152 = arith.constant 0.00999999977 : f32
    %209 = vector.broadcast %cst_152 : f32 to vector<10x128xf32>
    %210 = arith.mulf %209, %206 : vector<10x128xf32>
    %211 = arith.select %208, %206, %210 : vector<10x128xi1>, vector<10x128xf32>
    %212 = vector.broadcast %7 : vector<1x128xf32> to vector<10x128xf32>
    %213 = arith.mulf %211, %212 : vector<10x128xf32>
    %214 = vector.broadcast %8 : vector<1x128xf32> to vector<10x128xf32>
    %215 = arith.addf %213, %214 : vector<10x128xf32>
    %c0_153 = arith.constant 0 : index
    %c0_154 = arith.constant 0 : index
    %c0_155 = arith.constant 0 : index
    %216 = vector.load %arg15[%c0_153, %c0_154, %c0_155] : memref<2x10x128xf32, #tpu.memory_space<vmem>>, vector<1x10x128xf32>
    %217 = vector.shape_cast %216 : vector<1x10x128xf32> to vector<10x128xf32>
    %218 = vector.shape_cast %215 : vector<10x128xf32> to vector<1x10x128xf32>
    tpu.vector_store %arg15[%c0_153, %c0_154, %c0_155], %218 {strides = array<i32>} : memref<2x10x128xf32, #tpu.memory_space<vmem>>, vector<1x10x128xf32>,
    %c1_156 = arith.constant 1 : index
    %c0_157 = arith.constant 0 : index
    %c0_158 = arith.constant 0 : index
    %219 = vector.load %arg1[%c1_156, %c0_157, %c0_158] : memref<2x18x128xf32, #tpu.memory_space<vmem>>, vector<1x17x128xf32>
    %220 = vector.shape_cast %219 : vector<1x17x128xf32> to vector<17x128xf32>
    %c0_159 = arith.constant 0 : index
    %c0_160 = arith.constant 0 : index
    %c0_161 = arith.constant 0 : index
    %221 = vector.load %arg2[%c0_159, %c0_160, %c0_161] : memref<2x128x128xbf16, #tpu.memory_space<vmem>>, vector<1x128x128xbf16>
    %222 = vector.shape_cast %221 : vector<1x128x128xbf16> to vector<128x128xbf16>
    %223 = arith.truncf %220 : vector<17x128xf32> to vector<17x128xbf16>
    %cst_162 = arith.constant dense<0.000000e+00> : vector<17x128xf32>
    %224 = tpu.matmul %223, %222, %cst_162 {dimension_numbers = #tpu.dot_dimension_numbers<[1], [0], [0], [1], [0, 0, 1, 1], [], []>} : vector<17x128xbf16>, vector<128x128xbf16>, vector<17x128xf32> -> vector<17x128xf32>
    %c0_163 = arith.constant 0 : index
    %c0_164 = arith.constant 0 : index
    %225 = vector.load %arg10[%c0_163, %c0_164] : memref<17x128xf32, #tpu.memory_space<vmem>>, vector<17x128xf32>
    tpu.vector_store %arg10[%c0_163, %c0_164], %224 {strides = array<i32>} : memref<17x128xf32, #tpu.memory_space<vmem>>, vector<17x128xf32>,
    %c0_165 = arith.constant 0 : index
    %c0_166 = arith.constant 0 : index
    %226 = vector.load %arg10[%c0_165, %c0_166] : memref<17x128xf32, #tpu.memory_space<vmem>>, vector<17x128xf32>
    %c1_167 = arith.constant 1 : index
    %c1_168 = arith.constant 1 : index
    %c0_169 = arith.constant 0 : index
    %227 = vector.load %arg1[%c1_167, %c1_168, %c0_169] : memref<2x18x128xf32, #tpu.memory_space<vmem>>, vector<1x17x128xf32>
    %228 = vector.shape_cast %227 : vector<1x17x128xf32> to vector<17x128xf32>
    %c1_170 = arith.constant 1 : index
    %c0_171 = arith.constant 0 : index
    %c0_172 = arith.constant 0 : index
    %229 = vector.load %arg2[%c1_170, %c0_171, %c0_172] : memref<2x128x128xbf16, #tpu.memory_space<vmem>>, vector<1x128x128xbf16>
    %230 = vector.shape_cast %229 : vector<1x128x128xbf16> to vector<128x128xbf16>
    %231 = arith.truncf %228 : vector<17x128xf32> to vector<17x128xbf16>
    %cst_173 = arith.constant dense<0.000000e+00> : vector<17x128xf32>
    %232 = tpu.matmul %231, %230, %cst_173 {dimension_numbers = #tpu.dot_dimension_numbers<[1], [0], [0], [1], [0, 0, 1, 1], [], []>} : vector<17x128xbf16>, vector<128x128xbf16>, vector<17x128xf32> -> vector<17x128xf32>
    %233 = arith.addf %226, %232 : vector<17x128xf32>
    %c0_174 = arith.constant 0 : index
    %c0_175 = arith.constant 0 : index
    %234 = vector.load %arg10[%c0_174, %c0_175] : memref<17x128xf32, #tpu.memory_space<vmem>>, vector<17x128xf32>
    tpu.vector_store %arg10[%c0_174, %c0_175], %233 {strides = array<i32>} : memref<17x128xf32, #tpu.memory_space<vmem>>, vector<17x128xf32>,
    %c0_176 = arith.constant 0 : index
    %c0_177 = arith.constant 0 : index
    %235 = tpu.strided_load %arg10[%c0_176, %c0_177] {strides = array<i32: 2, 1>} : memref<17x128xf32, #tpu.memory_space<vmem>>, vector<8x128xf32>
    %c1_178 = arith.constant 1 : index
    %c0_179 = arith.constant 0 : index
    %236 = tpu.strided_load %arg10[%c1_178, %c0_179] {strides = array<i32: 2, 1>} : memref<17x128xf32, #tpu.memory_space<vmem>>, vector<8x128xf32>
    %237 = arith.maximumf %235, %236 : vector<8x128xf32>
    %238 = vector.broadcast %0 : vector<1x128xf32> to vector<8x128xf32>
    %239 = arith.addf %237, %238 : vector<8x128xf32>
    %cst_180 = arith.constant 0.000000e+00 : f32
    %240 = vector.broadcast %cst_180 : f32 to vector<8x128xf32>
    %241 = arith.cmpf ogt, %239, %240 : vector<8x128xf32>
    %cst_181 = arith.constant 0.00999999977 : f32
    %242 = vector.broadcast %cst_181 : f32 to vector<8x128xf32>
    %243 = arith.mulf %242, %239 : vector<8x128xf32>
    %244 = arith.select %241, %239, %243 : vector<8x128xi1>, vector<8x128xf32>
    %245 = vector.broadcast %1 : vector<1x128xf32> to vector<8x128xf32>
    %246 = arith.mulf %244, %245 : vector<8x128xf32>
    %247 = vector.broadcast %2 : vector<1x128xf32> to vector<8x128xf32>
    %248 = arith.addf %246, %247 : vector<8x128xf32>
    %249 = vector.extract_strided_slice %248 {offsets = [0, 0], sizes = [1, 128], strides = [1, 1]} : vector<8x128xf32> to vector<1x128xf32>
    %250 = vector.shape_cast %249 : vector<1x128xf32> to vector<1x128xf32>
    %251 = vector.broadcast %250 : vector<1x128xf32> to vector<16x128xf32>
    %c0_182 = arith.constant 0 : index
    %c0_183 = arith.constant 0 : index
    %c0_184 = arith.constant 0 : index
    %252 = vector.load %arg11[%c0_182, %c0_183, %c0_184] : memref<2x128x128xf32, #tpu.memory_space<vmem>>, vector<1x16x128xf32>
    %253 = vector.shape_cast %252 : vector<1x16x128xf32> to vector<16x128xf32>
    %254 = vector.shape_cast %251 : vector<16x128xf32> to vector<1x16x128xf32>
    tpu.vector_store %arg11[%c0_182, %c0_183, %c0_184], %254 {strides = array<i32>} : memref<2x128x128xf32, #tpu.memory_space<vmem>>, vector<1x16x128xf32>,
    %255 = vector.extract_strided_slice %248 {offsets = [1, 0], sizes = [1, 128], strides = [1, 1]} : vector<8x128xf32> to vector<1x128xf32>
    %256 = vector.shape_cast %255 : vector<1x128xf32> to vector<1x128xf32>
    %257 = vector.broadcast %256 : vector<1x128xf32> to vector<16x128xf32>
    %c0_185 = arith.constant 0 : index
    %c16_186 = arith.constant 16 : index
    %c0_187 = arith.constant 0 : index
    %258 = vector.load %arg11[%c0_185, %c16_186, %c0_187] : memref<2x128x128xf32, #tpu.memory_space<vmem>>, vector<1x16x128xf32>
    %259 = vector.shape_cast %258 : vector<1x16x128xf32> to vector<16x128xf32>
    %260 = vector.shape_cast %257 : vector<16x128xf32> to vector<1x16x128xf32>
    tpu.vector_store %arg11[%c0_185, %c16_186, %c0_187], %260 {strides = array<i32>} : memref<2x128x128xf32, #tpu.memory_space<vmem>>, vector<1x16x128xf32>,
    %261 = vector.extract_strided_slice %248 {offsets = [2, 0], sizes = [1, 128], strides = [1, 1]} : vector<8x128xf32> to vector<1x128xf32>
    %262 = vector.shape_cast %261 : vector<1x128xf32> to vector<1x128xf32>
    %263 = vector.broadcast %262 : vector<1x128xf32> to vector<16x128xf32>
    %c0_188 = arith.constant 0 : index
    %c32_189 = arith.constant 32 : index
    %c0_190 = arith.constant 0 : index
    %264 = vector.load %arg11[%c0_188, %c32_189, %c0_190] : memref<2x128x128xf32, #tpu.memory_space<vmem>>, vector<1x16x128xf32>
    %265 = vector.shape_cast %264 : vector<1x16x128xf32> to vector<16x128xf32>
    %266 = vector.shape_cast %263 : vector<16x128xf32> to vector<1x16x128xf32>
    tpu.vector_store %arg11[%c0_188, %c32_189, %c0_190], %266 {strides = array<i32>} : memref<2x128x128xf32, #tpu.memory_space<vmem>>, vector<1x16x128xf32>,
    %267 = vector.extract_strided_slice %248 {offsets = [3, 0], sizes = [1, 128], strides = [1, 1]} : vector<8x128xf32> to vector<1x128xf32>
    %268 = vector.shape_cast %267 : vector<1x128xf32> to vector<1x128xf32>
    %269 = vector.broadcast %268 : vector<1x128xf32> to vector<16x128xf32>
    %c0_191 = arith.constant 0 : index
    %c48_192 = arith.constant 48 : index
    %c0_193 = arith.constant 0 : index
    %270 = vector.load %arg11[%c0_191, %c48_192, %c0_193] : memref<2x128x128xf32, #tpu.memory_space<vmem>>, vector<1x16x128xf32>
    %271 = vector.shape_cast %270 : vector<1x16x128xf32> to vector<16x128xf32>
    %272 = vector.shape_cast %269 : vector<16x128xf32> to vector<1x16x128xf32>
    tpu.vector_store %arg11[%c0_191, %c48_192, %c0_193], %272 {strides = array<i32>} : memref<2x128x128xf32, #tpu.memory_space<vmem>>, vector<1x16x128xf32>,
    %273 = vector.extract_strided_slice %248 {offsets = [4, 0], sizes = [1, 128], strides = [1, 1]} : vector<8x128xf32> to vector<1x128xf32>
    %274 = vector.shape_cast %273 : vector<1x128xf32> to vector<1x128xf32>
    %275 = vector.broadcast %274 : vector<1x128xf32> to vector<16x128xf32>
    %c0_194 = arith.constant 0 : index
    %c64_195 = arith.constant 64 : index
    %c0_196 = arith.constant 0 : index
    %276 = vector.load %arg11[%c0_194, %c64_195, %c0_196] : memref<2x128x128xf32, #tpu.memory_space<vmem>>, vector<1x16x128xf32>
    %277 = vector.shape_cast %276 : vector<1x16x128xf32> to vector<16x128xf32>
    %278 = vector.shape_cast %275 : vector<16x128xf32> to vector<1x16x128xf32>
    tpu.vector_store %arg11[%c0_194, %c64_195, %c0_196], %278 {strides = array<i32>} : memref<2x128x128xf32, #tpu.memory_space<vmem>>, vector<1x16x128xf32>,
    %279 = vector.extract_strided_slice %248 {offsets = [5, 0], sizes = [1, 128], strides = [1, 1]} : vector<8x128xf32> to vector<1x128xf32>
    %280 = vector.shape_cast %279 : vector<1x128xf32> to vector<1x128xf32>
    %281 = vector.broadcast %280 : vector<1x128xf32> to vector<16x128xf32>
    %c0_197 = arith.constant 0 : index
    %c80_198 = arith.constant 80 : index
    %c0_199 = arith.constant 0 : index
    %282 = vector.load %arg11[%c0_197, %c80_198, %c0_199] : memref<2x128x128xf32, #tpu.memory_space<vmem>>, vector<1x16x128xf32>
    %283 = vector.shape_cast %282 : vector<1x16x128xf32> to vector<16x128xf32>
    %284 = vector.shape_cast %281 : vector<16x128xf32> to vector<1x16x128xf32>
    tpu.vector_store %arg11[%c0_197, %c80_198, %c0_199], %284 {strides = array<i32>} : memref<2x128x128xf32, #tpu.memory_space<vmem>>, vector<1x16x128xf32>,
    %285 = vector.extract_strided_slice %248 {offsets = [6, 0], sizes = [1, 128], strides = [1, 1]} : vector<8x128xf32> to vector<1x128xf32>
    %286 = vector.shape_cast %285 : vector<1x128xf32> to vector<1x128xf32>
    %287 = vector.broadcast %286 : vector<1x128xf32> to vector<16x128xf32>
    %c0_200 = arith.constant 0 : index
    %c96_201 = arith.constant 96 : index
    %c0_202 = arith.constant 0 : index
    %288 = vector.load %arg11[%c0_200, %c96_201, %c0_202] : memref<2x128x128xf32, #tpu.memory_space<vmem>>, vector<1x16x128xf32>
    %289 = vector.shape_cast %288 : vector<1x16x128xf32> to vector<16x128xf32>
    %290 = vector.shape_cast %287 : vector<16x128xf32> to vector<1x16x128xf32>
    tpu.vector_store %arg11[%c0_200, %c96_201, %c0_202], %290 {strides = array<i32>} : memref<2x128x128xf32, #tpu.memory_space<vmem>>, vector<1x16x128xf32>,
    %291 = vector.extract_strided_slice %248 {offsets = [7, 0], sizes = [1, 128], strides = [1, 1]} : vector<8x128xf32> to vector<1x128xf32>
    %292 = vector.shape_cast %291 : vector<1x128xf32> to vector<1x128xf32>
    %293 = vector.broadcast %292 : vector<1x128xf32> to vector<16x128xf32>
    %c0_203 = arith.constant 0 : index
    %c112_204 = arith.constant 112 : index
    %c0_205 = arith.constant 0 : index
    %294 = vector.load %arg11[%c0_203, %c112_204, %c0_205] : memref<2x128x128xf32, #tpu.memory_space<vmem>>, vector<1x16x128xf32>
    %295 = vector.shape_cast %294 : vector<1x16x128xf32> to vector<16x128xf32>
    %296 = vector.shape_cast %293 : vector<16x128xf32> to vector<1x16x128xf32>
    tpu.vector_store %arg11[%c0_203, %c112_204, %c0_205], %296 {strides = array<i32>} : memref<2x128x128xf32, #tpu.memory_space<vmem>>, vector<1x16x128xf32>,
    %297 = vector.extract_strided_slice %248 {offsets = [0, 0], sizes = [1, 128], strides = [1, 1]} : vector<8x128xf32> to vector<1x128xf32>
    %298 = vector.shape_cast %297 : vector<1x128xf32> to vector<1x128xf32>
    %299 = vector.broadcast %298 : vector<1x128xf32> to vector<16x128xf32>
    %c1_206 = arith.constant 1 : index
    %c0_207 = arith.constant 0 : index
    %c0_208 = arith.constant 0 : index
    %300 = vector.load %arg11[%c1_206, %c0_207, %c0_208] : memref<2x128x128xf32, #tpu.memory_space<vmem>>, vector<1x16x128xf32>
    %301 = vector.shape_cast %300 : vector<1x16x128xf32> to vector<16x128xf32>
    %302 = vector.shape_cast %299 : vector<16x128xf32> to vector<1x16x128xf32>
    tpu.vector_store %arg11[%c1_206, %c0_207, %c0_208], %302 {strides = array<i32>} : memref<2x128x128xf32, #tpu.memory_space<vmem>>, vector<1x16x128xf32>,
    %303 = vector.extract_strided_slice %248 {offsets = [1, 0], sizes = [1, 128], strides = [1, 1]} : vector<8x128xf32> to vector<1x128xf32>
    %304 = vector.shape_cast %303 : vector<1x128xf32> to vector<1x128xf32>
    %305 = vector.broadcast %304 : vector<1x128xf32> to vector<16x128xf32>
    %c1_209 = arith.constant 1 : index
    %c16_210 = arith.constant 16 : index
    %c0_211 = arith.constant 0 : index
    %306 = vector.load %arg11[%c1_209, %c16_210, %c0_211] : memref<2x128x128xf32, #tpu.memory_space<vmem>>, vector<1x16x128xf32>
    %307 = vector.shape_cast %306 : vector<1x16x128xf32> to vector<16x128xf32>
    %308 = vector.shape_cast %305 : vector<16x128xf32> to vector<1x16x128xf32>
    tpu.vector_store %arg11[%c1_209, %c16_210, %c0_211], %308 {strides = array<i32>} : memref<2x128x128xf32, #tpu.memory_space<vmem>>, vector<1x16x128xf32>,
    %309 = vector.extract_strided_slice %248 {offsets = [2, 0], sizes = [1, 128], strides = [1, 1]} : vector<8x128xf32> to vector<1x128xf32>
    %310 = vector.shape_cast %309 : vector<1x128xf32> to vector<1x128xf32>
    %311 = vector.broadcast %310 : vector<1x128xf32> to vector<16x128xf32>
    %c1_212 = arith.constant 1 : index
    %c32_213 = arith.constant 32 : index
    %c0_214 = arith.constant 0 : index
    %312 = vector.load %arg11[%c1_212, %c32_213, %c0_214] : memref<2x128x128xf32, #tpu.memory_space<vmem>>, vector<1x16x128xf32>
    %313 = vector.shape_cast %312 : vector<1x16x128xf32> to vector<16x128xf32>
    %314 = vector.shape_cast %311 : vector<16x128xf32> to vector<1x16x128xf32>
    tpu.vector_store %arg11[%c1_212, %c32_213, %c0_214], %314 {strides = array<i32>} : memref<2x128x128xf32, #tpu.memory_space<vmem>>, vector<1x16x128xf32>,
    %315 = vector.extract_strided_slice %248 {offsets = [3, 0], sizes = [1, 128], strides = [1, 1]} : vector<8x128xf32> to vector<1x128xf32>
    %316 = vector.shape_cast %315 : vector<1x128xf32> to vector<1x128xf32>
    %317 = vector.broadcast %316 : vector<1x128xf32> to vector<16x128xf32>
    %c1_215 = arith.constant 1 : index
    %c48_216 = arith.constant 48 : index
    %c0_217 = arith.constant 0 : index
    %318 = vector.load %arg11[%c1_215, %c48_216, %c0_217] : memref<2x128x128xf32, #tpu.memory_space<vmem>>, vector<1x16x128xf32>
    %319 = vector.shape_cast %318 : vector<1x16x128xf32> to vector<16x128xf32>
    %320 = vector.shape_cast %317 : vector<16x128xf32> to vector<1x16x128xf32>
    tpu.vector_store %arg11[%c1_215, %c48_216, %c0_217], %320 {strides = array<i32>} : memref<2x128x128xf32, #tpu.memory_space<vmem>>, vector<1x16x128xf32>,
    %321 = vector.extract_strided_slice %248 {offsets = [4, 0], sizes = [1, 128], strides = [1, 1]} : vector<8x128xf32> to vector<1x128xf32>
    %322 = vector.shape_cast %321 : vector<1x128xf32> to vector<1x128xf32>
    %323 = vector.broadcast %322 : vector<1x128xf32> to vector<16x128xf32>
    %c1_218 = arith.constant 1 : index
    %c64_219 = arith.constant 64 : index
    %c0_220 = arith.constant 0 : index
    %324 = vector.load %arg11[%c1_218, %c64_219, %c0_220] : memref<2x128x128xf32, #tpu.memory_space<vmem>>, vector<1x16x128xf32>
    %325 = vector.shape_cast %324 : vector<1x16x128xf32> to vector<16x128xf32>
    %326 = vector.shape_cast %323 : vector<16x128xf32> to vector<1x16x128xf32>
    tpu.vector_store %arg11[%c1_218, %c64_219, %c0_220], %326 {strides = array<i32>} : memref<2x128x128xf32, #tpu.memory_space<vmem>>, vector<1x16x128xf32>,
    %327 = vector.extract_strided_slice %248 {offsets = [5, 0], sizes = [1, 128], strides = [1, 1]} : vector<8x128xf32> to vector<1x128xf32>
    %328 = vector.shape_cast %327 : vector<1x128xf32> to vector<1x128xf32>
    %329 = vector.broadcast %328 : vector<1x128xf32> to vector<16x128xf32>
    %c1_221 = arith.constant 1 : index
    %c80_222 = arith.constant 80 : index
    %c0_223 = arith.constant 0 : index
    %330 = vector.load %arg11[%c1_221, %c80_222, %c0_223] : memref<2x128x128xf32, #tpu.memory_space<vmem>>, vector<1x16x128xf32>
    %331 = vector.shape_cast %330 : vector<1x16x128xf32> to vector<16x128xf32>
    %332 = vector.shape_cast %329 : vector<16x128xf32> to vector<1x16x128xf32>
    tpu.vector_store %arg11[%c1_221, %c80_222, %c0_223], %332 {strides = array<i32>} : memref<2x128x128xf32, #tpu.memory_space<vmem>>, vector<1x16x128xf32>,
    %333 = vector.extract_strided_slice %248 {offsets = [6, 0], sizes = [1, 128], strides = [1, 1]} : vector<8x128xf32> to vector<1x128xf32>
    %334 = vector.shape_cast %333 : vector<1x128xf32> to vector<1x128xf32>
    %335 = vector.broadcast %334 : vector<1x128xf32> to vector<16x128xf32>
    %c1_224 = arith.constant 1 : index
    %c96_225 = arith.constant 96 : index
    %c0_226 = arith.constant 0 : index
    %336 = vector.load %arg11[%c1_224, %c96_225, %c0_226] : memref<2x128x128xf32, #tpu.memory_space<vmem>>, vector<1x16x128xf32>
    %337 = vector.shape_cast %336 : vector<1x16x128xf32> to vector<16x128xf32>
    %338 = vector.shape_cast %335 : vector<16x128xf32> to vector<1x16x128xf32>
    tpu.vector_store %arg11[%c1_224, %c96_225, %c0_226], %338 {strides = array<i32>} : memref<2x128x128xf32, #tpu.memory_space<vmem>>, vector<1x16x128xf32>,
    %339 = vector.extract_strided_slice %248 {offsets = [7, 0], sizes = [1, 128], strides = [1, 1]} : vector<8x128xf32> to vector<1x128xf32>
    %340 = vector.shape_cast %339 : vector<1x128xf32> to vector<1x128xf32>
    %341 = vector.broadcast %340 : vector<1x128xf32> to vector<16x128xf32>
    %c1_227 = arith.constant 1 : index
    %c112_228 = arith.constant 112 : index
    %c0_229 = arith.constant 0 : index
    %342 = vector.load %arg11[%c1_227, %c112_228, %c0_229] : memref<2x128x128xf32, #tpu.memory_space<vmem>>, vector<1x16x128xf32>
    %343 = vector.shape_cast %342 : vector<1x16x128xf32> to vector<16x128xf32>
    %344 = vector.shape_cast %341 : vector<16x128xf32> to vector<1x16x128xf32>
    tpu.vector_store %arg11[%c1_227, %c112_228, %c0_229], %344 {strides = array<i32>} : memref<2x128x128xf32, #tpu.memory_space<vmem>>, vector<1x16x128xf32>,
    %c0_230 = arith.constant 0 : index
    %c0_231 = arith.constant 0 : index
    %c0_232 = arith.constant 0 : index
    %345 = vector.load %arg11[%c0_230, %c0_231, %c0_232] : memref<2x128x128xf32, #tpu.memory_space<vmem>>, vector<1x127x128xf32>
    %346 = vector.shape_cast %345 : vector<1x127x128xf32> to vector<127x128xf32>
    %c0_233 = arith.constant 0 : index
    %c0_234 = arith.constant 0 : index
    %c0_235 = arith.constant 0 : index
    %347 = vector.load %arg3[%c0_233, %c0_234, %c0_235] : memref<3x128x128xbf16, #tpu.memory_space<vmem>>, vector<1x128x128xbf16>
    %348 = vector.shape_cast %347 : vector<1x128x128xbf16> to vector<128x128xbf16>
    %349 = arith.truncf %346 : vector<127x128xf32> to vector<127x128xbf16>
    %cst_236 = arith.constant dense<0.000000e+00> : vector<127x128xf32>
    %350 = tpu.matmul %349, %348, %cst_236 {dimension_numbers = #tpu.dot_dimension_numbers<[1], [0], [0], [1], [0, 0, 1, 1], [], []>} : vector<127x128xbf16>, vector<128x128xbf16>, vector<127x128xf32> -> vector<127x128xf32>
    %c0_237 = arith.constant 0 : index
    %c0_238 = arith.constant 0 : index
    %351 = vector.load %arg12[%c0_237, %c0_238] : memref<127x128xf32, #tpu.memory_space<vmem>>, vector<127x128xf32>
    tpu.vector_store %arg12[%c0_237, %c0_238], %350 {strides = array<i32>} : memref<127x128xf32, #tpu.memory_space<vmem>>, vector<127x128xf32>,
    %c0_239 = arith.constant 0 : index
    %c0_240 = arith.constant 0 : index
    %352 = vector.load %arg12[%c0_239, %c0_240] : memref<127x128xf32, #tpu.memory_space<vmem>>, vector<127x128xf32>
    %c1_241 = arith.constant 1 : index
    %c0_242 = arith.constant 0 : index
    %c0_243 = arith.constant 0 : index
    %353 = vector.load %arg11[%c1_241, %c0_242, %c0_243] : memref<2x128x128xf32, #tpu.memory_space<vmem>>, vector<1x127x128xf32>
    %354 = vector.shape_cast %353 : vector<1x127x128xf32> to vector<127x128xf32>
    %c1_244 = arith.constant 1 : index
    %c0_245 = arith.constant 0 : index
    %c0_246 = arith.constant 0 : index
    %355 = vector.load %arg3[%c1_244, %c0_245, %c0_246] : memref<3x128x128xbf16, #tpu.memory_space<vmem>>, vector<1x128x128xbf16>
    %356 = vector.shape_cast %355 : vector<1x128x128xbf16> to vector<128x128xbf16>
    %357 = arith.truncf %354 : vector<127x128xf32> to vector<127x128xbf16>
    %cst_247 = arith.constant dense<0.000000e+00> : vector<127x128xf32>
    %358 = tpu.matmul %357, %356, %cst_247 {dimension_numbers = #tpu.dot_dimension_numbers<[1], [0], [0], [1], [0, 0, 1, 1], [], []>} : vector<127x128xbf16>, vector<128x128xbf16>, vector<127x128xf32> -> vector<127x128xf32>
    %359 = arith.addf %352, %358 : vector<127x128xf32>
    %c0_248 = arith.constant 0 : index
    %c0_249 = arith.constant 0 : index
    %360 = vector.load %arg12[%c0_248, %c0_249] : memref<127x128xf32, #tpu.memory_space<vmem>>, vector<127x128xf32>
    tpu.vector_store %arg12[%c0_248, %c0_249], %359 {strides = array<i32>} : memref<127x128xf32, #tpu.memory_space<vmem>>, vector<127x128xf32>,
    %c0_250 = arith.constant 0 : index
    %c0_251 = arith.constant 0 : index
    %361 = vector.load %arg12[%c0_250, %c0_251] : memref<127x128xf32, #tpu.memory_space<vmem>>, vector<127x128xf32>
    %c0_252 = arith.constant 0 : index
    %c1_253 = arith.constant 1 : index
    %c0_254 = arith.constant 0 : index
    %362 = vector.load %arg11[%c0_252, %c1_253, %c0_254] : memref<2x128x128xf32, #tpu.memory_space<vmem>>, vector<1x127x128xf32>
    %363 = vector.shape_cast %362 : vector<1x127x128xf32> to vector<127x128xf32>
    %c2_255 = arith.constant 2 : index
    %c0_256 = arith.constant 0 : index
    %c0_257 = arith.constant 0 : index
    %364 = vector.load %arg3[%c2_255, %c0_256, %c0_257] : memref<3x128x128xbf16, #tpu.memory_space<vmem>>, vector<1x128x128xbf16>
    %365 = vector.shape_cast %364 : vector<1x128x128xbf16> to vector<128x128xbf16>
    %366 = arith.truncf %363 : vector<127x128xf32> to vector<127x128xbf16>
    %cst_258 = arith.constant dense<0.000000e+00> : vector<127x128xf32>
    %367 = tpu.matmul %366, %365, %cst_258 {dimension_numbers = #tpu.dot_dimension_numbers<[1], [0], [0], [1], [0, 0, 1, 1], [], []>} : vector<127x128xbf16>, vector<128x128xbf16>, vector<127x128xf32> -> vector<127x128xf32>
    %368 = arith.addf %361, %367 : vector<127x128xf32>
    %c0_259 = arith.constant 0 : index
    %c0_260 = arith.constant 0 : index
    %369 = vector.load %arg12[%c0_259, %c0_260] : memref<127x128xf32, #tpu.memory_space<vmem>>, vector<127x128xf32>
    tpu.vector_store %arg12[%c0_259, %c0_260], %368 {strides = array<i32>} : memref<127x128xf32, #tpu.memory_space<vmem>>, vector<127x128xf32>,
    %c0_261 = arith.constant 0 : index
    %c0_262 = arith.constant 0 : index
    %370 = tpu.strided_load %arg12[%c0_261, %c0_262] {strides = array<i32: 3, 1>} : memref<127x128xf32, #tpu.memory_space<vmem>>, vector<42x128xf32>
    %c1_263 = arith.constant 1 : index
    %c0_264 = arith.constant 0 : index
    %371 = tpu.strided_load %arg12[%c1_263, %c0_264] {strides = array<i32: 3, 1>} : memref<127x128xf32, #tpu.memory_space<vmem>>, vector<42x128xf32>
    %372 = arith.maximumf %370, %371 : vector<42x128xf32>
    %c2_265 = arith.constant 2 : index
    %c0_266 = arith.constant 0 : index
    %373 = tpu.strided_load %arg12[%c2_265, %c0_266] {strides = array<i32: 3, 1>} : memref<127x128xf32, #tpu.memory_space<vmem>>, vector<42x128xf32>
    %374 = arith.maximumf %372, %373 : vector<42x128xf32>
    %375 = vector.broadcast %3 : vector<1x128xf32> to vector<42x128xf32>
    %376 = arith.addf %374, %375 : vector<42x128xf32>
    %cst_267 = arith.constant 0.000000e+00 : f32
    %377 = vector.broadcast %cst_267 : f32 to vector<42x128xf32>
    %378 = arith.cmpf ogt, %376, %377 : vector<42x128xf32>
    %cst_268 = arith.constant 0.00999999977 : f32
    %379 = vector.broadcast %cst_268 : f32 to vector<42x128xf32>
    %380 = arith.mulf %379, %376 : vector<42x128xf32>
    %381 = arith.select %378, %376, %380 : vector<42x128xi1>, vector<42x128xf32>
    %382 = vector.broadcast %4 : vector<1x128xf32> to vector<42x128xf32>
    %383 = arith.mulf %381, %382 : vector<42x128xf32>
    %384 = vector.broadcast %5 : vector<1x128xf32> to vector<42x128xf32>
    %385 = arith.addf %383, %384 : vector<42x128xf32>
    %c0_269 = arith.constant 0 : index
    %c0_270 = arith.constant 0 : index
    %386 = vector.load %arg13[%c0_269, %c0_270] : memref<42x128xf32, #tpu.memory_space<vmem>>, vector<42x128xf32>
    tpu.vector_store %arg13[%c0_269, %c0_270], %385 {strides = array<i32>} : memref<42x128xf32, #tpu.memory_space<vmem>>, vector<42x128xf32>,
    %c0_271 = arith.constant 0 : index
    %c0_272 = arith.constant 0 : index
    %387 = tpu.strided_load %arg13[%c0_271, %c0_272] {strides = array<i32: 2, 1>} : memref<42x128xf32, #tpu.memory_space<vmem>>, vector<20x128xf32>
    %c0_273 = arith.constant 0 : index
    %c0_274 = arith.constant 0 : index
    %c0_275 = arith.constant 0 : index
    %388 = vector.load %arg4[%c0_273, %c0_274, %c0_275] : memref<3x128x128xbf16, #tpu.memory_space<vmem>>, vector<1x128x128xbf16>
    %389 = vector.shape_cast %388 : vector<1x128x128xbf16> to vector<128x128xbf16>
    %390 = arith.truncf %387 : vector<20x128xf32> to vector<20x128xbf16>
    %cst_276 = arith.constant dense<0.000000e+00> : vector<20x128xf32>
    %391 = tpu.matmul %390, %389, %cst_276 {dimension_numbers = #tpu.dot_dimension_numbers<[1], [0], [0], [1], [0, 0, 1, 1], [], []>} : vector<20x128xbf16>, vector<128x128xbf16>, vector<20x128xf32> -> vector<20x128xf32>
    %c0_277 = arith.constant 0 : index
    %c0_278 = arith.constant 0 : index
    %392 = vector.load %arg14[%c0_277, %c0_278] : memref<20x128xf32, #tpu.memory_space<vmem>>, vector<20x128xf32>
    tpu.vector_store %arg14[%c0_277, %c0_278], %391 {strides = array<i32>} : memref<20x128xf32, #tpu.memory_space<vmem>>, vector<20x128xf32>,
    %c0_279 = arith.constant 0 : index
    %c0_280 = arith.constant 0 : index
    %393 = vector.load %arg14[%c0_279, %c0_280] : memref<20x128xf32, #tpu.memory_space<vmem>>, vector<20x128xf32>
    %c1_281 = arith.constant 1 : index
    %c0_282 = arith.constant 0 : index
    %394 = tpu.strided_load %arg13[%c1_281, %c0_282] {strides = array<i32: 2, 1>} : memref<42x128xf32, #tpu.memory_space<vmem>>, vector<20x128xf32>
    %c1_283 = arith.constant 1 : index
    %c0_284 = arith.constant 0 : index
    %c0_285 = arith.constant 0 : index
    %395 = vector.load %arg4[%c1_283, %c0_284, %c0_285] : memref<3x128x128xbf16, #tpu.memory_space<vmem>>, vector<1x128x128xbf16>
    %396 = vector.shape_cast %395 : vector<1x128x128xbf16> to vector<128x128xbf16>
    %397 = arith.truncf %394 : vector<20x128xf32> to vector<20x128xbf16>
    %cst_286 = arith.constant dense<0.000000e+00> : vector<20x128xf32>
    %398 = tpu.matmul %397, %396, %cst_286 {dimension_numbers = #tpu.dot_dimension_numbers<[1], [0], [0], [1], [0, 0, 1, 1], [], []>} : vector<20x128xbf16>, vector<128x128xbf16>, vector<20x128xf32> -> vector<20x128xf32>
    %399 = arith.addf %393, %398 : vector<20x128xf32>
    %c0_287 = arith.constant 0 : index
    %c0_288 = arith.constant 0 : index
    %400 = vector.load %arg14[%c0_287, %c0_288] : memref<20x128xf32, #tpu.memory_space<vmem>>, vector<20x128xf32>
    tpu.vector_store %arg14[%c0_287, %c0_288], %399 {strides = array<i32>} : memref<20x128xf32, #tpu.memory_space<vmem>>, vector<20x128xf32>,
    %c0_289 = arith.constant 0 : index
    %c0_290 = arith.constant 0 : index
    %401 = vector.load %arg14[%c0_289, %c0_290] : memref<20x128xf32, #tpu.memory_space<vmem>>, vector<20x128xf32>
    %c2_291 = arith.constant 2 : index
    %c0_292 = arith.constant 0 : index
    %402 = tpu.strided_load %arg13[%c2_291, %c0_292] {strides = array<i32: 2, 1>} : memref<42x128xf32, #tpu.memory_space<vmem>>, vector<20x128xf32>
    %c2_293 = arith.constant 2 : index
    %c0_294 = arith.constant 0 : index
    %c0_295 = arith.constant 0 : index
    %403 = vector.load %arg4[%c2_293, %c0_294, %c0_295] : memref<3x128x128xbf16, #tpu.memory_space<vmem>>, vector<1x128x128xbf16>
    %404 = vector.shape_cast %403 : vector<1x128x128xbf16> to vector<128x128xbf16>
    %405 = arith.truncf %402 : vector<20x128xf32> to vector<20x128xbf16>
    %cst_296 = arith.constant dense<0.000000e+00> : vector<20x128xf32>
    %406 = tpu.matmul %405, %404, %cst_296 {dimension_numbers = #tpu.dot_dimension_numbers<[1], [0], [0], [1], [0, 0, 1, 1], [], []>} : vector<20x128xbf16>, vector<128x128xbf16>, vector<20x128xf32> -> vector<20x128xf32>
    %407 = arith.addf %401, %406 : vector<20x128xf32>
    %c0_297 = arith.constant 0 : index
    %c0_298 = arith.constant 0 : index
    %408 = vector.load %arg14[%c0_297, %c0_298] : memref<20x128xf32, #tpu.memory_space<vmem>>, vector<20x128xf32>
    tpu.vector_store %arg14[%c0_297, %c0_298], %407 {strides = array<i32>} : memref<20x128xf32, #tpu.memory_space<vmem>>, vector<20x128xf32>,
    %c0_299 = arith.constant 0 : index
    %c0_300 = arith.constant 0 : index
    %409 = tpu.strided_load %arg14[%c0_299, %c0_300] {strides = array<i32: 2, 1>} : memref<20x128xf32, #tpu.memory_space<vmem>>, vector<10x128xf32>
    %c1_301 = arith.constant 1 : index
    %c0_302 = arith.constant 0 : index
    %410 = tpu.strided_load %arg14[%c1_301, %c0_302] {strides = array<i32: 2, 1>} : memref<20x128xf32, #tpu.memory_space<vmem>>, vector<10x128xf32>
    %411 = arith.maximumf %409, %410 : vector<10x128xf32>
    %412 = vector.broadcast %6 : vector<1x128xf32> to vector<10x128xf32>
    %413 = arith.addf %411, %412 : vector<10x128xf32>
    %cst_303 = arith.constant 0.000000e+00 : f32
    %414 = vector.broadcast %cst_303 : f32 to vector<10x128xf32>
    %415 = arith.cmpf ogt, %413, %414 : vector<10x128xf32>
    %cst_304 = arith.constant 0.00999999977 : f32
    %416 = vector.broadcast %cst_304 : f32 to vector<10x128xf32>
    %417 = arith.mulf %416, %413 : vector<10x128xf32>
    %418 = arith.select %415, %413, %417 : vector<10x128xi1>, vector<10x128xf32>
    %419 = vector.broadcast %7 : vector<1x128xf32> to vector<10x128xf32>
    %420 = arith.mulf %418, %419 : vector<10x128xf32>
    %421 = vector.broadcast %8 : vector<1x128xf32> to vector<10x128xf32>
    %422 = arith.addf %420, %421 : vector<10x128xf32>
    %c1_305 = arith.constant 1 : index
    %c0_306 = arith.constant 0 : index
    %c0_307 = arith.constant 0 : index
    %423 = vector.load %arg15[%c1_305, %c0_306, %c0_307] : memref<2x10x128xf32, #tpu.memory_space<vmem>>, vector<1x10x128xf32>
    %424 = vector.shape_cast %423 : vector<1x10x128xf32> to vector<10x128xf32>
    %425 = vector.shape_cast %422 : vector<10x128xf32> to vector<1x10x128xf32>
    tpu.vector_store %arg15[%c1_305, %c0_306, %c0_307], %425 {strides = array<i32>} : memref<2x10x128xf32, #tpu.memory_space<vmem>>, vector<1x10x128xf32>,
    %c0_308 = arith.constant 0 : index
    %c0_309 = arith.constant 0 : index
    %c0_310 = arith.constant 0 : index
    %426 = vector.load %arg15[%c0_308, %c0_309, %c0_310] : memref<2x10x128xf32, #tpu.memory_space<vmem>>, vector<2x10x128xf32>
    %427 = vector.extract_strided_slice %426 {offsets = [0, 0, 0], sizes = [2, 1, 128], strides = [1, 1, 1]} : vector<2x10x128xf32> to vector<2x1x128xf32>
    %428 = vector.shape_cast %427 : vector<2x1x128xf32> to vector<2x128xf32>
    %c0_311 = arith.constant 0 : index
    %c0_312 = arith.constant 0 : index
    %c0_313 = arith.constant 0 : index
    %429 = vector.load %arg5[%c0_311, %c0_312, %c0_313] : memref<10x128x128xbf16, #tpu.memory_space<vmem>>, vector<1x128x128xbf16>
    %430 = vector.shape_cast %429 : vector<1x128x128xbf16> to vector<128x128xbf16>
    %431 = arith.truncf %428 : vector<2x128xf32> to vector<2x128xbf16>
    %cst_314 = arith.constant dense<0.000000e+00> : vector<2x128xf32>
    %432 = tpu.matmul %431, %430, %cst_314 {dimension_numbers = #tpu.dot_dimension_numbers<[1], [0], [0], [1], [0, 0, 1, 1], [], []>} : vector<2x128xbf16>, vector<128x128xbf16>, vector<2x128xf32> -> vector<2x128xf32>
    %433 = vector.extract_strided_slice %426 {offsets = [0, 1, 0], sizes = [2, 1, 128], strides = [1, 1, 1]} : vector<2x10x128xf32> to vector<2x1x128xf32>
    %434 = vector.shape_cast %433 : vector<2x1x128xf32> to vector<2x128xf32>
    %c1_315 = arith.constant 1 : index
    %c0_316 = arith.constant 0 : index
    %c0_317 = arith.constant 0 : index
    %435 = vector.load %arg5[%c1_315, %c0_316, %c0_317] : memref<10x128x128xbf16, #tpu.memory_space<vmem>>, vector<1x128x128xbf16>
    %436 = vector.shape_cast %435 : vector<1x128x128xbf16> to vector<128x128xbf16>
    %437 = arith.truncf %434 : vector<2x128xf32> to vector<2x128xbf16>
    %cst_318 = arith.constant dense<0.000000e+00> : vector<2x128xf32>
    %438 = tpu.matmul %437, %436, %cst_318 {dimension_numbers = #tpu.dot_dimension_numbers<[1], [0], [0], [1], [0, 0, 1, 1], [], []>} : vector<2x128xbf16>, vector<128x128xbf16>, vector<2x128xf32> -> vector<2x128xf32>
    %439 = arith.addf %432, %438 : vector<2x128xf32>
    %440 = vector.extract_strided_slice %426 {offsets = [0, 2, 0], sizes = [2, 1, 128], strides = [1, 1, 1]} : vector<2x10x128xf32> to vector<2x1x128xf32>
    %441 = vector.shape_cast %440 : vector<2x1x128xf32> to vector<2x128xf32>
    %c2_319 = arith.constant 2 : index
    %c0_320 = arith.constant 0 : index
    %c0_321 = arith.constant 0 : index
    %442 = vector.load %arg5[%c2_319, %c0_320, %c0_321] : memref<10x128x128xbf16, #tpu.memory_space<vmem>>, vector<1x128x128xbf16>
    %443 = vector.shape_cast %442 : vector<1x128x128xbf16> to vector<128x128xbf16>
    %444 = arith.truncf %441 : vector<2x128xf32> to vector<2x128xbf16>
    %cst_322 = arith.constant dense<0.000000e+00> : vector<2x128xf32>
    %445 = tpu.matmul %444, %443, %cst_322 {dimension_numbers = #tpu.dot_dimension_numbers<[1], [0], [0], [1], [0, 0, 1, 1], [], []>} : vector<2x128xbf16>, vector<128x128xbf16>, vector<2x128xf32> -> vector<2x128xf32>
    %446 = arith.addf %439, %445 : vector<2x128xf32>
    %447 = vector.extract_strided_slice %426 {offsets = [0, 3, 0], sizes = [2, 1, 128], strides = [1, 1, 1]} : vector<2x10x128xf32> to vector<2x1x128xf32>
    %448 = vector.shape_cast %447 : vector<2x1x128xf32> to vector<2x128xf32>
    %c3_323 = arith.constant 3 : index
    %c0_324 = arith.constant 0 : index
    %c0_325 = arith.constant 0 : index
    %449 = vector.load %arg5[%c3_323, %c0_324, %c0_325] : memref<10x128x128xbf16, #tpu.memory_space<vmem>>, vector<1x128x128xbf16>
    %450 = vector.shape_cast %449 : vector<1x128x128xbf16> to vector<128x128xbf16>
    %451 = arith.truncf %448 : vector<2x128xf32> to vector<2x128xbf16>
    %cst_326 = arith.constant dense<0.000000e+00> : vector<2x128xf32>
    %452 = tpu.matmul %451, %450, %cst_326 {dimension_numbers = #tpu.dot_dimension_numbers<[1], [0], [0], [1], [0, 0, 1, 1], [], []>} : vector<2x128xbf16>, vector<128x128xbf16>, vector<2x128xf32> -> vector<2x128xf32>
    %453 = arith.addf %446, %452 : vector<2x128xf32>
    %454 = vector.extract_strided_slice %426 {offsets = [0, 4, 0], sizes = [2, 1, 128], strides = [1, 1, 1]} : vector<2x10x128xf32> to vector<2x1x128xf32>
    %455 = vector.shape_cast %454 : vector<2x1x128xf32> to vector<2x128xf32>
    %c4_327 = arith.constant 4 : index
    %c0_328 = arith.constant 0 : index
    %c0_329 = arith.constant 0 : index
    %456 = vector.load %arg5[%c4_327, %c0_328, %c0_329] : memref<10x128x128xbf16, #tpu.memory_space<vmem>>, vector<1x128x128xbf16>
    %457 = vector.shape_cast %456 : vector<1x128x128xbf16> to vector<128x128xbf16>
    %458 = arith.truncf %455 : vector<2x128xf32> to vector<2x128xbf16>
    %cst_330 = arith.constant dense<0.000000e+00> : vector<2x128xf32>
    %459 = tpu.matmul %458, %457, %cst_330 {dimension_numbers = #tpu.dot_dimension_numbers<[1], [0], [0], [1], [0, 0, 1, 1], [], []>} : vector<2x128xbf16>, vector<128x128xbf16>, vector<2x128xf32> -> vector<2x128xf32>
    %460 = arith.addf %453, %459 : vector<2x128xf32>
    %461 = vector.extract_strided_slice %426 {offsets = [0, 5, 0], sizes = [2, 1, 128], strides = [1, 1, 1]} : vector<2x10x128xf32> to vector<2x1x128xf32>
    %462 = vector.shape_cast %461 : vector<2x1x128xf32> to vector<2x128xf32>
    %c5_331 = arith.constant 5 : index
    %c0_332 = arith.constant 0 : index
    %c0_333 = arith.constant 0 : index
    %463 = vector.load %arg5[%c5_331, %c0_332, %c0_333] : memref<10x128x128xbf16, #tpu.memory_space<vmem>>, vector<1x128x128xbf16>
    %464 = vector.shape_cast %463 : vector<1x128x128xbf16> to vector<128x128xbf16>
    %465 = arith.truncf %462 : vector<2x128xf32> to vector<2x128xbf16>
    %cst_334 = arith.constant dense<0.000000e+00> : vector<2x128xf32>
    %466 = tpu.matmul %465, %464, %cst_334 {dimension_numbers = #tpu.dot_dimension_numbers<[1], [0], [0], [1], [0, 0, 1, 1], [], []>} : vector<2x128xbf16>, vector<128x128xbf16>, vector<2x128xf32> -> vector<2x128xf32>
    %467 = arith.addf %460, %466 : vector<2x128xf32>
    %468 = vector.extract_strided_slice %426 {offsets = [0, 6, 0], sizes = [2, 1, 128], strides = [1, 1, 1]} : vector<2x10x128xf32> to vector<2x1x128xf32>
    %469 = vector.shape_cast %468 : vector<2x1x128xf32> to vector<2x128xf32>
    %c6_335 = arith.constant 6 : index
    %c0_336 = arith.constant 0 : index
    %c0_337 = arith.constant 0 : index
    %470 = vector.load %arg5[%c6_335, %c0_336, %c0_337] : memref<10x128x128xbf16, #tpu.memory_space<vmem>>, vector<1x128x128xbf16>
    %471 = vector.shape_cast %470 : vector<1x128x128xbf16> to vector<128x128xbf16>
    %472 = arith.truncf %469 : vector<2x128xf32> to vector<2x128xbf16>
    %cst_338 = arith.constant dense<0.000000e+00> : vector<2x128xf32>
    %473 = tpu.matmul %472, %471, %cst_338 {dimension_numbers = #tpu.dot_dimension_numbers<[1], [0], [0], [1], [0, 0, 1, 1], [], []>} : vector<2x128xbf16>, vector<128x128xbf16>, vector<2x128xf32> -> vector<2x128xf32>
    %474 = arith.addf %467, %473 : vector<2x128xf32>
    %475 = vector.extract_strided_slice %426 {offsets = [0, 7, 0], sizes = [2, 1, 128], strides = [1, 1, 1]} : vector<2x10x128xf32> to vector<2x1x128xf32>
    %476 = vector.shape_cast %475 : vector<2x1x128xf32> to vector<2x128xf32>
    %c7_339 = arith.constant 7 : index
    %c0_340 = arith.constant 0 : index
    %c0_341 = arith.constant 0 : index
    %477 = vector.load %arg5[%c7_339, %c0_340, %c0_341] : memref<10x128x128xbf16, #tpu.memory_space<vmem>>, vector<1x128x128xbf16>
    %478 = vector.shape_cast %477 : vector<1x128x128xbf16> to vector<128x128xbf16>
    %479 = arith.truncf %476 : vector<2x128xf32> to vector<2x128xbf16>
    %cst_342 = arith.constant dense<0.000000e+00> : vector<2x128xf32>
    %480 = tpu.matmul %479, %478, %cst_342 {dimension_numbers = #tpu.dot_dimension_numbers<[1], [0], [0], [1], [0, 0, 1, 1], [], []>} : vector<2x128xbf16>, vector<128x128xbf16>, vector<2x128xf32> -> vector<2x128xf32>
    %481 = arith.addf %474, %480 : vector<2x128xf32>
    %482 = vector.extract_strided_slice %426 {offsets = [0, 8, 0], sizes = [2, 1, 128], strides = [1, 1, 1]} : vector<2x10x128xf32> to vector<2x1x128xf32>
    %483 = vector.shape_cast %482 : vector<2x1x128xf32> to vector<2x128xf32>
    %c8_343 = arith.constant 8 : index
    %c0_344 = arith.constant 0 : index
    %c0_345 = arith.constant 0 : index
    %484 = vector.load %arg5[%c8_343, %c0_344, %c0_345] : memref<10x128x128xbf16, #tpu.memory_space<vmem>>, vector<1x128x128xbf16>
    %485 = vector.shape_cast %484 : vector<1x128x128xbf16> to vector<128x128xbf16>
    %486 = arith.truncf %483 : vector<2x128xf32> to vector<2x128xbf16>
    %cst_346 = arith.constant dense<0.000000e+00> : vector<2x128xf32>
    %487 = tpu.matmul %486, %485, %cst_346 {dimension_numbers = #tpu.dot_dimension_numbers<[1], [0], [0], [1], [0, 0, 1, 1], [], []>} : vector<2x128xbf16>, vector<128x128xbf16>, vector<2x128xf32> -> vector<2x128xf32>
    %488 = arith.addf %481, %487 : vector<2x128xf32>
    %489 = vector.extract_strided_slice %426 {offsets = [0, 9, 0], sizes = [2, 1, 128], strides = [1, 1, 1]} : vector<2x10x128xf32> to vector<2x1x128xf32>
    %490 = vector.shape_cast %489 : vector<2x1x128xf32> to vector<2x128xf32>
    %c9_347 = arith.constant 9 : index
    %c0_348 = arith.constant 0 : index
    %c0_349 = arith.constant 0 : index
    %491 = vector.load %arg5[%c9_347, %c0_348, %c0_349] : memref<10x128x128xbf16, #tpu.memory_space<vmem>>, vector<1x128x128xbf16>
    %492 = vector.shape_cast %491 : vector<1x128x128xbf16> to vector<128x128xbf16>
    %493 = arith.truncf %490 : vector<2x128xf32> to vector<2x128xbf16>
    %cst_350 = arith.constant dense<0.000000e+00> : vector<2x128xf32>
    %494 = tpu.matmul %493, %492, %cst_350 {dimension_numbers = #tpu.dot_dimension_numbers<[1], [0], [0], [1], [0, 0, 1, 1], [], []>} : vector<2x128xbf16>, vector<128x128xbf16>, vector<2x128xf32> -> vector<2x128xf32>
    %495 = arith.addf %488, %494 : vector<2x128xf32>
    %496 = vector.broadcast %9 : vector<1x128xf32> to vector<2x128xf32>
    %497 = arith.addf %495, %496 : vector<2x128xf32>
    %cst_351 = arith.constant 0.000000e+00 : f32
    %498 = vector.broadcast %cst_351 : f32 to vector<2x128xf32>
    %499 = arith.cmpf ogt, %497, %498 : vector<2x128xf32>
    %cst_352 = arith.constant 0.00999999977 : f32
    %500 = vector.broadcast %cst_352 : f32 to vector<2x128xf32>
    %501 = arith.mulf %500, %497 : vector<2x128xf32>
    %502 = arith.select %499, %497, %501 : vector<2x128xi1>, vector<2x128xf32>
    %c0_353 = arith.constant 0 : index
    %c0_354 = arith.constant 0 : index
    %503 = vector.load %arg6[%c0_353, %c0_354] : memref<128x128xbf16, #tpu.memory_space<vmem>>, vector<128x128xbf16>
    %504 = arith.truncf %502 : vector<2x128xf32> to vector<2x128xbf16>
    %cst_355 = arith.constant dense<0.000000e+00> : vector<2x128xf32>
    %505 = tpu.matmul %504, %503, %cst_355 {dimension_numbers = #tpu.dot_dimension_numbers<[1], [0], [0], [1], [0, 0, 1, 1], [], []>} : vector<2x128xbf16>, vector<128x128xbf16>, vector<2x128xf32> -> vector<2x128xf32>
    %506 = vector.broadcast %10 : vector<1x128xf32> to vector<2x128xf32>
    %507 = arith.addf %505, %506 : vector<2x128xf32>
    %cst_356 = arith.constant 0.000000e+00 : f32
    %508 = vector.broadcast %cst_356 : f32 to vector<2x128xf32>
    %509 = arith.cmpf ogt, %507, %508 : vector<2x128xf32>
    %cst_357 = arith.constant 0.00999999977 : f32
    %510 = vector.broadcast %cst_357 : f32 to vector<2x128xf32>
    %511 = arith.mulf %510, %507 : vector<2x128xf32>
    %512 = arith.select %509, %507, %511 : vector<2x128xi1>, vector<2x128xf32>
    %c0_358 = arith.constant 0 : index
    %c0_359 = arith.constant 0 : index
    %513 = vector.load %arg7[%c0_358, %c0_359] : memref<128x128xbf16, #tpu.memory_space<vmem>>, vector<128x128xbf16>
    %514 = arith.truncf %512 : vector<2x128xf32> to vector<2x128xbf16>
    %cst_360 = arith.constant dense<0.000000e+00> : vector<2x128xf32>
    %515 = tpu.matmul %514, %513, %cst_360 {dimension_numbers = #tpu.dot_dimension_numbers<[1], [0], [0], [1], [0, 0, 1, 1], [], []>} : vector<2x128xbf16>, vector<128x128xbf16>, vector<2x128xf32> -> vector<2x128xf32>
    %516 = vector.broadcast %11 : vector<1x128xf32> to vector<2x128xf32>
    %517 = arith.addf %515, %516 : vector<2x128xf32>
    %cst_361 = arith.constant 0.000000e+00 : f32
    %518 = vector.broadcast %cst_361 : f32 to vector<2x128xf32>
    %519 = arith.cmpf ogt, %517, %518 : vector<2x128xf32>
    %cst_362 = arith.constant 0.00999999977 : f32
    %520 = vector.broadcast %cst_362 : f32 to vector<2x128xf32>
    %521 = arith.mulf %520, %517 : vector<2x128xf32>
    %522 = arith.select %519, %517, %521 : vector<2x128xi1>, vector<2x128xf32>
    %c0_363 = arith.constant 0 : index
    %c0_364 = arith.constant 0 : index
    %523 = vector.load %arg9[%c0_363, %c0_364] : memref<2x128xf32, #tpu.memory_space<vmem>>, vector<2x128xf32>
    tpu.vector_store %arg9[%c0_363, %c0_364], %522 {strides = array<i32>} : memref<2x128xf32, #tpu.memory_space<vmem>>, vector<2x128xf32>,
    return
  }
  func.func @transform_0(%arg0: i32) -> (i32, i32, i32) {
    %c0_i32 = arith.constant 0 : i32
    %c0_i32_0 = arith.constant 0 : i32
    %c0_i32_1 = arith.constant 0 : i32
    return %arg0, %c0_i32, %c0_i32_0 : i32, i32, i32
  }
  func.func @transform_1(%arg0: i32) -> (i32, i32, i32) {
    %c0_i32 = arith.constant 0 : i32
    %c0_i32_0 = arith.constant 0 : i32
    %c0_i32_1 = arith.constant 0 : i32
    %c0_i32_2 = arith.constant 0 : i32
    return %c0_i32, %c0_i32_0, %c0_i32_1 : i32, i32, i32
  }
  func.func @transform_2(%arg0: i32) -> (i32, i32, i32) {
    %c0_i32 = arith.constant 0 : i32
    %c0_i32_0 = arith.constant 0 : i32
    %c0_i32_1 = arith.constant 0 : i32
    %c0_i32_2 = arith.constant 0 : i32
    return %c0_i32, %c0_i32_0, %c0_i32_1 : i32, i32, i32
  }
  func.func @transform_3(%arg0: i32) -> (i32, i32, i32) {
    %c0_i32 = arith.constant 0 : i32
    %c0_i32_0 = arith.constant 0 : i32
    %c0_i32_1 = arith.constant 0 : i32
    %c0_i32_2 = arith.constant 0 : i32
    return %c0_i32, %c0_i32_0, %c0_i32_1 : i32, i32, i32
  }
  func.func @transform_4(%arg0: i32) -> (i32, i32, i32) {
    %c0_i32 = arith.constant 0 : i32
    %c0_i32_0 = arith.constant 0 : i32
    %c0_i32_1 = arith.constant 0 : i32
    %c0_i32_2 = arith.constant 0 : i32
    return %c0_i32, %c0_i32_0, %c0_i32_1 : i32, i32, i32
  }
  func.func @transform_5(%arg0: i32) -> (i32, i32) {
    %c0_i32 = arith.constant 0 : i32
    %c0_i32_0 = arith.constant 0 : i32
    %c0_i32_1 = arith.constant 0 : i32
    return %c0_i32, %c0_i32_0 : i32, i32
  }
  func.func @transform_6(%arg0: i32) -> (i32, i32) {
    %c0_i32 = arith.constant 0 : i32
    %c0_i32_0 = arith.constant 0 : i32
    %c0_i32_1 = arith.constant 0 : i32
    return %c0_i32, %c0_i32_0 : i32, i32
  }
  func.func @transform_7(%arg0: i32) -> (i32, i32) {
    %c0_i32 = arith.constant 0 : i32
    %c0_i32_0 = arith.constant 0 : i32
    %c0_i32_1 = arith.constant 0 : i32
    return %c0_i32, %c0_i32_0 : i32, i32
  }
  func.func @transform_8(%arg0: i32) -> (i32, i32) {
    %c0_i32 = arith.constant 0 : i32
    %c0_i32_0 = arith.constant 0 : i32
    return %arg0, %c0_i32 : i32, i32
  }
}

</mosaic_0001>

<bundles_post_ra>
// kernel: cnn_forward.1
= control target key start
LH: loop header
LB: loop body
LE: loop exit
PB: predicated region body
PF: predicated region fallthrough
CT: control target
= control target key end

     0   :  { %s5759_s0 = inlined_call_operand.vmem [shape: f32[2,18,128], index: 0, kind: input, shape index: {}]   ;;  %s5760_s1 = inlined_call_operand.vmem [shape: bf16[2,128,128], index: 1, kind: input, shape index: {}]   ;;  %s5761_s2 = inlined_call_operand.vmem [shape: bf16[3,128,128], index: 2, kind: input, shape index: {}]   ;;  %s5762_s3 = inlined_call_operand.vmem [shape: bf16[3,128,128], index: 3, kind: input, shape index: {}]   ;;  %s5763_s4 = inlined_call_operand.vmem [shape: bf16[10,128,128], index: 4, kind: input, shape index: {}]   ;;  %s5764_s5 = inlined_call_operand.vmem [shape: bf16[128,128], index: 5, kind: input, shape index: {}]   ;;  %s5765_s6 = inlined_call_operand.vmem [shape: bf16[128,128], index: 6, kind: input, shape index: {}]   ;;  %s5766_s7 = inlined_call_operand.vmem [shape: f32[12,128], index: 7, kind: input, shape index: {}]   ;;  %s5767_s8 = inlined_call_operand.hbm [shape: f32[2,128], index: 8, kind: output, shape index: {}]  }
   0x1   :  { %v4601_v0 = vld [vmem:[%s5760_s1 + $0x38] sm:$0xff]  ;;  %v4600_v2 = vld [vmem:[%s5760_s1 + $0x30] sm:$0xff]  ;;  %v4599_v4 = vld [vmem:[%s5760_s1 + $0x28] sm:$0xff] }
   0x2   :  { %v4609_v1 = vld [vmem:[%s5760_s1 + $0x78] sm:$0xff]  ;;  %111 = vmatpush.bf16.msra.mxu0 %v4601_v0  ;;  %v4608_v3 = vld [vmem:[%s5760_s1 + $0x70] sm:$0xff]  ;;  %v4607_v5 = vld [vmem:[%s5760_s1 + $0x68] sm:$0xff] }
   0x3   :  { %205 = vmatpush.bf16.msra.mxu1 %v4609_v1  ;;  %v4598_v6 = vld [vmem:[%s5760_s1 + $0x20] sm:$0xff] }
   0x4   :  { %v4606_v7 = vld [vmem:[%s5760_s1 + $0x60] sm:$0xff] }
   0x6   :  { %112 = vmatpush.bf16.msra.mxu0 %v4600_v2 }
   0x7   :  { %206 = vmatpush.bf16.msra.mxu1 %v4608_v3 }
   0xa   :  { %113 = vmatpush.bf16.msra.mxu0 %v4599_v4 }
   0xb   :  { %207 = vmatpush.bf16.msra.mxu1 %v4607_v5 }
   0xc   :  { %13 = vsyncpa [#allocation9], 0  ;;  %v4597_v8 = vld [vmem:[%s5760_s1 + $0x18] sm:$0xff]  ;;  %v4596_v10 = vld [vmem:[%s5760_s1 + $0x10] sm:$0xff] }
   0xd   :  { %v4605_v9 = vld [vmem:[%s5760_s1 + $0x58] sm:$0xff]  ;;  %v4604_v11 = vld [vmem:[%s5760_s1 + $0x50] sm:$0xff]  ;;  %v4595_v12 = vld [vmem:[%s5760_s1 + $0x8] sm:$0xff] }
   0xe   :  { %114 = vmatpush.bf16.msra.mxu0 %v4598_v6  ;;  %v4603_v13 = vld [vmem:[%s5760_s1 + $0x48] sm:$0xff]  ;;  %v4594_v14 = vld [vmem:[%s5760_s1] sm:$0xff]  ;;  %v4617_v22 = vld [vmem:[%s5761_s2 + $0x38] sm:$0xff] }
   0xf   :  { %208 = vmatpush.bf16.msra.mxu1 %v4606_v7  ;;  %v4602_v15 = vld [vmem:[%s5760_s1 + $0x40] sm:$0xff]  ;;  %v43_v17 = vld [vmem:[%s5759_s0 + $0x8] sm:$0xff]  ;;  %v4625_v23 = vld [vmem:[%s5761_s2 + $0x78] sm:$0xff]  ;;  %371 = vmatpush.bf16.msra.mxu2 %v4617_v22 }
  0x10   :  { %v42_v16 = vld [vmem:[%s5759_s0] sm:$0xff]  ;;  %v136_v19 = vld [vmem:[%s5759_s0 + $0x9] sm:$0xff]  ;;  %541 = vmatpush.bf16.msra.mxu3 %v4625_v23  ;;  %v4633_v26 = vld [vmem:[%s5761_s2 + $0xb8] sm:$0xff] }
  0x11   :  { %v135_v18 = vld [vmem:[%s5759_s0 + $0x1] sm:$0xff]  ;;  %v61_v20 = vpack.c.bf16 %v43_v17, %v42_v16  ;;  %v4616_v24 = vld [vmem:[%s5761_s2 + $0x30] sm:$0xff]  ;;  %v4613_v35 = vld [vmem:[%s5761_s2 + $0x18] sm:$0xff] }
  0x12   :  { %115 = vmatpush.bf16.msra.mxu0 %v4597_v8  ;;  %v155_v21 = vpack.c.bf16 %v136_v19, %v135_v18  ;;  %v4624_v25 = vld [vmem:[%s5761_s2 + $0x70] sm:$0xff]  ;;  %v4615_v27 = vld [vmem:[%s5761_s2 + $0x28] sm:$0xff]  ;;  %v4614_v30 = vld [vmem:[%s5761_s2 + $0x20] sm:$0xff] }
  0x13   :  { %209 = vmatpush.bf16.msra.mxu1 %v4605_v9  ;;  %372 = vmatpush.bf16.msra.mxu2 %v4616_v24  ;;  %v4623_v28 = vld [vmem:[%s5761_s2 + $0x68] sm:$0xff]  ;;  %v4632_v29 = vld [vmem:[%s5761_s2 + $0xb0] sm:$0xff]  ;;  %v4622_v31 = vld [vmem:[%s5761_s2 + $0x60] sm:$0xff] }
  0x14   :  { %542 = vmatpush.bf16.msra.mxu3 %v4624_v25  ;;  %v44_v32 = vld [vmem:[%s5759_s0 + $0x10] sm:$0x1]  ;;  %v4631_v34 = vld [vmem:[%s5761_s2 + $0xa8] sm:$0xff]  ;;  %v4621_v36 = vld [vmem:[%s5761_s2 + $0x58] sm:$0xff] }
  0x15   :  { %v62_v33 = vpack.c.bf16 %v44_v32, %v44_v32  ;;  %v4630_v37 = vld [vmem:[%s5761_s2 + $0xa0] sm:$0xff]  ;;  %v4612_v38 = vld [vmem:[%s5761_s2 + $0x10] sm:$0xff]  ;;  %v4629_v40 = vld [vmem:[%s5761_s2 + $0x98] sm:$0xff] }
  0x16   :  { %116 = vmatpush.bf16.msra.mxu0 %v4596_v10  ;;  %v4620_v39 = vld [vmem:[%s5761_s2 + $0x50] sm:$0xff]  ;;  %v4611_v41 = vld [vmem:[%s5761_s2 + $0x8] sm:$0xff]  ;;  %v4610_v44 = vld [vmem:[%s5761_s2] sm:$0xff] }
  0x17   :  { %210 = vmatpush.bf16.msra.mxu1 %v4604_v11  ;;  %373 = vmatpush.bf16.msra.mxu2 %v4615_v27  ;;  %v4619_v42 = vld [vmem:[%s5761_s2 + $0x48] sm:$0xff]  ;;  %v4628_v43 = vld [vmem:[%s5761_s2 + $0x90] sm:$0xff]  ;;  %v4618_v45 = vld [vmem:[%s5761_s2 + $0x40] sm:$0xff] }
  0x18   :  { %543 = vmatpush.bf16.msra.mxu3 %v4623_v28  ;;  %v4627_v46 = vld [vmem:[%s5761_s2 + $0x88] sm:$0xff]  ;;  %v137_v50 = vld [vmem:[%s5759_s0 + $0x11] sm:$0x1]  ;;  %v4626_v51 = vld [vmem:[%s5761_s2 + $0x80] sm:$0xff] }
  0x19   :  { %v156_v52 = vpack.c.bf16 %v137_v50, %v137_v50  ;;  %v5051_v56 = vld [vmem:[%s5766_s7] ss:$0 sm:$0xff]  ;;  %v5057_v61 = vld [vmem:[%s5766_s7 + $0x1] ss:$0 sm:$0xff]  ;;  %v5062_v63 = vld [vmem:[%s5766_s7 + $0x2] ss:$0 sm:$0xff] }
  0x1a   :  { %117 = vmatpush.bf16.msra.mxu0 %v4595_v12 }
  0x1b   :  { %211 = vmatpush.bf16.msra.mxu1 %v4603_v13  ;;  %374 = vmatpush.bf16.msra.mxu2 %v4614_v30 }
  0x1c   :  { %544 = vmatpush.bf16.msra.mxu3 %v4622_v31 }
  0x1e   :  { %118 = vmatpush.bf16.msra.mxu0 %v4594_v14 }
  0x1f   :  { %212 = vmatpush.bf16.msra.mxu1 %v4602_v15  ;;  %375 = vmatpush.bf16.msra.mxu2 %v4613_v35 }
  0x20   :  { %545 = vmatpush.bf16.msra.mxu3 %v4621_v36 }
  0x21   :  { %119 = vmatmul.bf16.vlgmr.msra.gmra.mxu0 %v61_v20 }
  0x22   :  { %213 = vmatmul.bf16.vlgmr.msra.gmra.mxu1 %v155_v21  ;;  %727 = vmatpush.bf16.msrb.mxu0 %v4633_v26 }
  0x23   :  { %376 = vmatpush.bf16.msra.mxu2 %v4612_v38 }
  0x24   :  { %546 = vmatpush.bf16.msra.mxu3 %v4620_v39 }
  0x26   :  { %728 = vmatpush.bf16.msrb.mxu0 %v4632_v29 }
  0x27   :  { %377 = vmatpush.bf16.msra.mxu2 %v4611_v41 }
  0x28   :  { %547 = vmatpush.bf16.msra.mxu3 %v4619_v42 }
  0x2a   :  { %729 = vmatpush.bf16.msrb.mxu0 %v4631_v34 }
  0x2b   :  { %378 = vmatpush.bf16.msra.mxu2 %v4610_v44 }
  0x2c   :  { %548 = vmatpush.bf16.msra.mxu3 %v4618_v45 }
  0x2e   :  { %730 = vmatpush.bf16.msrb.mxu0 %v4630_v37 }
  0x31   :  { %124 = vmatmul.bf16.gmra.mxu0 %v62_v33 }
  0x32   :  { %731 = vmatpush.bf16.msrb.mxu0 %v4629_v40  ;;  %218 = vmatmul.bf16.gmra.mxu1 %v156_v52 }
  0x36   :  { %732 = vmatpush.bf16.msrb.mxu0 %v4628_v43 }
  0x3a   :  { %733 = vmatpush.bf16.msrb.mxu0 %v4627_v46 }
  0x3e   :  { %734 = vmatpush.bf16.msrb.mxu0 %v4626_v51 }
  0x9e   :  { %v120_v47 = vpop.f32.mrf.mxu0 }
  0x9f   :  { %v214_v48 = vpop.f32.mrf.mxu1 }
  0xa0   :  { %v223_v49 = vadd.f32 %v214_v48, %v120_v47 }
  0xa2   :  { %226 = vst [vmem:[#allocation2] sm:$0xff] %v223_v49 }
  0xa6   :  { %v122_v53 = vpop.f32.mrf.mxu0 }
  0xa7   :  { %v216_v54 = vpop.f32.mrf.mxu1 }
  0xa8   :  { %v224_v55 = vadd.f32 %v216_v54, %v122_v53 }
  0xaa   :  { %227 = vst [vmem:[#allocation2 + $0x8] sm:$0xff] %v224_v55 }
  0xae   :  { %v125_v31 = vpop.f32.mrf.mxu0 }
  0xaf   :  { %131 = vst [vmem:[#allocation2 + $0x10] sm:$0x1] %v125_v31  ;;  %v219_v44 = vpop.f32.mrf.mxu1 }
  0xb1   :  { %v229_v57 = vld [vmem:[#allocation2] ss:$2 sm:$0xff]  ;;  %v231_v58 = vld [vmem:[#allocation2 + $0x1] ss:$2 sm:$0xff] }
  0xb2   :  { %v232_v59 = vmax.f32 %v229_v57, %v231_v58 }
  0xb4   :  { %v234_v60 = vadd.f32 %v5051_v56, %v232_v59 }
  0xb6   :  { %vm235_vm0 = vcmp.gt.f32.partialorder %v234_v60, 0.0  ;;  %v236_v62 = vmul.f32 0.01, %v234_v60  ;;  %v127_v35 = vpop.f32.mrf.mxu0  ;;  %v134_v43 = vld [vmem:[#allocation2 + $0x10] sm:$0x1] }
  0xb7   :  { %v225_v47 = vadd.f32 %v219_v44, %v134_v43  ;;  %v221_v50 = vpop.f32.mrf.mxu1 }
  0xb8   :  { %v237_v0 = vsel %vm235_vm0, %v234_v60, %v236_v62 }
  0xb9   :  { %v239_v1 = vmul.f32 %v5057_v61, %v237_v0  ;;  %228 = vst [vmem:[#allocation2 + $0x10] sm:$0x1] %v225_v47 }
  0xbb   :  { %v241_v2 = vadd.f32 %v5062_v63, %v239_v1 }
  0xbd   :  { %v242_v3 = vperm.slane %v241_v2, 0  ;;  %v245_v4 = vperm.slane %v241_v2, 1  ;;  %v248_v6 = vperm.slane %v241_v2, 2  ;;  %v251_v7 = vperm.slane %v241_v2, 3 }
  0xbe   :  { %v254_v8 = vperm.slane %v241_v2, 4  ;;  %v257_v9 = vperm.slane %v241_v2, 5  ;;  %v260_v11 = vperm.slane %v241_v2, 6  ;;  %v263_v14 = vperm.slane %v241_v2, 7 }
  0xbf   :  { %243 = vst [vmem:[#allocation3] sm:$0xff] %v242_v3  ;;  %v315_v5 = vpack.c.bf16 %v242_v3, %v242_v3  ;;  %v316_v15 = vpack.c.bf16 %v245_v4, %v245_v4  ;;  %v317_v19 = vpack.c.bf16 %v248_v6, %v248_v6  ;;  %v318_v23 = vpack.c.bf16 %v251_v7, %v251_v7 }
  0xc0   :  { %244 = vst [vmem:[#allocation3 + $0x8] sm:$0xff] %v242_v3  ;;  %v319_v27 = vpack.c.bf16 %v254_v8, %v254_v8  ;;  %v320_v32 = vpack.c.bf16 %v257_v9, %v257_v9  ;;  %v321_v37 = vpack.c.bf16 %v260_v11, %v260_v11 }
  0xc1   :  { %379 = vmatmul.bf16.vlgmr.msra.gmra.mxu2 %v315_v5  ;;  %549 = vmatmul.bf16.vlgmr.msra.gmra.mxu3 %v315_v5  ;;  %246 = vst [vmem:[#allocation3 + $0x10] sm:$0xff] %v245_v4 }
  0xc2   :  { %247 = vst [vmem:[#allocation3 + $0x18] sm:$0xff] %v245_v4 }
  0xc3   :  { %249 = vst [vmem:[#allocation3 + $0x20] sm:$0xff] %v248_v6 }
  0xc4   :  { %250 = vst [vmem:[#allocation3 + $0x28] sm:$0xff] %v248_v6 }
  0xc5   :  { %252 = vst [vmem:[#allocation3 + $0x30] sm:$0xff] %v251_v7 }
  0xc6   :  { %253 = vst [vmem:[#allocation3 + $0x38] sm:$0xff] %v251_v7 }
  0xc7   :  { %v638_v10 = vld [vmem:[#allocation3 + $0x1] sm:$0xff]  ;;  %255 = vst [vmem:[#allocation3 + $0x40] sm:$0xff] %v254_v8 }
  0xc8   :  { %v639_v12 = vld [vmem:[#allocation3 + $0x9] sm:$0xff]  ;;  %256 = vst [vmem:[#allocation3 + $0x48] sm:$0xff] %v254_v8 }
  0xc9   :  { %v671_v13 = vpack.c.bf16 %v639_v12, %v638_v10  ;;  %258 = vst [vmem:[#allocation3 + $0x50] sm:$0xff] %v257_v9  ;;  %v640_v16 = vld [vmem:[#allocation3 + $0x11] sm:$0xff] }
  0xca   :  { %259 = vst [vmem:[#allocation3 + $0x58] sm:$0xff] %v257_v9  ;;  %v641_v17 = vld [vmem:[#allocation3 + $0x19] sm:$0xff] }
  0xcb   :  { %735 = vmatmul.bf16.vlgmr.msrb.gmra.mxu0 %v671_v13  ;;  %261 = vst [vmem:[#allocation3 + $0x60] sm:$0xff] %v260_v11  ;;  %v672_v18 = vpack.c.bf16 %v641_v17, %v640_v16  ;;  %v642_v20 = vld [vmem:[#allocation3 + $0x21] sm:$0xff] }
  0xcc   :  { %262 = vst [vmem:[#allocation3 + $0x68] sm:$0xff] %v260_v11  ;;  %v643_v21 = vld [vmem:[#allocation3 + $0x29] sm:$0xff] }
  0xcd   :  { %264 = vst [vmem:[#allocation3 + $0x70] sm:$0xff] %v263_v14  ;;  %v673_v22 = vpack.c.bf16 %v643_v21, %v642_v20  ;;  %v644_v24 = vld [vmem:[#allocation3 + $0x31] sm:$0xff] }
  0xce   :  { %265 = vst [vmem:[#allocation3 + $0x78] sm:$0xff] %v263_v14  ;;  %v645_v25 = vld [vmem:[#allocation3 + $0x39] sm:$0xff] }
  0xcf   :  { %282 = vst [vmem:[#allocation3 + $0xf8] sm:$0xff] %v263_v14  ;;  %v674_v26 = vpack.c.bf16 %v645_v25, %v644_v24  ;;  %v646_v28 = vld [vmem:[#allocation3 + $0x41] sm:$0xff]  ;;  %v5080_v25 = vld [vmem:[%s5766_s7 + $0x5] ss:$0 sm:$0xff] }
  0xd0   :  { %v647_v29 = vld [vmem:[#allocation3 + $0x49] sm:$0xff] }
  0xd1   :  { %384 = vmatmul.bf16.gmra.mxu2 %v316_v15  ;;  %554 = vmatmul.bf16.gmra.mxu3 %v316_v15  ;;  %v675_v30 = vpack.c.bf16 %v647_v29, %v646_v28  ;;  %v648_v33 = vld [vmem:[#allocation3 + $0x51] sm:$0xff] }
  0xd2   :  { %v649_v34 = vld [vmem:[#allocation3 + $0x59] sm:$0xff] }
  0xd3   :  { %v676_v36 = vpack.c.bf16 %v649_v34, %v648_v33  ;;  %v650_v38 = vld [vmem:[#allocation3 + $0x61] sm:$0xff] }
  0xd4   :  { %v651_v39 = vld [vmem:[#allocation3 + $0x69] sm:$0xff] }
  0xd5   :  { %v677_v40 = vpack.c.bf16 %v651_v39, %v650_v38  ;;  %v298_v41 = vld [vmem:[#allocation3 + $0x78] sm:$0x7f] }
  0xd6   :  { %v467_v42 = vld [vmem:[#allocation3 + $0xf8] sm:$0x7f]  ;;  %v322_v45 = vpack.c.bf16 %v298_v41, %v263_v14 }
  0xd7   :  { %v492_v46 = vpack.c.bf16 %v467_v42, %v263_v14  ;;  %v652_v48 = vld [vmem:[#allocation3 + $0x71] sm:$0xff]  ;;  %v653_v49 = vld [vmem:[#allocation3 + $0x79] sm:$0x7f]  ;;  %v5069_v14 = vld [vmem:[%s5766_s7 + $0x3] ss:$0 sm:$0xff] }
  0xd8   :  { %v678_v51 = vpack.c.bf16 %v653_v49, %v652_v48 }
  0xdb   :  { %740 = vmatmul.bf16.gmra.mxu0 %v672_v18 }
  0xe1   :  { %389 = vmatmul.bf16.gmra.mxu2 %v317_v19  ;;  %559 = vmatmul.bf16.gmra.mxu3 %v317_v19 }
  0xeb   :  { %745 = vmatmul.bf16.gmra.mxu0 %v673_v22  ;;  %v5075_v22 = vld [vmem:[%s5766_s7 + $0x4] ss:$0 sm:$0xff] }
  0xf1   :  { %394 = vmatmul.bf16.gmra.mxu2 %v318_v23  ;;  %564 = vmatmul.bf16.gmra.mxu3 %v318_v23 }
  0xfb   :  { %750 = vmatmul.bf16.gmra.mxu0 %v674_v26 }
 0x101   :  { %399 = vmatmul.bf16.gmra.mxu2 %v319_v27  ;;  %569 = vmatmul.bf16.gmra.mxu3 %v319_v27 }
 0x10b   :  { %755 = vmatmul.bf16.gmra.mxu0 %v675_v30 }
 0x111   :  { %404 = vmatmul.bf16.gmra.mxu2 %v320_v32  ;;  %574 = vmatmul.bf16.gmra.mxu3 %v320_v32 }
 0x11b   :  { %760 = vmatmul.bf16.gmra.mxu0 %v676_v36 }
 0x121   :  { %409 = vmatmul.bf16.gmra.mxu2 %v321_v37  ;;  %579 = vmatmul.bf16.gmra.mxu3 %v321_v37 }
 0x12b   :  { %765 = vmatmul.bf16.gmra.mxu0 %v677_v40 }
 0x131   :  { %414 = vmatmul.bf16.gmra.mxu2 %v322_v45  ;;  %584 = vmatmul.bf16.gmra.mxu3 %v492_v46 }
 0x13b   :  { %770 = vmatmul.bf16.gmra.mxu0 %v678_v51 }
 0x144   :  { %v380_v52 = vpop.f32.mrf.mxu2  ;;  %v550_v53 = vpop.f32.mrf.mxu3 }
 0x145   :  { %v590_v54 = vadd.f32 %v550_v53, %v380_v52 }
 0x148   :  { %v736_v55 = vpop.f32.mrf.mxu0 }
 0x149   :  { %v776_v57 = vadd.f32 %v736_v55, %v590_v54 }
 0x14b   :  { %792 = vst [vmem:[#allocation4] sm:$0xff] %v776_v57 }
 0x14c   :  { %v382_v58 = vpop.f32.mrf.mxu2  ;;  %v552_v59 = vpop.f32.mrf.mxu3 }
 0x14d   :  { %v591_v60 = vadd.f32 %v552_v59, %v382_v58 }
 0x150   :  { %v738_v62 = vpop.f32.mrf.mxu0 }
 0x151   :  { %v777_v0 = vadd.f32 %v738_v62, %v591_v60 }
 0x153   :  { %793 = vst [vmem:[#allocation4 + $0x8] sm:$0xff] %v777_v0 }
 0x154   :  { %v385_v1 = vpop.f32.mrf.mxu2  ;;  %v555_v2 = vpop.f32.mrf.mxu3 }
 0x155   :  { %v592_v3 = vadd.f32 %v555_v2, %v385_v1  ;;  %v4641_v1 = vld [vmem:[%s5762_s3 + $0x38] sm:$0xff] }
 0x156   :  { %971 = vmatpush.bf16.msrb.mxu1 %v4641_v1  ;;  %v4648_v1 = vld [vmem:[%s5762_s3 + $0x70] sm:$0xff] }
 0x158   :  { %v741_v4 = vpop.f32.mrf.mxu0 }
 0x159   :  { %v778_v5 = vadd.f32 %v741_v4, %v592_v3 }
 0x15b   :  { %794 = vst [vmem:[#allocation4 + $0x10] sm:$0xff] %v778_v5 }
 0x15c   :  { %v387_v6 = vpop.f32.mrf.mxu2  ;;  %v557_v7 = vpop.f32.mrf.mxu3 }
 0x15d   :  { %v593_v8 = vadd.f32 %v557_v7, %v387_v6  ;;  %v4640_v6 = vld [vmem:[%s5762_s3 + $0x30] sm:$0xff] }
 0x15e   :  { %972 = vmatpush.bf16.msrb.mxu1 %v4640_v6 }
 0x160   :  { %v743_v9 = vpop.f32.mrf.mxu0 }
 0x161   :  { %v779_v10 = vadd.f32 %v743_v9, %v593_v8 }
 0x162   :  { %v808_v11 = vld [vmem:[#allocation4] ss:$3 sm:$0xff]  ;;  %v820_v12 = vld [vmem:[#allocation4 + $0x1] ss:$3 sm:$0xff]  ;;  %v838_v15 = vld [vmem:[#allocation4 + $0x2] ss:$3 sm:$0xff] }
 0x163   :  { %795 = vst [vmem:[#allocation4 + $0x18] sm:$0xff] %v779_v10  ;;  %v831_v13 = vmax.f32 %v808_v11, %v820_v12 }
 0x164   :  { %v390_v16 = vpop.f32.mrf.mxu2  ;;  %v560_v17 = vpop.f32.mrf.mxu3 }
 0x165   :  { %v594_v18 = vadd.f32 %v560_v17, %v390_v16  ;;  %v849_v19 = vmax.f32 %v831_v13, %v838_v15  ;;  %v4639_v13 = vld [vmem:[%s5762_s3 + $0x28] sm:$0xff] }
 0x166   :  { %973 = vmatpush.bf16.msrb.mxu1 %v4639_v13 }
 0x167   :  { %v856_v20 = vadd.f32 %v5069_v14, %v849_v19  ;;  %v4638_v19 = vld [vmem:[%s5762_s3 + $0x20] sm:$0xff] }
 0x168   :  { %v746_v21 = vpop.f32.mrf.mxu0 }
 0x169   :  { %v780_v23 = vadd.f32 %v746_v21, %v594_v18  ;;  %vm862_vm1 = vcmp.gt.f32.partialorder %v856_v20, 0.0  ;;  %v868_v24 = vmul.f32 0.01, %v856_v20 }
 0x16a   :  { %974 = vmatpush.bf16.msrb.mxu1 %v4638_v19  ;;  %v4645_v19 = vld [vmem:[%s5762_s3 + $0x58] sm:$0xff] }
 0x16b   :  { %796 = vst [vmem:[#allocation4 + $0x20] sm:$0xff] %v780_v23  ;;  %v874_v26 = vsel %vm862_vm1, %v856_v20, %v868_v24  ;;  %vm2396_vm1 = vcmask 1041409  }
 0x16c   :  { %v392_v27 = vpop.f32.mrf.mxu2  ;;  %v562_v28 = vpop.f32.mrf.mxu3  ;;  %v881_v29 = vmul.f32 %v5075_v22, %v874_v26 }
 0x16d   :  { %v595_v30 = vadd.f32 %v562_v28, %v392_v27  ;;  %v4637_v28 = vld [vmem:[%s5762_s3 + $0x18] sm:$0xff] }
 0x16e   :  { %v888_v31 = vadd.f32 %v5080_v25, %v881_v29  ;;  %975 = vmatpush.bf16.msrb.mxu1 %v4637_v28  ;;  %v4643_v28 = vld [vmem:[%s5762_s3 + $0x48] sm:$0xff] }
 0x170   :  { %v748_v32 = vpop.f32.mrf.mxu0  ;;  %894 = vst [vmem:[#allocation5] sm:$0xff] %v888_v31  ;;  %v4673_v31 = vld [vmem:[%s5760_s1 + $0x78] sm:$0xff] }
 0x171   :  { %v781_v33 = vadd.f32 %v748_v32, %v595_v30  ;;  %v4636_v32 = vld [vmem:[%s5762_s3 + $0x10] sm:$0xff]  ;;  %1381 = vmatpush.bf16.msrb.mxu2 %v4673_v31 }
 0x172   :  { %976 = vmatpush.bf16.msrb.mxu1 %v4636_v32 }
 0x173   :  { %797 = vst [vmem:[#allocation4 + $0x28] sm:$0xff] %v781_v33 }
 0x174   :  { %v395_v34 = vpop.f32.mrf.mxu2  ;;  %v565_v35 = vpop.f32.mrf.mxu3 }
 0x175   :  { %v596_v36 = vadd.f32 %v565_v35, %v395_v34 }
 0x178   :  { %v751_v37 = vpop.f32.mrf.mxu0 }
 0x179   :  { %v782_v38 = vadd.f32 %v751_v37, %v596_v36  ;;  %v4635_v36 = vld [vmem:[%s5762_s3 + $0x8] sm:$0xff] }
 0x17a   :  { %v810_v39 = vld [vmem:[#allocation4 + $0x18] ss:$3 sm:$0xff]  ;;  %v822_v40 = vld [vmem:[#allocation4 + $0x19] ss:$3 sm:$0xff]  ;;  %v840_v42 = vld [vmem:[#allocation4 + $0x1a] ss:$3 sm:$0xff]  ;;  %977 = vmatpush.bf16.msrb.mxu1 %v4635_v36 }
 0x17b   :  { %798 = vst [vmem:[#allocation4 + $0x30] sm:$0xff] %v782_v38  ;;  %v832_v41 = vmax.f32 %v810_v39, %v822_v40  ;;  %v4656_v36 = vld [vmem:[%s5762_s3 + $0xb0] sm:$0xff] }
 0x17c   :  { %v397_v43 = vpop.f32.mrf.mxu2  ;;  %v567_v44 = vpop.f32.mrf.mxu3 }
 0x17d   :  { %v597_v45 = vadd.f32 %v567_v44, %v397_v43  ;;  %v850_v46 = vmax.f32 %v832_v41, %v840_v42  ;;  %v4634_v41 = vld [vmem:[%s5762_s3] sm:$0xff] }
 0x17e   :  { %978 = vmatpush.bf16.msrb.mxu1 %v4634_v41 }
 0x17f   :  { %v857_v47 = vadd.f32 %v5069_v14, %v850_v46 }
 0x180   :  { %v753_v48 = vpop.f32.mrf.mxu0 }
 0x181   :  { %v783_v49 = vadd.f32 %v753_v48, %v597_v45  ;;  %vm863_vm2 = vcmp.gt.f32.partialorder %v857_v47, 0.0  ;;  %v869_v50 = vmul.f32 0.01, %v857_v47 }
 0x183   :  { %799 = vst [vmem:[#allocation4 + $0x38] sm:$0xff] %v783_v49  ;;  %v875_v51 = vsel %vm863_vm2, %v857_v47, %v869_v50 }
 0x184   :  { %v400_v52 = vpop.f32.mrf.mxu2  ;;  %v570_v53 = vpop.f32.mrf.mxu3  ;;  %v882_v54 = vmul.f32 %v5075_v22, %v875_v51 }
 0x185   :  { %v598_v55 = vadd.f32 %v570_v53, %v400_v52 }
 0x186   :  { %v889_v57 = vadd.f32 %v5080_v25, %v882_v54 }
 0x188   :  { %v756_v58 = vpop.f32.mrf.mxu0  ;;  %895 = vst [vmem:[#allocation5 + $0x8] sm:$0xff] %v889_v57 }
 0x189   :  { %v784_v59 = vadd.f32 %v756_v58, %v598_v55 }
 0x18b   :  { %800 = vst [vmem:[#allocation4 + $0x40] sm:$0xff] %v784_v59  ;;  %v4649_v59 = vld [vmem:[%s5762_s3 + $0x78] sm:$0xff] }
 0x18c   :  { %v402_v60 = vpop.f32.mrf.mxu2  ;;  %v572_v62 = vpop.f32.mrf.mxu3  ;;  %1068 = vmatpush.bf16.msra.mxu1 %v4649_v59 }
 0x18d   :  { %v599_v0 = vadd.f32 %v572_v62, %v402_v60 }
 0x190   :  { %v758_v2 = vpop.f32.mrf.mxu0  ;;  %1069 = vmatpush.bf16.msra.mxu1 %v4648_v1  ;;  %v3759_v1 = vld [vmem:[%s5759_s0 + $0x19] sm:$0xff] }
 0x191   :  { %v785_v3 = vadd.f32 %v758_v2, %v599_v0  ;;  %v4672_v0 = vld [vmem:[%s5760_s1 + $0x70] sm:$0xff] }
 0x192   :  { %v812_v4 = vld [vmem:[#allocation4 + $0x30] ss:$3 sm:$0xff]  ;;  %v824_v5 = vld [vmem:[#allocation4 + $0x31] ss:$3 sm:$0xff]  ;;  %v842_v8 = vld [vmem:[#allocation4 + $0x32] ss:$3 sm:$0xff]  ;;  %1382 = vmatpush.bf16.msrb.mxu2 %v4672_v0 }
 0x193   :  { %801 = vst [vmem:[#allocation4 + $0x48] sm:$0xff] %v785_v3  ;;  %v833_v7 = vmax.f32 %v812_v4, %v824_v5  ;;  %v4671_v3 = vld [vmem:[%s5760_s1 + $0x68] sm:$0xff]  ;;  %v900_v5 = vld [vmem:[#allocation5] ss:$2 sm:$0xff] }
 0x194   :  { %v405_v9 = vpop.f32.mrf.mxu2  ;;  %v575_v10 = vpop.f32.mrf.mxu3  ;;  %v4647_v4 = vld [vmem:[%s5762_s3 + $0x68] sm:$0xff]  ;;  %v4666_v0 = vld [vmem:[%s5760_s1 + $0x40] sm:$0xff] }
 0x195   :  { %v600_v11 = vadd.f32 %v575_v10, %v405_v9  ;;  %v851_v12 = vmax.f32 %v833_v7, %v842_v8  ;;  %1070 = vmatpush.bf16.msra.mxu1 %v4647_v4  ;;  %v4646_v8 = vld [vmem:[%s5762_s3 + $0x60] sm:$0xff] }
 0x196   :  { %1383 = vmatpush.bf16.msrb.mxu2 %v4671_v3  ;;  %v4670_v9 = vld [vmem:[%s5760_s1 + $0x60] sm:$0xff] }
 0x197   :  { %v858_v15 = vadd.f32 %v5069_v14, %v851_v12  ;;  %v4662_v3 = vld [vmem:[%s5760_s1 + $0x20] sm:$0xff] }
 0x198   :  { %v761_v16 = vpop.f32.mrf.mxu0 }
 0x199   :  { %v786_v17 = vadd.f32 %v761_v16, %v600_v11  ;;  %vm864_vm3 = vcmp.gt.f32.partialorder %v858_v15, 0.0  ;;  %v870_v18 = vmul.f32 0.01, %v858_v15  ;;  %1071 = vmatpush.bf16.msra.mxu1 %v4646_v8 }
 0x19a   :  { %1384 = vmatpush.bf16.msrb.mxu2 %v4670_v9 }
 0x19b   :  { %802 = vst [vmem:[#allocation4 + $0x50] sm:$0xff] %v786_v17  ;;  %v876_v20 = vsel %vm864_vm3, %v858_v15, %v870_v18 }
 0x19c   :  { %v407_v21 = vpop.f32.mrf.mxu2  ;;  %v577_v23 = vpop.f32.mrf.mxu3  ;;  %v883_v24 = vmul.f32 %v5075_v22, %v876_v20 }
 0x19d   :  { %v601_v26 = vadd.f32 %v577_v23, %v407_v21  ;;  %1072 = vmatpush.bf16.msra.mxu1 %v4645_v19  ;;  %v4644_v23 = vld [vmem:[%s5762_s3 + $0x50] sm:$0xff] }
 0x19e   :  { %v890_v27 = vadd.f32 %v5080_v25, %v883_v24  ;;  %v4669_v24 = vld [vmem:[%s5760_s1 + $0x58] sm:$0xff] }
 0x19f   :  { %1385 = vmatpush.bf16.msrb.mxu2 %v4669_v24 }
 0x1a0   :  { %v763_v29 = vpop.f32.mrf.mxu0  ;;  %896 = vst [vmem:[#allocation5 + $0x10] sm:$0xff] %v890_v27 }
 0x1a1   :  { %v787_v30 = vadd.f32 %v763_v29, %v601_v26  ;;  %1073 = vmatpush.bf16.msra.mxu1 %v4644_v23 }
 0x1a3   :  { %803 = vst [vmem:[#allocation4 + $0x58] sm:$0xff] %v787_v30 }
 0x1a4   :  { %v410_v33 = vpop.f32.mrf.mxu2  ;;  %v580_v34 = vpop.f32.mrf.mxu3 }
 0x1a5   :  { %v602_v35 = vadd.f32 %v580_v34, %v410_v33  ;;  %1074 = vmatpush.bf16.msra.mxu1 %v4643_v28  ;;  %v4642_v33 = vld [vmem:[%s5762_s3 + $0x40] sm:$0xff]  ;;  %v4657_v34 = vld [vmem:[%s5762_s3 + $0xb8] sm:$0xff] }
 0x1a7   :  { %v1096_v8 = vld [vmem:[#allocation5 + $0x2] ss:$2 sm:$0xff] }
 0x1a8   :  { %v766_v37 = vpop.f32.mrf.mxu0 }
 0x1a9   :  { %v788_v38 = vadd.f32 %v766_v37, %v602_v35  ;;  %1075 = vmatpush.bf16.msra.mxu1 %v4642_v33 }
 0x1aa   :  { %v814_v39 = vld [vmem:[#allocation4 + $0x48] ss:$3 sm:$0xff]  ;;  %v826_v40 = vld [vmem:[#allocation4 + $0x49] ss:$3 sm:$0xff]  ;;  %v844_v43 = vld [vmem:[#allocation4 + $0x4a] ss:$3 sm:$0xff] }
 0x1ab   :  { %804 = vst [vmem:[#allocation4 + $0x60] sm:$0xff] %v788_v38  ;;  %v834_v42 = vmax.f32 %v814_v39, %v826_v40 }
 0x1ac   :  { %v412_v44 = vpop.f32.mrf.mxu2  ;;  %v582_v45 = vpop.f32.mrf.mxu3 }
 0x1ad   :  { %v603_v46 = vadd.f32 %v582_v45, %v412_v44  ;;  %v852_v47 = vmax.f32 %v834_v42, %v844_v43  ;;  %v4668_v42 = vld [vmem:[%s5760_s1 + $0x50] sm:$0xff]  ;;  %v4655_v44 = vld [vmem:[%s5762_s3 + $0xa8] sm:$0xff] }
 0x1ae   :  { %1386 = vmatpush.bf16.msrb.mxu2 %v4668_v42  ;;  %v4685_v42 = vld [vmem:[%s5761_s2 + $0x58] sm:$0xff] }
 0x1af   :  { %v859_v48 = vadd.f32 %v5069_v14, %v852_v47 }
 0x1b0   :  { %v768_v49 = vpop.f32.mrf.mxu0 }
 0x1b1   :  { %v789_v50 = vadd.f32 %v768_v49, %v603_v46  ;;  %vm865_vm4 = vcmp.gt.f32.partialorder %v859_v48, 0.0  ;;  %v871_v51 = vmul.f32 0.01, %v859_v48  ;;  %v4654_v46 = vld [vmem:[%s5762_s3 + $0xa0] sm:$0xff] }
 0x1b3   :  { %805 = vst [vmem:[#allocation4 + $0x68] sm:$0xff] %v789_v50  ;;  %v877_v52 = vsel %vm865_vm4, %v859_v48, %v871_v51  ;;  %v4653_v50 = vld [vmem:[%s5762_s3 + $0x98] sm:$0xff] }
 0x1b4   :  { %v415_v53 = vpop.f32.mrf.mxu2  ;;  %v585_v54 = vpop.f32.mrf.mxu3  ;;  %v884_v55 = vmul.f32 %v5075_v22, %v877_v52 }
 0x1b5   :  { %v604_v57 = vadd.f32 %v585_v54, %v415_v53  ;;  %v4652_v53 = vld [vmem:[%s5762_s3 + $0x90] sm:$0xff] }
 0x1b6   :  { %v891_v58 = vadd.f32 %v5080_v25, %v884_v55  ;;  %v4651_v55 = vld [vmem:[%s5762_s3 + $0x88] sm:$0xff] }
 0x1b8   :  { %v771_v60 = vpop.f32.mrf.mxu0  ;;  %897 = vst [vmem:[#allocation5 + $0x18] sm:$0xff] %v891_v58  ;;  %v4664_v58 = vld [vmem:[%s5760_s1 + $0x30] sm:$0xff] }
 0x1b9   :  { %v790_v62 = vadd.f32 %v771_v60, %v604_v57  ;;  %v4665_v57 = vld [vmem:[%s5760_s1 + $0x38] sm:$0xff] }
 0x1bb   :  { %806 = vst [vmem:[#allocation4 + $0x70] sm:$0xff] %v790_v62  ;;  %v4663_v62 = vld [vmem:[%s5760_s1 + $0x28] sm:$0xff] }
 0x1bc   :  { %v417_v2 = vpop.f32.mrf.mxu2  ;;  %v587_v16 = vpop.f32.mrf.mxu3 }
 0x1bd   :  { %435 = vst [vmem:[#allocation4 + $0x78] sm:$0x7f] %v417_v2  ;;  %v3760_v2 = vld [vmem:[%s5759_s0 + $0x21] sm:$0xff] }
 0x1be   :  { %v1331_v4 = vpack.c.bf16 %v3760_v2, %v3759_v1  ;;  %v4684_v2 = vld [vmem:[%s5761_s2 + $0x50] sm:$0xff] }
 0x1bf   :  { %v902_v6 = vld [vmem:[#allocation5 + $0x10] ss:$2 sm:$0xff]  ;;  %v998_v52 = vld [vmem:[#allocation5 + $0x11] ss:$2 sm:$0xff] }
 0x1c0   :  { %v921_v7 = vpack.c.bf16 %v902_v6, %v900_v5  ;;  %v773_v29 = vpop.f32.mrf.mxu0  ;;  %v4661_v5 = vld [vmem:[%s5760_s1 + $0x18] sm:$0xff]  ;;  %v4660_v6 = vld [vmem:[%s5760_s1 + $0x10] sm:$0xff] }
 0x1c2   :  { %v816_v10 = vld [vmem:[#allocation4 + $0x60] ss:$3 sm:$0xff]  ;;  %v828_v11 = vld [vmem:[#allocation4 + $0x61] ss:$3 sm:$0xff]  ;;  %979 = vmatmul.bf16.vlgmr.msrb.gmra.mxu1 %v921_v7  ;;  %v846_v13 = vld [vmem:[#allocation4 + $0x62] ss:$3 sm:$0xff] }
 0x1c3   :  { %v835_v12 = vmax.f32 %v816_v10, %v828_v11  ;;  %1168 = vmatpush.bf16.msrb.mxu1 %v4657_v34  ;;  %v4659_v10 = vld [vmem:[%s5760_s1 + $0x8] sm:$0xff]  ;;  %v4658_v11 = vld [vmem:[%s5760_s1] sm:$0xff] }
 0x1c4   :  { %v451_v15 = vld [vmem:[#allocation4 + $0x78] sm:$0x7f] }
 0x1c5   :  { %v605_v17 = vadd.f32 %v587_v16, %v451_v15  ;;  %v853_v18 = vmax.f32 %v835_v12, %v846_v13  ;;  %v3724_v15 = vld [vmem:[%s5759_s0 + $0x18] sm:$0xff]  ;;  %v3725_v16 = vld [vmem:[%s5759_s0 + $0x20] sm:$0xff] }
 0x1c7   :  { %621 = vst [vmem:[#allocation4 + $0x78] sm:$0x7f] %v605_v17  ;;  %v860_v20 = vadd.f32 %v5069_v14, %v853_v18  ;;  %1169 = vmatpush.bf16.msrb.mxu1 %v4656_v36  ;;  %v1238_v17 = vpack.c.bf16 %v3725_v16, %v3724_v15  ;;  %v4681_v18 = vld [vmem:[%s5761_s2 + $0x38] sm:$0xff]  ;;  %v4686_v36 = vld [vmem:[%s5761_s2 + $0x60] sm:$0xff] }
 0x1c8   :  { %1542 = vmatpush.bf16.msrb.mxu3 %v4681_v18  ;;  %v4694_v16 = vld [vmem:[%s5761_s2 + $0xa0] sm:$0xff] }
 0x1c9   :  { %vm866_vm5 = vcmp.gt.f32.partialorder %v860_v20, 0.0  ;;  %v872_v21 = vmul.f32 0.01, %v860_v20  ;;  %v4682_v18 = vld [vmem:[%s5761_s2 + $0x40] sm:$0xff] }
 0x1cb   :  { %v878_v26 = vsel %vm866_vm5, %v860_v20, %v872_v21  ;;  %1170 = vmatpush.bf16.msrb.mxu1 %v4655_v44  ;;  %v4689_v20 = vld [vmem:[%s5761_s2 + $0x78] sm:$0xff]  ;;  %v4680_v21 = vld [vmem:[%s5761_s2 + $0x30] sm:$0xff] }
 0x1cc   :  { %v885_v27 = vmul.f32 %v5075_v22, %v878_v26  ;;  %1711 = vmatpush.bf16.msra.mxu0 %v4689_v20  ;;  %1543 = vmatpush.bf16.msrb.mxu3 %v4680_v21  ;;  %v4688_v26 = vld [vmem:[%s5761_s2 + $0x70] sm:$0xff]  ;;  %v4693_v21 = vld [vmem:[%s5761_s2 + $0x98] sm:$0xff] }
 0x1ce   :  { %v637_v30 = vld [vmem:[#allocation4 + $0x78] sm:$0x7f]  ;;  %v892_v31 = vadd.f32 %v5080_v25, %v885_v27  ;;  %v4679_v27 = vld [vmem:[%s5761_s2 + $0x28] sm:$0xff] }
 0x1cf   :  { %v791_v32 = vadd.f32 %v773_v29, %v637_v30  ;;  %1171 = vmatpush.bf16.msrb.mxu1 %v4654_v46  ;;  %v4687_v30 = vld [vmem:[%s5761_s2 + $0x68] sm:$0xff] }
 0x1d0   :  { %898 = vst [vmem:[#allocation5 + $0x20] sm:$0xff] %v892_v31  ;;  %1712 = vmatpush.bf16.msra.mxu0 %v4688_v26  ;;  %1544 = vmatpush.bf16.msrb.mxu3 %v4679_v27  ;;  %v4678_v31 = vld [vmem:[%s5761_s2 + $0x20] sm:$0xff] }
 0x1d1   :  { %807 = vst [vmem:[#allocation4 + $0x78] sm:$0x7f] %v791_v32 }
 0x1d3   :  { %1172 = vmatpush.bf16.msrb.mxu1 %v4653_v50 }
 0x1d4   :  { %1713 = vmatpush.bf16.msra.mxu0 %v4687_v30  ;;  %1545 = vmatpush.bf16.msrb.mxu3 %v4678_v31  ;;  %v4691_v30 = vld [vmem:[%s5761_s2 + $0x88] sm:$0xff]  ;;  %v4690_v31 = vld [vmem:[%s5761_s2 + $0x80] sm:$0xff] }
 0x1d7   :  { %v904_v35 = vld [vmem:[#allocation5 + $0x20] ss:$2 sm:$0xf]  ;;  %1173 = vmatpush.bf16.msrb.mxu1 %v4652_v53  ;;  %v1000_v59 = vld [vmem:[#allocation5 + $0x21] ss:$2 sm:$0xf] }
 0x1d8   :  { %v818_v37 = vld [vmem:[#allocation4 + $0x78] ss:$3 sm:$0x3]  ;;  %v830_v38 = vld [vmem:[#allocation4 + $0x79] ss:$3 sm:$0x3]  ;;  %v922_v39 = vpack.c.bf16 %v904_v35, %v904_v35  ;;  %v1019_v60 = vpack.c.bf16 %v1000_v59, %v1000_v59  ;;  %1714 = vmatpush.bf16.msra.mxu0 %v4686_v36 }
 0x1d9   :  { %v836_v40 = vmax.f32 %v818_v37, %v830_v38  ;;  %v848_v41 = vld [vmem:[#allocation4 + $0x7a] ss:$3 sm:$0x3]  ;;  %v4677_v37 = vld [vmem:[%s5761_s2 + $0x18] sm:$0xff] }
 0x1da   :  { %984 = vmatmul.bf16.gmra.mxu1 %v922_v39  ;;  %v1098_v7 = vld [vmem:[#allocation5 + $0x12] ss:$2 sm:$0xff]  ;;  %1546 = vmatpush.bf16.msrb.mxu3 %v4677_v37 }
 0x1db   :  { %v854_v43 = vmax.f32 %v836_v40, %v848_v41  ;;  %1174 = vmatpush.bf16.msrb.mxu1 %v4651_v55  ;;  %v1118_v9 = vpack.c.bf16 %v1098_v7, %v1096_v8  ;;  %v4826_v55 = vld [vmem:[%s5766_s7 + $0x7] ss:$0 sm:$0xff] }
 0x1dc   :  { %1715 = vmatpush.bf16.msra.mxu0 %v4685_v42 }
 0x1dd   :  { %v861_v45 = vadd.f32 %v5069_v14, %v854_v43  ;;  %v996_v14 = vld [vmem:[#allocation5 + $0x1] ss:$2 sm:$0xff]  ;;  %v4676_v43 = vld [vmem:[%s5761_s2 + $0x10] sm:$0xff] }
 0x1de   :  { %v1018_v54 = vpack.c.bf16 %v998_v52, %v996_v14  ;;  %1547 = vmatpush.bf16.msrb.mxu3 %v4676_v43  ;;  %v4825_v52 = vld [vmem:[%s5766_s7 + $0x6] ss:$0 sm:$0xff] }
 0x1df   :  { %vm867_vm6 = vcmp.gt.f32.partialorder %v861_v45, 0.0  ;;  %v873_v47 = vmul.f32 0.01, %v861_v45 }
 0x1e0   :  { %1716 = vmatpush.bf16.msra.mxu0 %v4684_v2 }
 0x1e1   :  { %v879_v48 = vsel %vm867_vm6, %v861_v45, %v873_v47 }
 0x1e2   :  { %v886_v49 = vmul.f32 %v5075_v22, %v879_v48  ;;  %v4667_v22 = vld [vmem:[%s5760_s1 + $0x48] sm:$0xff] }
 0x1e3   :  { %1387 = vmatpush.bf16.msrb.mxu2 %v4667_v22 }
 0x1e4   :  { %v893_v51 = vadd.f32 %v5080_v25, %v886_v49  ;;  %v4650_v25 = vld [vmem:[%s5762_s3 + $0x80] sm:$0xff] }
 0x1e5   :  { %1175 = vmatpush.bf16.msrb.mxu1 %v4650_v25 }
 0x1e6   :  { %899 = vst [vmem:[#allocation5 + $0x28] sm:$0x3] %v893_v51 }
 0x1e7   :  { %1388 = vmatpush.bf16.msrb.mxu2 %v4666_v0  ;;  %v4696_v0 = vld [vmem:[%s5761_s2 + $0xb0] sm:$0xff] }
 0x1ea   :  { %1076 = vmatmul.bf16.vlgmr.msra.gmra.mxu1 %v1018_v54  ;;  %1389 = vmatmul.bf16.vlgmr.msrb.gmra.mxu2 %v1331_v4  ;;  %v4697_v54 = vld [vmem:[%s5761_s2 + $0xb8] sm:$0xff] }
 0x1eb   :  { %1288 = vmatpush.bf16.msra.mxu1 %v4665_v57 }
 0x1ed   :  { %v1100_v12 = vld [vmem:[#allocation5 + $0x22] ss:$2 sm:$0xf] }
 0x1ee   :  { %v1119_v13 = vpack.c.bf16 %v1100_v12, %v1100_v12 }
 0x1ef   :  { %1289 = vmatpush.bf16.msra.mxu1 %v4664_v58  ;;  %v4827_v58 = vld [vmem:[%s5766_s7 + $0x8] ss:$0 sm:$0xff] }
 0x1f3   :  { %1290 = vmatpush.bf16.msra.mxu1 %v4663_v62 }
 0x1f7   :  { %1291 = vmatpush.bf16.msra.mxu1 %v4662_v3  ;;  %v4675_v3 = vld [vmem:[%s5761_s2 + $0x8] sm:$0xff] }
 0x1f8   :  { %1548 = vmatpush.bf16.msrb.mxu3 %v4675_v3 }
 0x1fa   :  { %1081 = vmatmul.bf16.gmra.mxu1 %v1019_v60 }
 0x1fb   :  { %1292 = vmatpush.bf16.msra.mxu1 %v4661_v5  ;;  %v4695_v5 = vld [vmem:[%s5761_s2 + $0xa8] sm:$0xff] }
 0x1ff   :  { %1293 = vmatpush.bf16.msra.mxu1 %v4660_v6  ;;  %v3726_v6 = vld [vmem:[%s5759_s0 + $0x28] sm:$0x1] }
 0x203   :  { %1294 = vmatpush.bf16.msra.mxu1 %v4659_v10  ;;  %v1239_v10 = vpack.c.bf16 %v3726_v6, %v3726_v6 }
 0x207   :  { %1295 = vmatpush.bf16.msra.mxu1 %v4658_v11  ;;  %v4674_v11 = vld [vmem:[%s5761_s2] sm:$0xff] }
 0x208   :  { %1549 = vmatpush.bf16.msrb.mxu3 %v4674_v11 }
 0x20a   :  { %1176 = vmatmul.bf16.vlgmr.msrb.gmra.mxu1 %v1118_v9  ;;  %v4683_v9 = vld [vmem:[%s5761_s2 + $0x48] sm:$0xff] }
 0x20b   :  { %1896 = vmatpush.bf16.msrb.mxu1 %v4697_v54  ;;  %1717 = vmatpush.bf16.msra.mxu0 %v4683_v9 }
 0x20f   :  { %1897 = vmatpush.bf16.msrb.mxu1 %v4696_v0  ;;  %1718 = vmatpush.bf16.msra.mxu0 %v4682_v18 }
 0x213   :  { %1898 = vmatpush.bf16.msrb.mxu1 %v4695_v5 }
 0x217   :  { %1899 = vmatpush.bf16.msrb.mxu1 %v4694_v16 }
 0x21a   :  { %1181 = vmatmul.bf16.gmra.mxu1 %v1119_v13 }
 0x21b   :  { %1900 = vmatpush.bf16.msrb.mxu1 %v4693_v21 }
 0x22a   :  { %1296 = vmatmul.bf16.vlgmr.msra.gmra.mxu1 %v1238_v17 }
 0x23a   :  { %1301 = vmatmul.bf16.gmra.mxu1 %v1239_v10 }
 0x23f   :  { %v980_v19 = vpop.f32.mrf.mxu1 }
 0x247   :  { %v982_v23 = vpop.f32.mrf.mxu1 }
 0x257   :  { %v985_v24 = vpop.f32.mrf.mxu1 }
 0x258   :  { %991 = vst [vmem:[#allocation6 + $0x10] sm:$0xf] %v985_v24 }
 0x25f   :  { %v987_v28 = vpop.f32.mrf.mxu1  ;;  %v994_v33 = vld [vmem:[#allocation6 + $0x10] sm:$0xf] }
 0x267   :  { %v1077_v29 = vpop.f32.mrf.mxu1 }
 0x268   :  { %v1086_v39 = vadd.f32 %v1077_v29, %v980_v19  ;;  %v4692_v29 = vld [vmem:[%s5761_s2 + $0x90] sm:$0xff] }
 0x269   :  { %1901 = vmatpush.bf16.msrb.mxu1 %v4692_v29 }
 0x26d   :  { %v1390_v8 = vpop.f32.mrf.mxu2  ;;  %1902 = vmatpush.bf16.msrb.mxu1 %v4691_v30 }
 0x26f   :  { %v1079_v32 = vpop.f32.mrf.mxu1 }
 0x270   :  { %v1087_v44 = vadd.f32 %v1079_v32, %v982_v23  ;;  %v3761_v23 = vld [vmem:[%s5759_s0 + $0x29] sm:$0x1]  ;;  %s3379_s0 = sshll.u32 %s5767_s8, 4  ;;  %s3380_s0 = int_to_ptr.hbm [resolvable:$true] %s3379_s0 }
 0x271   :  { %v1332_v27 = vpack.c.bf16 %v3761_v23, %v3761_v23  ;;  %1903 = vmatpush.bf16.msrb.mxu1 %v4690_v31 }
 0x273   :  { %1394 = vmatmul.bf16.gmra.mxu2 %v1332_v27 }
 0x275   :  { %v1392_v26 = vpop.f32.mrf.mxu2 }
 0x277   :  { %v1082_v34 = vpop.f32.mrf.mxu1 }
 0x278   :  { %v1088_v35 = vadd.f32 %v1082_v34, %v994_v33 }
 0x27a   :  { %1091 = vst [vmem:[#allocation6 + $0x10] sm:$0xf] %v1088_v35 }
 0x27f   :  { %v1084_v38 = vpop.f32.mrf.mxu1 }
 0x281   :  { %v1094_v47 = vld [vmem:[#allocation6 + $0x10] sm:$0xf] }
 0x287   :  { %v1177_v40 = vpop.f32.mrf.mxu1 }
 0x288   :  { %v1186_v41 = vadd.f32 %v1177_v40, %v1086_v39 }
 0x28a   :  { %1189 = vst [vmem:[#allocation6] sm:$0xff] %v1186_v41 }
 0x28f   :  { %v1179_v45 = vpop.f32.mrf.mxu1 }
 0x290   :  { %v1187_v46 = vadd.f32 %v1179_v45, %v1087_v44 }
 0x292   :  { %1190 = vst [vmem:[#allocation6 + $0x8] sm:$0xff] %v1187_v46 }
 0x297   :  { %v1182_v48 = vpop.f32.mrf.mxu1 }
 0x298   :  { %v1188_v49 = vadd.f32 %v1182_v48, %v1094_v47 }
 0x299   :  { %v1192_v50 = vld [vmem:[#allocation6] ss:$2 sm:$0xff]  ;;  %v1196_v51 = vld [vmem:[#allocation6 + $0x1] ss:$2 sm:$0xff] }
 0x29a   :  { %1191 = vst [vmem:[#allocation6 + $0x10] sm:$0xf] %v1188_v49  ;;  %v1199_v14 = vmax.f32 %v1192_v50, %v1196_v51 }
 0x29c   :  { %v1202_v53 = vadd.f32 %v4825_v52, %v1199_v14 }
 0x29e   :  { %vm1204_vm7 = vcmp.gt.f32.partialorder %v1202_v53, 0.0  ;;  %v1206_v22 = vmul.f32 0.01, %v1202_v53 }
 0x29f   :  { %v1184_v25 = vpop.f32.mrf.mxu1 }
 0x2a0   :  { %v1208_v57 = vsel %vm1204_vm7, %v1202_v53, %v1206_v22 }
 0x2a1   :  { %v1211_v59 = vmul.f32 %v4826_v55, %v1208_v57  ;;  %v1194_v60 = vld [vmem:[#allocation6 + $0x10] ss:$2 sm:$0x3]  ;;  %v1198_v62 = vld [vmem:[#allocation6 + $0x11] ss:$2 sm:$0x3] }
 0x2a2   :  { %v1200_v1 = vmax.f32 %v1194_v60, %v1198_v62 }
 0x2a3   :  { %v1214_v4 = vadd.f32 %v4827_v58, %v1211_v59 }
 0x2a4   :  { %v1203_v7 = vadd.f32 %v4825_v52, %v1200_v1 }
 0x2a5   :  { %1216 = vst [vmem:[#allocation7 + $0x10] sm:$0xff] %v1214_v4 }
 0x2a6   :  { %vm1205_vm8 = vcmp.gt.f32.partialorder %v1203_v7, 0.0  ;;  %v1207_v12 = vmul.f32 0.01, %v1203_v7 }
 0x2a7   :  { %v1297_v13 = vpop.f32.mrf.mxu1 }
 0x2a8   :  { %v1399_v15 = vadd.f32 %v1390_v8, %v1297_v13  ;;  %v1209_v17 = vsel %vm1205_vm8, %v1203_v7, %v1207_v12 }
 0x2a9   :  { %v1212_v19 = vmul.f32 %v4826_v55, %v1209_v17 }
 0x2aa   :  { %1402 = vst [vmem:[#allocation2] sm:$0xff] %v1399_v15 }
 0x2ab   :  { %v1215_v20 = vadd.f32 %v4827_v58, %v1212_v19 }
 0x2ad   :  { %1217 = vst [vmem:[#allocation7] sm:$0x3] %v1215_v20 }
 0x2af   :  { %v1299_v24 = vpop.f32.mrf.mxu1 }
 0x2b0   :  { %v1400_v28 = vadd.f32 %v1392_v26, %v1299_v24 }
 0x2b2   :  { %1403 = vst [vmem:[#allocation2 + $0x8] sm:$0xff] %v1400_v28 }
 0x2b7   :  { %v1302_v5 = vpop.f32.mrf.mxu1 }
 0x2b8   :  { %1308 = vst [vmem:[#allocation2 + $0x10] sm:$0x1] %v1302_v5 }
 0x2b9   :  { %v1405_v32 = vld [vmem:[#allocation2] ss:$2 sm:$0xff]  ;;  %v1406_v33 = vld [vmem:[#allocation2 + $0x1] ss:$2 sm:$0xff] }
 0x2ba   :  { %v1407_v34 = vmax.f32 %v1405_v32, %v1406_v33 }
 0x2bc   :  { %v1408_v35 = vadd.f32 %v5051_v56, %v1407_v34 }
 0x2be   :  { %vm1409_vm9 = vcmp.gt.f32.partialorder %v1408_v35, 0.0  ;;  %v1410_v36 = vmul.f32 0.01, %v1408_v35 }
 0x2bf   :  { %v1304_v7 = vpop.f32.mrf.mxu1  ;;  %v1311_v16 = vld [vmem:[#allocation2 + $0x10] sm:$0x1] }
 0x2c0   :  { %v1411_v37 = vsel %vm1409_vm9, %v1408_v35, %v1410_v36 }
 0x2c1   :  { %v1412_v38 = vmul.f32 %v5057_v61, %v1411_v37 }
 0x2c3   :  { %v1413_v39 = vadd.f32 %v5062_v63, %v1412_v38 }
 0x2c5   :  { %v1414_v40 = vperm.slane %v1413_v39, 0  ;;  %v1417_v42 = vperm.slane %v1413_v39, 1  ;;  %v1420_v43 = vperm.slane %v1413_v39, 2  ;;  %v1423_v56 = vperm.slane %v1413_v39, 3 }
 0x2c6   :  { %v1426_v61 = vperm.slane %v1413_v39, 4  ;;  %v1429_v47 = vperm.slane %v1413_v39, 5  ;;  %v1432_v48 = vperm.slane %v1413_v39, 6  ;;  %v1435_v49 = vperm.slane %v1413_v39, 7 }
 0x2c7   :  { %1415 = vst [vmem:[#allocation3] sm:$0xff] %v1414_v40  ;;  %v1486_v41 = vpack.c.bf16 %v1414_v40, %v1414_v40  ;;  %v1487_v63 = vpack.c.bf16 %v1417_v42, %v1417_v42  ;;  %v1488_v14 = vpack.c.bf16 %v1420_v43, %v1420_v43  ;;  %v1489_v55 = vpack.c.bf16 %v1423_v56, %v1423_v56 }
 0x2c8   :  { %1416 = vst [vmem:[#allocation3 + $0x8] sm:$0xff] %v1414_v40  ;;  %v1490_v59 = vpack.c.bf16 %v1426_v61, %v1426_v61  ;;  %v1491_v1 = vpack.c.bf16 %v1429_v47, %v1429_v47  ;;  %v1492_v6 = vpack.c.bf16 %v1432_v48, %v1432_v48 }
 0x2c9   :  { %1550 = vmatmul.bf16.vlgmr.msrb.gmra.mxu3 %v1486_v41  ;;  %1719 = vmatmul.bf16.vlgmr.msra.gmra.mxu0 %v1486_v41  ;;  %1418 = vst [vmem:[#allocation3 + $0x10] sm:$0xff] %v1417_v42 }
 0x2ca   :  { %1419 = vst [vmem:[#allocation3 + $0x18] sm:$0xff] %v1417_v42 }
 0x2cb   :  { %1421 = vst [vmem:[#allocation3 + $0x20] sm:$0xff] %v1420_v43 }
 0x2cc   :  { %1422 = vst [vmem:[#allocation3 + $0x28] sm:$0xff] %v1420_v43 }
 0x2cd   :  { %1424 = vst [vmem:[#allocation3 + $0x30] sm:$0xff] %v1423_v56 }
 0x2ce   :  { %1425 = vst [vmem:[#allocation3 + $0x38] sm:$0xff] %v1423_v56 }
 0x2cf   :  { %v1808_v44 = vld [vmem:[#allocation3 + $0x1] sm:$0xff]  ;;  %1427 = vst [vmem:[#allocation3 + $0x40] sm:$0xff] %v1426_v61 }
 0x2d0   :  { %v1809_v45 = vld [vmem:[#allocation3 + $0x9] sm:$0xff]  ;;  %1428 = vst [vmem:[#allocation3 + $0x48] sm:$0xff] %v1426_v61 }
 0x2d1   :  { %v1840_v46 = vpack.c.bf16 %v1809_v45, %v1808_v44  ;;  %1430 = vst [vmem:[#allocation3 + $0x50] sm:$0xff] %v1429_v47  ;;  %v1810_v50 = vld [vmem:[#allocation3 + $0x11] sm:$0xff] }
 0x2d2   :  { %1431 = vst [vmem:[#allocation3 + $0x58] sm:$0xff] %v1429_v47  ;;  %v1811_v51 = vld [vmem:[#allocation3 + $0x19] sm:$0xff] }
 0x2d3   :  { %1904 = vmatmul.bf16.vlgmr.msrb.gmra.mxu1 %v1840_v46  ;;  %1433 = vst [vmem:[#allocation3 + $0x60] sm:$0xff] %v1432_v48  ;;  %v1841_v52 = vpack.c.bf16 %v1811_v51, %v1810_v50  ;;  %v1812_v53 = vld [vmem:[#allocation3 + $0x21] sm:$0xff]  ;;  %v5324_v51 = vld [vmem:[%s5766_s7 + $0x3] ss:$0 sm:$0xff] }
 0x2d4   :  { %1434 = vst [vmem:[#allocation3 + $0x68] sm:$0xff] %v1432_v48  ;;  %v1813_v54 = vld [vmem:[#allocation3 + $0x29] sm:$0xff] }
 0x2d5   :  { %1436 = vst [vmem:[#allocation3 + $0x70] sm:$0xff] %v1435_v49  ;;  %v1842_v22 = vpack.c.bf16 %v1813_v54, %v1812_v53  ;;  %v1814_v25 = vld [vmem:[#allocation3 + $0x31] sm:$0xff] }
 0x2d6   :  { %1437 = vst [vmem:[#allocation3 + $0x78] sm:$0xff] %v1435_v49  ;;  %v1815_v57 = vld [vmem:[#allocation3 + $0x39] sm:$0xff] }
 0x2d7   :  { %1453 = vst [vmem:[#allocation3 + $0xf8] sm:$0xff] %v1435_v49  ;;  %v1843_v58 = vpack.c.bf16 %v1815_v57, %v1814_v25  ;;  %v1816_v60 = vld [vmem:[#allocation3 + $0x41] sm:$0xff]  ;;  %v5330_v57 = vld [vmem:[%s5766_s7 + $0x4] ss:$0 sm:$0xff] }
 0x2d8   :  { %v1817_v62 = vld [vmem:[#allocation3 + $0x49] sm:$0xff] }
 0x2d9   :  { %1555 = vmatmul.bf16.gmra.mxu3 %v1487_v63  ;;  %1724 = vmatmul.bf16.gmra.mxu0 %v1487_v63  ;;  %v1844_v0 = vpack.c.bf16 %v1817_v62, %v1816_v60  ;;  %v1818_v2 = vld [vmem:[#allocation3 + $0x51] sm:$0xff]  ;;  %v5336_v60 = vld [vmem:[%s5766_s7 + $0x5] ss:$0 sm:$0xff] }
 0x2da   :  { %v1819_v3 = vld [vmem:[#allocation3 + $0x59] sm:$0xff] }
 0x2db   :  { %v1845_v4 = vpack.c.bf16 %v1819_v3, %v1818_v2  ;;  %v1820_v8 = vld [vmem:[#allocation3 + $0x61] sm:$0xff] }
 0x2dc   :  { %v1821_v9 = vld [vmem:[#allocation3 + $0x69] sm:$0xff] }
 0x2dd   :  { %v1846_v10 = vpack.c.bf16 %v1821_v9, %v1820_v8  ;;  %v1469_v11 = vld [vmem:[#allocation3 + $0x78] sm:$0x7f] }
 0x2de   :  { %v1638_v12 = vld [vmem:[#allocation3 + $0xf8] sm:$0x7f]  ;;  %v1493_v13 = vpack.c.bf16 %v1469_v11, %v1435_v49 }
 0x2df   :  { %v1662_v15 = vpack.c.bf16 %v1638_v12, %v1435_v49  ;;  %v1822_v19 = vld [vmem:[#allocation3 + $0x71] sm:$0xff]  ;;  %v1823_v20 = vld [vmem:[#allocation3 + $0x79] sm:$0x7f] }
 0x2e0   :  { %v1847_v21 = vpack.c.bf16 %v1823_v20, %v1822_v19 }
 0x2e3   :  { %1909 = vmatmul.bf16.gmra.mxu1 %v1841_v52 }
 0x2e9   :  { %1560 = vmatmul.bf16.gmra.mxu3 %v1488_v14  ;;  %1729 = vmatmul.bf16.gmra.mxu0 %v1488_v14 }
 0x2f3   :  { %1914 = vmatmul.bf16.gmra.mxu1 %v1842_v22 }
 0x2f6   :  { %v1395_v17 = vpop.f32.mrf.mxu2 }
 0x2f7   :  { %v1401_v18 = vadd.f32 %v1395_v17, %v1311_v16 }
 0x2f9   :  { %1565 = vmatmul.bf16.gmra.mxu3 %v1489_v55  ;;  %1734 = vmatmul.bf16.gmra.mxu0 %v1489_v55  ;;  %1404 = vst [vmem:[#allocation2 + $0x10] sm:$0x1] %v1401_v18 }
 0x2fe   :  { %v1397_v23 = vpop.f32.mrf.mxu2 }
 0x303   :  { %1919 = vmatmul.bf16.gmra.mxu1 %v1843_v58 }
 0x309   :  { %1570 = vmatmul.bf16.gmra.mxu3 %v1490_v59  ;;  %1739 = vmatmul.bf16.gmra.mxu0 %v1490_v59 }
 0x313   :  { %1924 = vmatmul.bf16.gmra.mxu1 %v1844_v0 }
 0x319   :  { %1575 = vmatmul.bf16.gmra.mxu3 %v1491_v1  ;;  %1744 = vmatmul.bf16.gmra.mxu0 %v1491_v1 }
 0x323   :  { %1929 = vmatmul.bf16.gmra.mxu1 %v1845_v4 }
 0x329   :  { %1580 = vmatmul.bf16.gmra.mxu3 %v1492_v6  ;;  %1749 = vmatmul.bf16.gmra.mxu0 %v1492_v6 }
 0x333   :  { %1934 = vmatmul.bf16.gmra.mxu1 %v1846_v10 }
 0x339   :  { %1585 = vmatmul.bf16.gmra.mxu3 %v1493_v13  ;;  %1754 = vmatmul.bf16.gmra.mxu0 %v1662_v15 }
 0x343   :  { %1939 = vmatmul.bf16.gmra.mxu1 %v1847_v21 }
 0x346   :  { %v1720_v24 = vpop.f32.mrf.mxu0 }
 0x34c   :  { %v1551_v26 = vpop.f32.mrf.mxu3 }
 0x34d   :  { %v1760_v28 = vadd.f32 %v1720_v24, %v1551_v26 }
 0x34e   :  { %v1722_v27 = vpop.f32.mrf.mxu0 }
 0x350   :  { %v1905_v29 = vpop.f32.mrf.mxu1 }
 0x351   :  { %v1945_v30 = vadd.f32 %v1905_v29, %v1760_v28 }
 0x353   :  { %1961 = vst [vmem:[#allocation4] sm:$0xff] %v1945_v30 }
 0x354   :  { %v1553_v31 = vpop.f32.mrf.mxu3 }
 0x355   :  { %v1761_v33 = vadd.f32 %v1722_v27, %v1553_v31 }
 0x356   :  { %v1725_v32 = vpop.f32.mrf.mxu0 }
 0x358   :  { %v1907_v34 = vpop.f32.mrf.mxu1 }
 0x359   :  { %v1946_v35 = vadd.f32 %v1907_v34, %v1761_v33 }
 0x35b   :  { %1962 = vst [vmem:[#allocation4 + $0x8] sm:$0xff] %v1946_v35 }
 0x35c   :  { %v1556_v36 = vpop.f32.mrf.mxu3 }
 0x35d   :  { %v1762_v38 = vadd.f32 %v1725_v32, %v1556_v36 }
 0x35e   :  { %v1727_v37 = vpop.f32.mrf.mxu0 }
 0x360   :  { %v1910_v39 = vpop.f32.mrf.mxu1 }
 0x361   :  { %v1947_v40 = vadd.f32 %v1910_v39, %v1762_v38 }
 0x363   :  { %1963 = vst [vmem:[#allocation4 + $0x10] sm:$0xff] %v1947_v40 }
 0x364   :  { %v1558_v41 = vpop.f32.mrf.mxu3 }
 0x365   :  { %v1763_v43 = vadd.f32 %v1727_v37, %v1558_v41 }
 0x366   :  { %v1730_v42 = vpop.f32.mrf.mxu0 }
 0x368   :  { %v1912_v56 = vpop.f32.mrf.mxu1 }
 0x369   :  { %v1948_v44 = vadd.f32 %v1912_v56, %v1763_v43 }
 0x36a   :  { %v1977_v45 = vld [vmem:[#allocation4] ss:$3 sm:$0xff]  ;;  %v1983_v46 = vld [vmem:[#allocation4 + $0x1] ss:$3 sm:$0xff]  ;;  %v1995_v47 = vld [vmem:[#allocation4 + $0x2] ss:$3 sm:$0xff] }
 0x36b   :  { %v1989_v63 = vmax.f32 %v1977_v45, %v1983_v46  ;;  %1964 = vst [vmem:[#allocation4 + $0x18] sm:$0xff] %v1948_v44  ;;  %v4705_v44 = vld [vmem:[%s5762_s3 + $0x38] sm:$0xff] }
 0x36c   :  { %v1561_v61 = vpop.f32.mrf.mxu3  ;;  %2118 = vmatpush.bf16.msra.mxu2 %v4705_v44 }
 0x36d   :  { %v2001_v49 = vmax.f32 %v1989_v63, %v1995_v47  ;;  %v1764_v50 = vadd.f32 %v1730_v42, %v1561_v61 }
 0x36e   :  { %v1732_v48 = vpop.f32.mrf.mxu0 }
 0x36f   :  { %v2007_v52 = vadd.f32 %v5324_v51, %v2001_v49 }
 0x370   :  { %v1915_v14 = vpop.f32.mrf.mxu1 }
 0x371   :  { %v1949_v53 = vadd.f32 %v1915_v14, %v1764_v50  ;;  %vm2013_vm10 = vcmp.gt.f32.partialorder %v2007_v52, 0.0  ;;  %v2019_v54 = vmul.f32 0.01, %v2007_v52  ;;  %v4704_v14 = vld [vmem:[%s5762_s3 + $0x30] sm:$0xff] }
 0x372   :  { %2119 = vmatpush.bf16.msra.mxu2 %v4704_v14 }
 0x373   :  { %1965 = vst [vmem:[#allocation4 + $0x20] sm:$0xff] %v1949_v53  ;;  %v2025_v55 = vsel %vm2013_vm10, %v2007_v52, %v2019_v54 }
 0x374   :  { %v1563_v22 = vpop.f32.mrf.mxu3  ;;  %v2031_v58 = vmul.f32 %v5330_v57, %v2025_v55 }
 0x375   :  { %v1765_v59 = vadd.f32 %v1732_v48, %v1563_v22  ;;  %v4703_v22 = vld [vmem:[%s5762_s3 + $0x28] sm:$0xff] }
 0x376   :  { %v1735_v25 = vpop.f32.mrf.mxu0  ;;  %v2037_v62 = vadd.f32 %v5336_v60, %v2031_v58  ;;  %2120 = vmatpush.bf16.msra.mxu2 %v4703_v22  ;;  %v4702_v58 = vld [vmem:[%s5762_s3 + $0x20] sm:$0xff]  ;;  %v4720_v22 = vld [vmem:[%s5762_s3 + $0xb0] sm:$0xff] }
 0x378   :  { %v1917_v0 = vpop.f32.mrf.mxu1  ;;  %2043 = vst [vmem:[#allocation5] sm:$0xff] %v2037_v62 }
 0x379   :  { %v1950_v1 = vadd.f32 %v1917_v0, %v1765_v59 }
 0x37a   :  { %2121 = vmatpush.bf16.msra.mxu2 %v4702_v58 }
 0x37b   :  { %1966 = vst [vmem:[#allocation4 + $0x28] sm:$0xff] %v1950_v1 }
 0x37c   :  { %v1566_v2 = vpop.f32.mrf.mxu3 }
 0x37d   :  { %v1766_v4 = vadd.f32 %v1735_v25, %v1566_v2 }
 0x37e   :  { %v1737_v3 = vpop.f32.mrf.mxu0 }
 0x380   :  { %v1920_v5 = vpop.f32.mrf.mxu1 }
 0x381   :  { %v1951_v6 = vadd.f32 %v1920_v5, %v1766_v4  ;;  %v4701_v5 = vld [vmem:[%s5762_s3 + $0x18] sm:$0xff] }
 0x382   :  { %v1978_v7 = vld [vmem:[#allocation4 + $0x18] ss:$3 sm:$0xff]  ;;  %v1984_v8 = vld [vmem:[#allocation4 + $0x19] ss:$3 sm:$0xff]  ;;  %v1996_v11 = vld [vmem:[#allocation4 + $0x1a] ss:$3 sm:$0xff]  ;;  %2122 = vmatpush.bf16.msra.mxu2 %v4701_v5 }
 0x383   :  { %v1990_v10 = vmax.f32 %v1978_v7, %v1984_v8  ;;  %1967 = vst [vmem:[#allocation4 + $0x30] sm:$0xff] %v1951_v6 }
 0x384   :  { %v1568_v9 = vpop.f32.mrf.mxu3 }
 0x385   :  { %v2002_v13 = vmax.f32 %v1990_v10, %v1996_v11  ;;  %v1767_v15 = vadd.f32 %v1737_v3, %v1568_v9  ;;  %v4700_v10 = vld [vmem:[%s5762_s3 + $0x10] sm:$0xff] }
 0x386   :  { %v1740_v12 = vpop.f32.mrf.mxu0  ;;  %2123 = vmatpush.bf16.msra.mxu2 %v4700_v10 }
 0x387   :  { %v2008_v16 = vadd.f32 %v5324_v51, %v2002_v13 }
 0x388   :  { %v1922_v17 = vpop.f32.mrf.mxu1 }
 0x389   :  { %v1952_v18 = vadd.f32 %v1922_v17, %v1767_v15  ;;  %vm2014_vm11 = vcmp.gt.f32.partialorder %v2008_v16, 0.0  ;;  %v2020_v19 = vmul.f32 0.01, %v2008_v16  ;;  %v4699_v15 = vld [vmem:[%s5762_s3 + $0x8] sm:$0xff] }
 0x38a   :  { %2124 = vmatpush.bf16.msra.mxu2 %v4699_v15 }
 0x38b   :  { %1968 = vst [vmem:[#allocation4 + $0x38] sm:$0xff] %v1952_v18  ;;  %v2026_v21 = vsel %vm2014_vm11, %v2008_v16, %v2020_v19 }
 0x38c   :  { %v1571_v20 = vpop.f32.mrf.mxu3  ;;  %v2032_v24 = vmul.f32 %v5330_v57, %v2026_v21 }
 0x38d   :  { %v1768_v26 = vadd.f32 %v1740_v12, %v1571_v20  ;;  %v4698_v20 = vld [vmem:[%s5762_s3] sm:$0xff] }
 0x38e   :  { %v1742_v23 = vpop.f32.mrf.mxu0  ;;  %v2038_v27 = vadd.f32 %v5336_v60, %v2032_v24  ;;  %2125 = vmatpush.bf16.msra.mxu2 %v4698_v20  ;;  %v4745_v20 = vld [vmem:[%s5763_s4 + $0xb8] sm:$0xff] }
 0x38f   :  { %2596 = vmatpush.bf16.msrb.mxu0 %v4745_v20  ;;  %v4765_v20 = vld [vmem:[%s5763_s4 + $0x158] sm:$0xff] }
 0x390   :  { %v1925_v28 = vpop.f32.mrf.mxu1  ;;  %2044 = vst [vmem:[#allocation5 + $0x8] sm:$0xff] %v2038_v27 }
 0x391   :  { %v1953_v29 = vadd.f32 %v1925_v28, %v1768_v26  ;;  %v4712_v28 = vld [vmem:[%s5762_s3 + $0x70] sm:$0xff] }
 0x393   :  { %1969 = vst [vmem:[#allocation4 + $0x40] sm:$0xff] %v1953_v29 }
 0x394   :  { %v1573_v30 = vpop.f32.mrf.mxu3 }
 0x395   :  { %v1769_v32 = vadd.f32 %v1742_v23, %v1573_v30  ;;  %v4713_v23 = vld [vmem:[%s5762_s3 + $0x78] sm:$0xff] }
 0x396   :  { %v1745_v31 = vpop.f32.mrf.mxu0  ;;  %2211 = vmatpush.bf16.msrb.mxu2 %v4713_v23  ;;  %v4727_v23 = vld [vmem:[%s5763_s4 + $0x28] sm:$0xff] }
 0x397   :  { %v2049_v29 = vld [vmem:[#allocation5] ss:$2 sm:$0xff] }
 0x398   :  { %v1927_v33 = vpop.f32.mrf.mxu1 }
 0x399   :  { %v1954_v34 = vadd.f32 %v1927_v33, %v1769_v32 }
 0x39a   :  { %v1979_v35 = vld [vmem:[#allocation4 + $0x30] ss:$3 sm:$0xff]  ;;  %v1985_v36 = vld [vmem:[#allocation4 + $0x31] ss:$3 sm:$0xff]  ;;  %v1997_v39 = vld [vmem:[#allocation4 + $0x32] ss:$3 sm:$0xff]  ;;  %2212 = vmatpush.bf16.msrb.mxu2 %v4712_v28 }
 0x39b   :  { %v1991_v38 = vmax.f32 %v1979_v35, %v1985_v36  ;;  %1970 = vst [vmem:[#allocation4 + $0x48] sm:$0xff] %v1954_v34  ;;  %v4743_v28 = vld [vmem:[%s5763_s4 + $0xa8] sm:$0xff] }
 0x39c   :  { %v1576_v37 = vpop.f32.mrf.mxu3 }
 0x39d   :  { %v2003_v40 = vmax.f32 %v1991_v38, %v1997_v39  ;;  %v1770_v41 = vadd.f32 %v1745_v31, %v1576_v37  ;;  %v4711_v31 = vld [vmem:[%s5762_s3 + $0x68] sm:$0xff]  ;;  %v4710_v38 = vld [vmem:[%s5762_s3 + $0x60] sm:$0xff] }
 0x39e   :  { %v1747_v42 = vpop.f32.mrf.mxu0  ;;  %2213 = vmatpush.bf16.msrb.mxu2 %v4711_v31 }
 0x39f   :  { %v2009_v43 = vadd.f32 %v5324_v51, %v2003_v40 }
 0x3a0   :  { %v1930_v56 = vpop.f32.mrf.mxu1 }
 0x3a1   :  { %vm2015_vm12 = vcmp.gt.f32.partialorder %v2009_v43, 0.0  ;;  %v2021_v45 = vmul.f32 0.01, %v2009_v43  ;;  %v1955_v46 = vadd.f32 %v1930_v56, %v1770_v41 }
 0x3a2   :  { %2214 = vmatpush.bf16.msrb.mxu2 %v4710_v38  ;;  %v4736_v38 = vld [vmem:[%s5763_s4 + $0x70] sm:$0xff] }
 0x3a3   :  { %1971 = vst [vmem:[#allocation4 + $0x50] sm:$0xff] %v1955_v46  ;;  %v2027_v63 = vsel %vm2015_vm12, %v2009_v43, %v2021_v45  ;;  %v4709_v43 = vld [vmem:[%s5762_s3 + $0x58] sm:$0xff]  ;;  %v4708_v45 = vld [vmem:[%s5762_s3 + $0x50] sm:$0xff] }
 0x3a4   :  { %v1578_v61 = vpop.f32.mrf.mxu3  ;;  %v2033_v47 = vmul.f32 %v5330_v57, %v2027_v63 }
 0x3a5   :  { %v1771_v48 = vadd.f32 %v1747_v42, %v1578_v61 }
 0x3a6   :  { %v2039_v49 = vadd.f32 %v5336_v60, %v2033_v47  ;;  %v1750_v52 = vpop.f32.mrf.mxu0  ;;  %2215 = vmatpush.bf16.msrb.mxu2 %v4709_v43  ;;  %v4734_v43 = vld [vmem:[%s5763_s4 + $0x60] sm:$0xff] }
 0x3a8   :  { %v1932_v50 = vpop.f32.mrf.mxu1  ;;  %2045 = vst [vmem:[#allocation5 + $0x10] sm:$0xff] %v2039_v49  ;;  %v4707_v49 = vld [vmem:[%s5762_s3 + $0x48] sm:$0xff] }
 0x3a9   :  { %v1956_v53 = vadd.f32 %v1932_v50, %v1771_v48  ;;  %v4706_v50 = vld [vmem:[%s5762_s3 + $0x40] sm:$0xff] }
 0x3aa   :  { %2216 = vmatpush.bf16.msrb.mxu2 %v4708_v45 }
 0x3ab   :  { %1972 = vst [vmem:[#allocation4 + $0x58] sm:$0xff] %v1956_v53 }
 0x3ac   :  { %v1581_v54 = vpop.f32.mrf.mxu3 }
 0x3ad   :  { %v1772_v55 = vadd.f32 %v1750_v52, %v1581_v54  ;;  %v4721_v52 = vld [vmem:[%s5762_s3 + $0xb8] sm:$0xff] }
 0x3ae   :  { %v1752_v1 = vpop.f32.mrf.mxu0  ;;  %2217 = vmatpush.bf16.msrb.mxu2 %v4707_v49  ;;  %v4731_v49 = vld [vmem:[%s5763_s4 + $0x48] sm:$0xff] }
 0x3af   :  { %v2238_v15 = vld [vmem:[#allocation5 + $0x2] ss:$2 sm:$0xff] }
 0x3b0   :  { %v1935_v25 = vpop.f32.mrf.mxu1 }
 0x3b1   :  { %v1957_v59 = vadd.f32 %v1935_v25, %v1772_v55 }
 0x3b2   :  { %v1980_v62 = vld [vmem:[#allocation4 + $0x48] ss:$3 sm:$0xff]  ;;  %v1986_v0 = vld [vmem:[#allocation4 + $0x49] ss:$3 sm:$0xff]  ;;  %v1998_v4 = vld [vmem:[#allocation4 + $0x4a] ss:$3 sm:$0xff]  ;;  %2218 = vmatpush.bf16.msrb.mxu2 %v4706_v50 }
 0x3b3   :  { %v1992_v3 = vmax.f32 %v1980_v62, %v1986_v0  ;;  %1973 = vst [vmem:[#allocation4 + $0x60] sm:$0xff] %v1957_v59  ;;  %v4719_v62 = vld [vmem:[%s5762_s3 + $0xa8] sm:$0xff] }
 0x3b4   :  { %v1583_v2 = vpop.f32.mrf.mxu3  ;;  %v4723_v50 = vld [vmem:[%s5763_s4 + $0x8] sm:$0xff] }
 0x3b5   :  { %v2004_v6 = vmax.f32 %v1992_v3, %v1998_v4  ;;  %v1773_v7 = vadd.f32 %v1752_v1, %v1583_v2  ;;  %v4718_v2 = vld [vmem:[%s5762_s3 + $0xa0] sm:$0xff] }
 0x3b6   :  { %v1755_v17 = vpop.f32.mrf.mxu0 }
 0x3b7   :  { %v2010_v8 = vadd.f32 %v5324_v51, %v2004_v6  ;;  %v4717_v6 = vld [vmem:[%s5762_s3 + $0x98] sm:$0xff] }
 0x3b8   :  { %v1937_v9 = vpop.f32.mrf.mxu1 }
 0x3b9   :  { %v1958_v11 = vadd.f32 %v1937_v9, %v1773_v7  ;;  %vm2016_vm13 = vcmp.gt.f32.partialorder %v2010_v8, 0.0  ;;  %v2022_v12 = vmul.f32 0.01, %v2010_v8 }
 0x3bb   :  { %1974 = vst [vmem:[#allocation4 + $0x68] sm:$0xff] %v1958_v11  ;;  %v2028_v16 = vsel %vm2016_vm13, %v2010_v8, %v2022_v12  ;;  %v4716_v8 = vld [vmem:[%s5762_s3 + $0x90] sm:$0xff]  ;;  %v4729_v12 = vld [vmem:[%s5763_s4 + $0x38] sm:$0xff] }
 0x3bc   :  { %v1586_v13 = vpop.f32.mrf.mxu3  ;;  %v2034_v18 = vmul.f32 %v5330_v57, %v2028_v16  ;;  %2513 = vmatpush.bf16.msra.mxu3 %v4729_v12  ;;  %v4766_v12 = vld [vmem:[%s5763_s4 + $0x160] sm:$0xff] }
 0x3bd   :  { %v1774_v19 = vadd.f32 %v1755_v17, %v1586_v13 }
 0x3be   :  { %v2040_v21 = vadd.f32 %v5336_v60, %v2034_v18  ;;  %v1757_v36 = vpop.f32.mrf.mxu0 }
 0x3c0   :  { %v1940_v24 = vpop.f32.mrf.mxu1  ;;  %2046 = vst [vmem:[#allocation5 + $0x18] sm:$0xff] %v2040_v21  ;;  %v4753_v21 = vld [vmem:[%s5763_s4 + $0xf8] sm:$0xff] }
 0x3c1   :  { %v1959_v26 = vadd.f32 %v1940_v24, %v1774_v19  ;;  %v4728_v19 = vld [vmem:[%s5763_s4 + $0x30] sm:$0xff]  ;;  %2680 = vmatpush.bf16.msra.mxu1 %v4753_v21  ;;  %v4774_v21 = vld [vmem:[%s5763_s4 + $0x1a0] sm:$0xff] }
 0x3c2   :  { %2514 = vmatpush.bf16.msra.mxu3 %v4728_v19  ;;  %v4744_v24 = vld [vmem:[%s5763_s4 + $0xb0] sm:$0xff] }
 0x3c3   :  { %1975 = vst [vmem:[#allocation4 + $0x70] sm:$0xff] %v1959_v26  ;;  %2597 = vmatpush.bf16.msrb.mxu0 %v4744_v24  ;;  %v4752_v26 = vld [vmem:[%s5763_s4 + $0xf0] sm:$0xff] }
 0x3c4   :  { %v1588_v27 = vpop.f32.mrf.mxu3 }
 0x3c5   :  { %1606 = vst [vmem:[#allocation4 + $0x78] sm:$0x7f] %v1588_v27  ;;  %2681 = vmatpush.bf16.msra.mxu1 %v4752_v26  ;;  %v4726_v27 = vld [vmem:[%s5763_s4 + $0x20] sm:$0xff] }
 0x3c6   :  { %2515 = vmatpush.bf16.msra.mxu3 %v4727_v23  ;;  %v4782_v26 = vld [vmem:[%s5763_s4 + $0x1e0] sm:$0xff] }
 0x3c7   :  { %v2050_v30 = vld [vmem:[#allocation5 + $0x10] ss:$2 sm:$0xff]  ;;  %v2143_v7 = vld [vmem:[#allocation5 + $0x11] ss:$2 sm:$0xff]  ;;  %2598 = vmatpush.bf16.msrb.mxu0 %v4743_v28 }
 0x3c8   :  { %v2068_v32 = vpack.c.bf16 %v2050_v30, %v2049_v29  ;;  %v1942_v61 = vpop.f32.mrf.mxu1  ;;  %v4751_v30 = vld [vmem:[%s5763_s4 + $0xe8] sm:$0xff]  ;;  %v4756_v28 = vld [vmem:[%s5763_s4 + $0x110] sm:$0xff] }
 0x3c9   :  { %2682 = vmatpush.bf16.msra.mxu1 %v4751_v30 }
 0x3ca   :  { %v1981_v33 = vld [vmem:[#allocation4 + $0x60] ss:$3 sm:$0xff]  ;;  %v1987_v34 = vld [vmem:[#allocation4 + $0x61] ss:$3 sm:$0xff]  ;;  %2126 = vmatmul.bf16.vlgmr.msra.gmra.mxu2 %v2068_v32  ;;  %v1999_v39 = vld [vmem:[#allocation4 + $0x62] ss:$3 sm:$0xff]  ;;  %2516 = vmatpush.bf16.msra.mxu3 %v4726_v27 }
 0x3cb   :  { %v1993_v35 = vmax.f32 %v1981_v33, %v1987_v34  ;;  %2307 = vmatpush.bf16.msra.mxu2 %v4721_v52  ;;  %v4725_v32 = vld [vmem:[%s5763_s4 + $0x18] sm:$0xff]  ;;  %v4742_v33 = vld [vmem:[%s5763_s4 + $0xa0] sm:$0xff]  ;;  %v4740_v52 = vld [vmem:[%s5763_s4 + $0x90] sm:$0xff] }
 0x3cc   :  { %v1622_v37 = vld [vmem:[#allocation4 + $0x78] sm:$0x7f]  ;;  %2599 = vmatpush.bf16.msrb.mxu0 %v4742_v33  ;;  %v4781_v33 = vld [vmem:[%s5763_s4 + $0x1d8] sm:$0xff] }
 0x3cd   :  { %v1775_v40 = vadd.f32 %v1757_v36, %v1622_v37  ;;  %v2005_v41 = vmax.f32 %v1993_v35, %v1999_v39  ;;  %v4750_v35 = vld [vmem:[%s5763_s4 + $0xe0] sm:$0xff]  ;;  %v4737_v36 = vld [vmem:[%s5763_s4 + $0x78] sm:$0xff]  ;;  %v4724_v39 = vld [vmem:[%s5763_s4 + $0x10] sm:$0xff] }
 0x3ce   :  { %2517 = vmatpush.bf16.msra.mxu3 %v4725_v32  ;;  %2683 = vmatpush.bf16.msra.mxu1 %v4750_v35  ;;  %v4773_v32 = vld [vmem:[%s5763_s4 + $0x198] sm:$0xff]  ;;  %v4755_v35 = vld [vmem:[%s5763_s4 + $0x108] sm:$0xff] }
 0x3cf   :  { %1791 = vst [vmem:[#allocation4 + $0x78] sm:$0x7f] %v1775_v40  ;;  %v2011_v42 = vadd.f32 %v5324_v51, %v2005_v41  ;;  %2308 = vmatpush.bf16.msra.mxu2 %v4720_v22  ;;  %v4741_v40 = vld [vmem:[%s5763_s4 + $0x98] sm:$0xff]  ;;  %v4735_v41 = vld [vmem:[%s5763_s4 + $0x68] sm:$0xff] }
 0x3d0   :  { %2600 = vmatpush.bf16.msrb.mxu0 %v4741_v40  ;;  %v4761_v22 = vld [vmem:[%s5763_s4 + $0x138] sm:$0xff]  ;;  %v4763_v40 = vld [vmem:[%s5763_s4 + $0x148] sm:$0xff] }
 0x3d1   :  { %vm2017_vm14 = vcmp.gt.f32.partialorder %v2011_v42, 0.0  ;;  %v2023_v56 = vmul.f32 0.01, %v2011_v42 }
 0x3d2   :  { %2518 = vmatpush.bf16.msra.mxu3 %v4724_v39 }
 0x3d3   :  { %v2029_v44 = vsel %vm2017_vm14, %v2011_v42, %v2023_v56  ;;  %2309 = vmatpush.bf16.msra.mxu2 %v4719_v62  ;;  %v4749_v56 = vld [vmem:[%s5763_s4 + $0xd8] sm:$0xff]  ;;  %v4739_v62 = vld [vmem:[%s5763_s4 + $0x88] sm:$0xff] }
 0x3d4   :  { %v2035_v46 = vmul.f32 %v5330_v57, %v2029_v44  ;;  %2684 = vmatpush.bf16.msra.mxu1 %v4749_v56  ;;  %v4733_v44 = vld [vmem:[%s5763_s4 + $0x58] sm:$0xff]  ;;  %2601 = vmatpush.bf16.msrb.mxu0 %v4740_v52 }
 0x3d6   :  { %v1807_v63 = vld [vmem:[#allocation4 + $0x78] sm:$0x7f]  ;;  %v2041_v48 = vadd.f32 %v5336_v60, %v2035_v46  ;;  %2519 = vmatpush.bf16.msra.mxu3 %v4723_v50  ;;  %v4762_v50 = vld [vmem:[%s5763_s4 + $0x140] sm:$0xff] }
 0x3d7   :  { %v1960_v47 = vadd.f32 %v1942_v61, %v1807_v63  ;;  %2310 = vmatpush.bf16.msra.mxu2 %v4718_v2  ;;  %v4738_v2 = vld [vmem:[%s5763_s4 + $0x80] sm:$0xff] }
 0x3d8   :  { %2047 = vst [vmem:[#allocation5 + $0x20] sm:$0xff] %v2041_v48  ;;  %v4732_v48 = vld [vmem:[%s5763_s4 + $0x50] sm:$0xff]  ;;  %2602 = vmatpush.bf16.msrb.mxu0 %v4739_v62  ;;  %v4793_v62 = vld [vmem:[%s5763_s4 + $0x238] sm:$0xff] }
 0x3d9   :  { %1976 = vst [vmem:[#allocation4 + $0x78] sm:$0x7f] %v1960_v47 }
 0x3db   :  { %2311 = vmatpush.bf16.msra.mxu2 %v4717_v6  ;;  %v4785_v6 = vld [vmem:[%s5763_s4 + $0x1f8] sm:$0xff] }
 0x3dc   :  { %2603 = vmatpush.bf16.msrb.mxu0 %v4738_v2 }
 0x3df   :  { %v2051_v54 = vld [vmem:[#allocation5 + $0x20] ss:$2 sm:$0xf]  ;;  %2312 = vmatpush.bf16.msra.mxu2 %v4716_v8  ;;  %v2144_v10 = vld [vmem:[#allocation5 + $0x21] ss:$2 sm:$0xf] }
 0x3e0   :  { %v1982_v14 = vld [vmem:[#allocation4 + $0x78] ss:$3 sm:$0x3]  ;;  %v1988_v53 = vld [vmem:[#allocation4 + $0x79] ss:$3 sm:$0x3]  ;;  %v2069_v25 = vpack.c.bf16 %v2051_v54, %v2051_v54  ;;  %v2162_v11 = vpack.c.bf16 %v2144_v10, %v2144_v10 }
 0x3e1   :  { %v1994_v55 = vmax.f32 %v1982_v14, %v1988_v53  ;;  %v2000_v58 = vld [vmem:[#allocation4 + $0x7a] ss:$3 sm:$0x3]  ;;  %v4730_v53 = vld [vmem:[%s5763_s4 + $0x40] sm:$0xff] }
 0x3e2   :  { %2131 = vmatmul.bf16.gmra.mxu2 %v2069_v25  ;;  %v2239_v13 = vld [vmem:[#allocation5 + $0x12] ss:$2 sm:$0xff]  ;;  %v4722_v25 = vld [vmem:[%s5763_s4] sm:$0xff] }
 0x3e3   :  { %v2006_v59 = vmax.f32 %v1994_v55, %v2000_v58  ;;  %v2257_v16 = vpack.c.bf16 %v2239_v13, %v2238_v15  ;;  %v4748_v54 = vld [vmem:[%s5763_s4 + $0xd0] sm:$0xff]  ;;  %2520 = vmatpush.bf16.msra.mxu3 %v4722_v25  ;;  %v4775_v13 = vld [vmem:[%s5763_s4 + $0x1a8] sm:$0xff] }
 0x3e4   :  { %2685 = vmatpush.bf16.msra.mxu1 %v4748_v54  ;;  %v4784_v10 = vld [vmem:[%s5763_s4 + $0x1f0] sm:$0xff]  ;;  %v4783_v15 = vld [vmem:[%s5763_s4 + $0x1e8] sm:$0xff] }
 0x3e5   :  { %v2012_v0 = vadd.f32 %v5324_v51, %v2006_v59  ;;  %v2142_v51 = vld [vmem:[#allocation5 + $0x1] ss:$2 sm:$0xff] }
 0x3e6   :  { %v2161_v9 = vpack.c.bf16 %v2143_v7, %v2142_v51  ;;  %v4769_v59 = vld [vmem:[%s5763_s4 + $0x178] sm:$0xff]  ;;  %v4759_v51 = vld [vmem:[%s5763_s4 + $0x128] sm:$0xff] }
 0x3e7   :  { %vm2018_vm15 = vcmp.gt.f32.partialorder %v2012_v0, 0.0  ;;  %v2024_v1 = vmul.f32 0.01, %v2012_v0  ;;  %2848 = vmatpush.bf16.msrb.mxu3 %v4769_v59 }
 0x3e9   :  { %v2030_v3 = vsel %vm2018_vm15, %v2012_v0, %v2024_v1  ;;  %v4747_v0 = vld [vmem:[%s5763_s4 + $0xc8] sm:$0xff]  ;;  %v4760_v1 = vld [vmem:[%s5763_s4 + $0x130] sm:$0xff] }
 0x3ea   :  { %v2036_v4 = vmul.f32 %v5330_v57, %v2030_v3  ;;  %v4715_v57 = vld [vmem:[%s5762_s3 + $0x88] sm:$0xff]  ;;  %v4768_v3 = vld [vmem:[%s5763_s4 + $0x170] sm:$0xff]  ;;  %2686 = vmatpush.bf16.msra.mxu1 %v4747_v0 }
 0x3eb   :  { %2313 = vmatpush.bf16.msra.mxu2 %v4715_v57  ;;  %2849 = vmatpush.bf16.msrb.mxu3 %v4768_v3  ;;  %v4767_v57 = vld [vmem:[%s5763_s4 + $0x168] sm:$0xff]  ;;  %v4770_v3 = vld [vmem:[%s5763_s4 + $0x180] sm:$0xff] }
 0x3ec   :  { %v2042_v5 = vadd.f32 %v5336_v60, %v2036_v4  ;;  %v4714_v60 = vld [vmem:[%s5762_s3 + $0x80] sm:$0xff] }
 0x3ed   :  { %v4746_v4 = vld [vmem:[%s5763_s4 + $0xc0] sm:$0xff] }
 0x3ee   :  { %2048 = vst [vmem:[#allocation5 + $0x28] sm:$0x3] %v2042_v5  ;;  %v4777_v5 = vld [vmem:[%s5763_s4 + $0x1b8] sm:$0xff]  ;;  %2687 = vmatpush.bf16.msra.mxu1 %v4746_v4 }
 0x3ef   :  { %2314 = vmatpush.bf16.msra.mxu2 %v4714_v60  ;;  %2932 = vmatpush.bf16.msra.mxu0 %v4777_v5  ;;  %v4776_v60 = vld [vmem:[%s5763_s4 + $0x1b0] sm:$0xff] }
 0x3f0   :  { %2850 = vmatpush.bf16.msrb.mxu3 %v4767_v57 }
 0x3f2   :  { %2219 = vmatmul.bf16.vlgmr.msrb.gmra.mxu2 %v2161_v9  ;;  %3016 = vmatpush.bf16.msrb.mxu1 %v4785_v6 }
 0x3f3   :  { %2448 = vmatpush.bf16.msrb.mxu2 %v4737_v36  ;;  %2933 = vmatpush.bf16.msra.mxu0 %v4776_v60  ;;  %v4778_v60 = vld [vmem:[%s5763_s4 + $0x1c0] sm:$0xff] }
 0x3f4   :  { %2851 = vmatpush.bf16.msrb.mxu3 %v4766_v12  ;;  %v4800_v12 = vld [vmem:[%s5763_s4 + $0x270] sm:$0xff] }
 0x3f5   :  { %v2240_v17 = vld [vmem:[#allocation5 + $0x22] ss:$2 sm:$0xf] }
 0x3f6   :  { %v2258_v18 = vpack.c.bf16 %v2240_v17, %v2240_v17  ;;  %3017 = vmatpush.bf16.msrb.mxu1 %v4784_v10 }
 0x3f7   :  { %2449 = vmatpush.bf16.msrb.mxu2 %v4736_v38  ;;  %2934 = vmatpush.bf16.msra.mxu0 %v4775_v13 }
 0x3f8   :  { %2852 = vmatpush.bf16.msrb.mxu3 %v4765_v20 }
 0x3fa   :  { %3018 = vmatpush.bf16.msrb.mxu1 %v4783_v15  ;;  %v4791_v15 = vld [vmem:[%s5763_s4 + $0x228] sm:$0xff] }
 0x3fb   :  { %2450 = vmatpush.bf16.msrb.mxu2 %v4735_v41  ;;  %2935 = vmatpush.bf16.msra.mxu0 %v4774_v21  ;;  %v4772_v41 = vld [vmem:[%s5763_s4 + $0x190] sm:$0xff] }
 0x3fe   :  { %3019 = vmatpush.bf16.msrb.mxu1 %v4782_v26  ;;  %v4798_v26 = vld [vmem:[%s5763_s4 + $0x260] sm:$0xff] }
 0x3ff   :  { %2451 = vmatpush.bf16.msrb.mxu2 %v4734_v43  ;;  %v4836_v43 = vld [vmem:[%s5766_s7 + $0x7] ss:$0 sm:$0xff]  ;;  %2936 = vmatpush.bf16.msra.mxu0 %v4773_v32 }
 0x402   :  { %2224 = vmatmul.bf16.gmra.mxu2 %v2162_v11  ;;  %v4758_v11 = vld [vmem:[%s5763_s4 + $0x120] sm:$0xff]  ;;  %3020 = vmatpush.bf16.msrb.mxu1 %v4781_v33 }
 0x403   :  { %2452 = vmatpush.bf16.msrb.mxu2 %v4733_v44  ;;  %2937 = vmatpush.bf16.msra.mxu0 %v4772_v41  ;;  %v2353_v41 = vld [vmem:[#allocation7] sm:$0x3] }
 0x407   :  { %2453 = vmatpush.bf16.msrb.mxu2 %v4732_v48 }
 0x40b   :  { %2454 = vmatpush.bf16.msrb.mxu2 %v4731_v49 }
 0x40f   :  { %2455 = vmatpush.bf16.msrb.mxu2 %v4730_v53  ;;  %v4779_v53 = vld [vmem:[%s5763_s4 + $0x1c8] sm:$0xff] }
 0x412   :  { %2315 = vmatmul.bf16.vlgmr.msra.gmra.mxu2 %v2257_v16  ;;  %v4757_v16 = vld [vmem:[%s5763_s4 + $0x118] sm:$0xff] }
 0x413   :  { %2764 = vmatpush.bf16.msra.mxu2 %v4761_v22 }
 0x417   :  { %2765 = vmatpush.bf16.msra.mxu2 %v4760_v1 }
 0x41b   :  { %2766 = vmatpush.bf16.msra.mxu2 %v4759_v51  ;;  %v4801_v51 = vld [vmem:[%s5763_s4 + $0x278] sm:$0xff] }
 0x41f   :  { %2767 = vmatpush.bf16.msra.mxu2 %v4758_v11  ;;  %v4792_v11 = vld [vmem:[%s5763_s4 + $0x230] sm:$0xff] }
 0x422   :  { %2320 = vmatmul.bf16.gmra.mxu2 %v2258_v18 }
 0x423   :  { %2768 = vmatpush.bf16.msra.mxu2 %v4757_v16 }
 0x427   :  { %2769 = vmatpush.bf16.msra.mxu2 %v4756_v28 }
 0x42b   :  { %2770 = vmatpush.bf16.msra.mxu2 %v4755_v35 }
 0x44d   :  { %v2127_v29 = vpop.f32.mrf.mxu2 }
 0x455   :  { %v5456_v31 = vpop.f32.mrf.mxu2 }
 0x465   :  { %v2132_v34 = vpop.f32.mrf.mxu2 }
 0x466   :  { %2138 = vst [vmem:[#allocation6 + $0x10] sm:$0xf] %v2132_v34 }
 0x46d   :  { %v2134_v37 = vpop.f32.mrf.mxu2  ;;  %v2141_v46 = vld [vmem:[#allocation6 + $0x10] sm:$0xf] }
 0x46e   :  { %v4835_v37 = vld [vmem:[#allocation7 + $0x10] sm:$0xff] }
 0x46f   :  { %v2372_v38 = vpack.c.bf16 %v4835_v37, %v4835_v37  ;;  %v4797_v37 = vld [vmem:[%s5763_s4 + $0x258] sm:$0xff] }
 0x471   :  { %v5615_v48 = vunpack.c.l.b16 %v2372_v38 }
 0x473   :  { %v2395_v22 = vrot.slane %v5615_v48, 1  ;;  %v2543_v25 = vrot.slane %v5615_v48, 2  ;;  %v2711_v20 = vrot.slane %v5615_v48, 4  ;;  %v2795_v28 = vrot.slane %v5615_v48, 5 }
 0x475   :  { %v2220_v42 = vpop.f32.mrf.mxu2 }
 0x476   :  { %v2229_v14 = vadd.f32 %v2220_v42, %v2127_v29  ;;  %v4834_v29 = vld [vmem:[%s5766_s7 + $0x6] ss:$0 sm:$0xff]  ;;  %v4780_v42 = vld [vmem:[%s5763_s4 + $0x1d0] sm:$0xff] }
 0x477   :  { %3021 = vmatpush.bf16.msrb.mxu1 %v4780_v42 }
 0x47b   :  { %3022 = vmatpush.bf16.msrb.mxu1 %v4779_v53 }
 0x47d   :  { %v2222_v45 = vpop.f32.mrf.mxu2 }
 0x47e   :  { %v2230_v7 = vadd.f32 %v2222_v45, %v5456_v31  ;;  %v4764_v31 = vld [vmem:[%s5763_s4 + $0x150] sm:$0xff] }
 0x47f   :  { %2853 = vmatpush.bf16.msrb.mxu3 %v4764_v31  ;;  %3023 = vmatpush.bf16.msrb.mxu1 %v4778_v60  ;;  %v4789_v31 = vld [vmem:[%s5763_s4 + $0x218] sm:$0xff] }
 0x480   :  { %v4817_v60 = vld [vmem:[%s5765_s6 + $0x38] sm:$0xff] }
 0x483   :  { %2854 = vmatpush.bf16.msrb.mxu3 %v4763_v40 }
 0x485   :  { %v2225_v61 = vpop.f32.mrf.mxu2 }
 0x486   :  { %v2231_v63 = vadd.f32 %v2225_v61, %v2141_v46  ;;  %v4754_v61 = vld [vmem:[%s5763_s4 + $0x100] sm:$0xff] }
 0x487   :  { %2771 = vmatpush.bf16.msra.mxu2 %v4754_v61  ;;  %2855 = vmatpush.bf16.msrb.mxu3 %v4762_v50  ;;  %v4795_v61 = vld [vmem:[%s5763_s4 + $0x248] sm:$0xff] }
 0x488   :  { %2234 = vst [vmem:[#allocation6 + $0x10] sm:$0xf] %v2231_v63  ;;  %v4837_v63 = vld [vmem:[%s5766_s7 + $0x8] ss:$0 sm:$0xff] }
 0x48d   :  { %v2227_v47 = vpop.f32.mrf.mxu2 }
 0x48f   :  { %v2237_v17 = vld [vmem:[#allocation6 + $0x10] sm:$0xf] }
 0x495   :  { %v2316_v55 = vpop.f32.mrf.mxu2 }
 0x496   :  { %v2325_v58 = vadd.f32 %v2316_v55, %v2229_v14  ;;  %v4771_v14 = vld [vmem:[%s5763_s4 + $0x188] sm:$0xff] }
 0x497   :  { %2938 = vmatpush.bf16.msra.mxu0 %v4771_v14 }
 0x498   :  { %2328 = vst [vmem:[#allocation6] sm:$0xff] %v2325_v58  ;;  %v2627_v58 = vrot.slane %v5615_v48, 3 }
 0x49b   :  { %2939 = vmatpush.bf16.msra.mxu0 %v4770_v3 }
 0x49d   :  { %v2318_v8 = vpop.f32.mrf.mxu2 }
 0x49e   :  { %v2326_v9 = vadd.f32 %v2318_v8, %v2230_v7 }
 0x4a0   :  { %2329 = vst [vmem:[#allocation6 + $0x8] sm:$0xff] %v2326_v9 }
 0x4a5   :  { %v2321_v18 = vpop.f32.mrf.mxu2 }
 0x4a6   :  { %v2327_v19 = vadd.f32 %v2321_v18, %v2237_v17  ;;  %v4799_v17 = vld [vmem:[%s5763_s4 + $0x268] sm:$0xff] }
 0x4a7   :  { %v2331_v23 = vld [vmem:[#allocation6] ss:$2 sm:$0xff]  ;;  %v2333_v24 = vld [vmem:[#allocation6 + $0x1] ss:$2 sm:$0xff] }
 0x4a8   :  { %v2335_v27 = vmax.f32 %v2331_v23, %v2333_v24  ;;  %2330 = vst [vmem:[#allocation6 + $0x10] sm:$0xf] %v2327_v19  ;;  %v4790_v19 = vld [vmem:[%s5763_s4 + $0x220] sm:$0xff] }
 0x4aa   :  { %v2337_v30 = vadd.f32 %v4834_v29, %v2335_v27 }
 0x4ac   :  { %vm2339_vm0 = vcmp.gt.f32.partialorder %v2337_v30, 0.0  ;;  %v2341_v34 = vmul.f32 0.01, %v2337_v30 }
 0x4ad   :  { %v2323_v36 = vpop.f32.mrf.mxu2 }
 0x4ae   :  { %v2343_v39 = vsel %vm2339_vm0, %v2337_v30, %v2341_v34  ;;  %v2963_v30 = vrot.slane %v5615_v48, 7 }
 0x4af   :  { %v2345_v56 = vmul.f32 %v4836_v43, %v2343_v39  ;;  %v2332_v44 = vld [vmem:[#allocation6 + $0x10] ss:$2 sm:$0x3]  ;;  %v2334_v45 = vld [vmem:[#allocation6 + $0x11] ss:$2 sm:$0x3] }
 0x4b0   :  { %v2336_v46 = vmax.f32 %v2332_v44, %v2334_v45  ;;  %v3047_v44 = vpack.c.bf16 %v2353_v41, %v2353_v41 }
 0x4b1   :  { %v2347_v47 = vadd.f32 %v4837_v63, %v2345_v56  ;;  %v4796_v56 = vld [vmem:[%s5763_s4 + $0x250] sm:$0xff] }
 0x4b2   :  { %v2338_v49 = vadd.f32 %v4834_v29, %v2336_v46  ;;  %v2879_v29 = vrot.slane %v5615_v48, 6  ;;  %v4787_v46 = vld [vmem:[%s5763_s4 + $0x208] sm:$0xff] }
 0x4b3   :  { %v2373_v52 = vpack.c.bf16 %v2347_v47, %v2347_v47 }
 0x4b4   :  { %vm2340_vm2 = vcmp.gt.f32.partialorder %v2338_v49, 0.0  ;;  %v2342_v55 = vmul.f32 0.01, %v2338_v49 }
 0x4b5   :  { %v2394_v54 = vunpack.c.l.b16 %v2373_v52 }
 0x4b6   :  { %v2344_v10 = vsel %vm2340_vm2, %v2338_v49, %v2342_v55  ;;  %v4794_v49 = vld [vmem:[%s5763_s4 + $0x240] sm:$0xff]  ;;  %v4808_v55 = vld [vmem:[%s5764_s5 + $0x30] sm:$0xff] }
 0x4b7   :  { %v2397_v59 = vsel %vm2396_vm1, %v2394_v54, %v2395_v22  ;;  %v2461_v0 = vrot.slane %v2394_v54, 7  ;;  %v2544_v1 = vrot.slane %v2394_v54, 1  ;;  %v2628_v2 = vrot.slane %v2394_v54, 2  ;;  %v4809_v22 = vld [vmem:[%s5764_s5 + $0x38] sm:$0xff] }
 0x4b8   :  { %v2398_v4 = vpack.c.b16 %v2397_v59, %v2397_v59  ;;  %v2346_v13 = vmul.f32 %v4836_v43, %v2344_v10  ;;  %v2712_v18 = vrot.slane %v2394_v54, 3  ;;  %v2796_v21 = vrot.slane %v2394_v54, 4  ;;  %v4788_v43 = vld [vmem:[%s5763_s4 + $0x210] sm:$0xff]  ;;  %v4805_v59 = vld [vmem:[%s5764_s5 + $0x18] sm:$0xff] }
 0x4b9   :  { %v2462_v5 = vsel %vm2396_vm1, %v2461_v0, %v5615_v48  ;;  %v2545_v6 = vsel %vm2396_vm1, %v2544_v1, %v2543_v25  ;;  %v2629_v7 = vsel %vm2396_vm1, %v2628_v2, %v2627_v58  ;;  %v2880_v23 = vrot.slane %v2394_v54, 5  ;;  %v4786_v48 = vld [vmem:[%s5763_s4 + $0x200] sm:$0xff]  ;;  %v4807_v25 = vld [vmem:[%s5764_s5 + $0x28] sm:$0xff]  ;;  %v4804_v2 = vld [vmem:[%s5764_s5 + $0x10] sm:$0xff] }
 0x4ba   :  { %2456 = vmatmul.bf16.vlgmr.msrb.gmra.mxu2 %v2398_v4  ;;  %v2463_v8 = vpack.c.b16 %v2462_v5, %v2462_v5  ;;  %v2546_v9 = vpack.c.b16 %v2545_v6, %v2545_v6  ;;  %v2630_v57 = vpack.c.b16 %v2629_v7, %v2629_v7  ;;  %v2348_v16 = vadd.f32 %v4837_v63, %v2346_v13  ;;  %v4806_v58 = vld [vmem:[%s5764_s5 + $0x20] sm:$0xff] }
 0x4bb   :  { %3105 = vmatpush.bf16.msrb.mxu2 %v4793_v62  ;;  %v2964_v24 = vrot.slane %v2394_v54, 6  ;;  %v2713_v27 = vsel %vm2396_vm1, %v2712_v18, %v2711_v20  ;;  %v2797_v32 = vsel %vm2396_vm1, %v2796_v21, %v2795_v28  ;;  %v2881_v33 = vsel %vm2396_vm1, %v2880_v23, %v2879_v29  ;;  %v4814_v21 = vld [vmem:[%s5765_s6 + $0x20] sm:$0xff]  ;;  %v4812_v29 = vld [vmem:[%s5765_s6 + $0x10] sm:$0xff] }
 0x4bc   :  { %2521 = vmatmul.bf16.vlgmr.msra.gmra.mxu3 %v2463_v8  ;;  %2604 = vmatmul.bf16.vlgmr.msrb.gmra.mxu0 %v2546_v9  ;;  %2351 = vst [vmem:[#allocation7 + $0x8] sm:$0x3] %v2348_v16  ;;  %v2714_v34 = vpack.c.b16 %v2713_v27, %v2713_v27  ;;  %v2798_v39 = vpack.c.b16 %v2797_v32, %v2797_v32  ;;  %v3051_v63 = vunpack.c.l.b16 %v3047_v44  ;;  %v4803_v8 = vld [vmem:[%s5764_s5 + $0x8] sm:$0xff]  ;;  %v4813_v27 = vld [vmem:[%s5765_s6 + $0x18] sm:$0xff] }
 0x4bd   :  { %2688 = vmatmul.bf16.vlgmr.msra.gmra.mxu1 %v2630_v57  ;;  %3188 = vmatpush.bf16.msra.mxu3 %v4801_v51  ;;  %v2965_v35 = vsel %vm2396_vm1, %v2964_v24, %v2963_v30  ;;  %v2882_v40 = vpack.c.b16 %v2881_v33, %v2881_v33  ;;  %v4802_v57 = vld [vmem:[%s5764_s5] sm:$0xff]  ;;  %v4828_v33 = vld [vmem:[%s5766_s7 + $0x9] ss:$0 sm:$0xff] }
 0x4be   :  { %v2966_v42 = vpack.c.b16 %v2965_v35, %v2965_v35  ;;  %v3136_v52 = vrot.slane %v3051_v63, 1  ;;  %3273 = vmatpush.bf16.msrb.mxu0 %v4809_v22  ;;  %3355 = vmatpush.bf16.msra.mxu1 %v4817_v60 }
 0x4bf   :  { %3106 = vmatpush.bf16.msrb.mxu2 %v4792_v11 }
 0x4c1   :  { %3189 = vmatpush.bf16.msra.mxu3 %v4800_v12  ;;  %v4816_v12 = vld [vmem:[%s5765_s6 + $0x30] sm:$0xff] }
 0x4c2   :  { %3274 = vmatpush.bf16.msrb.mxu0 %v4808_v55  ;;  %3356 = vmatpush.bf16.msra.mxu1 %v4816_v12 }
 0x4c3   :  { %3107 = vmatpush.bf16.msrb.mxu2 %v4791_v15  ;;  %v2355_v36 = vld [vmem:[#allocation7 + $0x8] sm:$0x3] }
 0x4c4   :  { %v3048_v38 = vpack.c.bf16 %v2355_v36, %v2355_v36 }
 0x4c5   :  { %3190 = vmatpush.bf16.msra.mxu3 %v4799_v17  ;;  %v4815_v17 = vld [vmem:[%s5765_s6 + $0x28] sm:$0xff] }
 0x4c6   :  { %v3052_v45 = vunpack.c.l.b16 %v3048_v38  ;;  %3275 = vmatpush.bf16.msrb.mxu0 %v4807_v25  ;;  %3357 = vmatpush.bf16.msra.mxu1 %v4815_v17 }
 0x4c7   :  { %3108 = vmatpush.bf16.msrb.mxu2 %v4790_v19 }
 0x4c8   :  { %v3053_v47 = vrot.slane %v3052_v45, 7  ;;  %v3137_v14 = vsel %vm2396_vm1, %v3052_v45, %v3136_v52 }
 0x4c9   :  { %3191 = vmatpush.bf16.msra.mxu3 %v4798_v26  ;;  %v3138_v54 = vpack.c.b16 %v3137_v14, %v3137_v14 }
 0x4ca   :  { %2772 = vmatmul.bf16.vlgmr.msra.gmra.mxu2 %v2714_v34  ;;  %v3054_v50 = vsel %vm2396_vm1, %v3053_v47, %v3051_v63  ;;  %3276 = vmatpush.bf16.msrb.mxu0 %v4806_v58 }
 0x4cb   :  { %3109 = vmatpush.bf16.msrb.mxu2 %v4789_v31  ;;  %v3055_v53 = vpack.c.b16 %v3054_v50, %v3054_v50  ;;  %3358 = vmatpush.bf16.msra.mxu1 %v4814_v21 }
 0x4cc   :  { %2856 = vmatmul.bf16.vlgmr.msrb.gmra.mxu3 %v2798_v39  ;;  %2940 = vmatmul.bf16.vlgmr.msra.gmra.mxu0 %v2882_v40 }
 0x4cd   :  { %3024 = vmatmul.bf16.vlgmr.msrb.gmra.mxu1 %v2966_v42  ;;  %3192 = vmatpush.bf16.msra.mxu3 %v4797_v37  ;;  %v4811_v42 = vld [vmem:[%s5765_s6 + $0x8] sm:$0xff] }
 0x4ce   :  { %3277 = vmatpush.bf16.msrb.mxu0 %v4805_v59 }
 0x4cf   :  { %3110 = vmatpush.bf16.msrb.mxu2 %v4788_v43  ;;  %3359 = vmatpush.bf16.msra.mxu1 %v4813_v27  ;;  %v4810_v43 = vld [vmem:[%s5765_s6] sm:$0xff]  ;;  %s4864_s6 = smov [#allocation8]  }
 0x4d0   :  { %s3377_s29 = sshll.u32 %s4864_s6, 4  ;;  %s3378_s29 = int_to_ptr.vmem [resolvable:$true] %s3377_s29 }
 0x4d1   :  { %3193 = vmatpush.bf16.msra.mxu3 %v4796_v56  ;;  %v4829_v56 = vld [vmem:[%s5766_s7 + $0xa] ss:$0 sm:$0xff] }
 0x4d2   :  { %3278 = vmatpush.bf16.msrb.mxu0 %v4804_v2 }
 0x4d3   :  { %3111 = vmatpush.bf16.msrb.mxu2 %v4787_v46  ;;  %3360 = vmatpush.bf16.msra.mxu1 %v4812_v29 }
 0x4d5   :  { %3194 = vmatpush.bf16.msra.mxu3 %v4795_v61 }
 0x4d6   :  { %3279 = vmatpush.bf16.msrb.mxu0 %v4803_v8 }
 0x4d7   :  { %3112 = vmatpush.bf16.msrb.mxu2 %v4786_v48  ;;  %3361 = vmatpush.bf16.msra.mxu1 %v4811_v42  ;;  %v4830_v48 = vld [vmem:[%s5766_s7 + $0xb] ss:$0 sm:$0xff] }
 0x4d9   :  { %3195 = vmatpush.bf16.msra.mxu3 %v4794_v49 }
 0x4da   :  { %3113 = vmatmul.bf16.vlgmr.msrb.gmra.mxu2 %v3055_v53  ;;  %3280 = vmatpush.bf16.msrb.mxu0 %v4802_v57 }
 0x4db   :  { %3362 = vmatpush.bf16.msra.mxu1 %v4810_v43 }
 0x4dc   :  { %3196 = vmatmul.bf16.vlgmr.msra.gmra.mxu3 %v3138_v54 }
 0x539   :  { %v2605_v62 = vpop.f32.mrf.mxu0 }
 0x53a   :  { %v2689_v0 = vpop.f32.mrf.mxu1 }
 0x53d   :  { %v2457_v1 = vpop.f32.mrf.mxu2 }
 0x53f   :  { %v2522_v3 = vpop.f32.mrf.mxu3 }
 0x540   :  { %v2523_v7 = vadd.f32 %v2522_v3, %v2457_v1 }
 0x541   :  { %v2607_v4 = vpop.f32.mrf.mxu0 }
 0x542   :  { %v2691_v5 = vpop.f32.mrf.mxu1  ;;  %v2609_v10 = vadd.f32 %v2605_v62, %v2523_v7 }
 0x544   :  { %v2693_v15 = vadd.f32 %v2689_v0, %v2609_v10 }
 0x545   :  { %v2459_v6 = vpop.f32.mrf.mxu2 }
 0x547   :  { %v2524_v51 = vpop.f32.mrf.mxu3 }
 0x549   :  { %v2941_v9 = vpop.f32.mrf.mxu0 }
 0x54a   :  { %v3025_v11 = vpop.f32.mrf.mxu1 }
 0x54d   :  { %v2773_v13 = vpop.f32.mrf.mxu2 }
 0x54e   :  { %v2777_v18 = vadd.f32 %v2773_v13, %v2693_v15 }
 0x54f   :  { %v2857_v16 = vpop.f32.mrf.mxu3 }
 0x550   :  { %v2861_v23 = vadd.f32 %v2857_v16, %v2777_v18 }
 0x551   :  { %v2943_v19 = vpop.f32.mrf.mxu0 }
 0x552   :  { %v3027_v20 = vpop.f32.mrf.mxu1  ;;  %v2945_v28 = vadd.f32 %v2941_v9, %v2861_v23 }
 0x554   :  { %v3029_v30 = vadd.f32 %v3025_v11, %v2945_v28 }
 0x555   :  { %v2775_v24 = vpop.f32.mrf.mxu2 }
 0x557   :  { %v2859_v26 = vpop.f32.mrf.mxu3 }
 0x55d   :  { %v3114_v31 = vpop.f32.mrf.mxu2 }
 0x55e   :  { %v3118_v32 = vadd.f32 %v3114_v31, %v3029_v30 }
 0x55f   :  { %v3197_v34 = vpop.f32.mrf.mxu3 }
 0x560   :  { %v3201_v35 = vadd.f32 %v3197_v34, %v3118_v32 }
 0x562   :  { %v3203_v36 = vadd.f32 %v4828_v33, %v3201_v35 }
 0x564   :  { %vm3204_vm3 = vcmp.gt.f32.partialorder %v3203_v36, 0.0  ;;  %v3205_v37 = vmul.f32 0.01, %v3203_v36 }
 0x565   :  { %v3116_v38 = vpop.f32.mrf.mxu2 }
 0x566   :  { %v3206_v39 = vsel %vm3204_vm3, %v3203_v36, %v3205_v37 }
 0x567   :  { %v3223_v40 = vpack.c.bf16 %v3206_v39, %v3206_v39  ;;  %v3199_v41 = vpop.f32.mrf.mxu3 }
 0x569   :  { %3281 = vmatmul.bf16.vlgmr.msrb.gmra.mxu0 %v3223_v40 }
 0x5e6   :  { %v3282_v44 = vpop.f32.mrf.mxu0 }
 0x5e7   :  { %v3283_v45 = vadd.f32 %v4829_v56, %v3282_v44 }
 0x5e9   :  { %vm3286_vm4 = vcmp.gt.f32.partialorder %v3283_v45, 0.0  ;;  %v3287_v46 = vmul.f32 0.01, %v3283_v45 }
 0x5eb   :  { %v3288_v61 = vsel %vm3286_vm4, %v3283_v45, %v3287_v46 }
 0x5ec   :  { %v3305_v63 = vpack.c.bf16 %v3288_v61, %v3288_v61 }
 0x5ee   :  { %v3284_v47 = vpop.f32.mrf.mxu0  ;;  %3363 = vmatmul.bf16.vlgmr.msra.gmra.mxu1 %v3305_v63 }
 0x66b   :  { %v3364_v49 = vpop.f32.mrf.mxu1 }
 0x66c   :  { %v3365_v50 = vadd.f32 %v4830_v48, %v3364_v49 }
 0x66e   :  { %vm3368_vm5 = vcmp.gt.f32.partialorder %v3365_v50, 0.0  ;;  %v3369_v52 = vmul.f32 0.01, %v3365_v50 }
 0x670   :  { %v3370_v14 = vsel %vm3368_vm5, %v3365_v50, %v3369_v52 }
 0x671   :  { %3371 = vst [vmem:[#allocation8] sm:$0x3] %v3370_v14 }
 0x672   :  { %3382 = dma.vmem_to_hbm [thread:$0]  %s3378_s29, 32, %s3380_s0, [#allocation9]  }
 0x673   :  { %v3366_v53 = vpop.f32.mrf.mxu1 }
 0x674   :  { %4862 = dma.done.wait [#allocation9], 32  }
 0x675   :  { %4863 = vsyncadd [#allocation9], 4294967264 }
 0x676   :  { %3387 = vsyncpa [#allocation9], 1 }

</bundles_post_ra>
